<compile_context>
chip_gen: v7x
topology: tpu7x:2x2x1
jax: 0.10.0
libtpu: 0.0.40
codegen_flags: <defaults>
</compile_context>

<pallas_src>
import functools

import jax
import jax.numpy as jnp
from jax.experimental import pallas as pl
from jax.experimental.pallas import tpu as pltpu

NUM_LAYERS = 12   # 6 encoder + 6 decoder Linear layers
LANES = 128


def _round_up(x, m):
    return (x + m - 1) // m * m


def _layer_dims(input_dim):
    dims = [input_dim // (2 ** i) for i in range(7)]          # d, d/2, ..., d/64
    enc = list(zip(dims[:-1], dims[1:]))                      # d -> d/64
    dec = list(zip(dims[::-1][:-1], dims[::-1][1:]))          # d/64 -> d
    return enc + dec                                          # 12 (fan_in, fan_out)


def ae_kernel(x_ref, w_ref, b_ref, out_ref):
    """Fused 12-layer autoencoder forward for one batch tile.

    x_ref   : (TILE_B, PAD)   bf16 input activations (feature dim lane-padded)
    w_ref   : (12, PAD, PAD)  bf16 zero-padded weights, (in, out) layout
    b_ref   : (12, 1, PAD)    f32 zero-padded biases
    out_ref : (TILE_B, PAD)   bf16 output
    """
    h = x_ref[...]                                   # bf16-resident activation
    for i in range(NUM_LAYERS):
        # bf16 MXU operands, f32 accumulation; bias add + activation in f32,
        # then a single cast back to bf16.  Zero-padded weights/biases keep
        # the dead interior lanes at exactly 0 through every ReLU layer.
        acc = jnp.dot(h, w_ref[i], preferred_element_type=jnp.float32)
        acc = acc + b_ref[i]
        if i == NUM_LAYERS - 1:
            acc = jax.nn.sigmoid(acc)                # final decoder layer
        elif i != 5:
            acc = jnp.maximum(acc, 0.0)              # ReLU (skipped at bottleneck)
        h = acc.astype(jnp.bfloat16)
    out_ref[...] = h


def make_ae_params(input_dim, key):
    """Deterministic init mirroring nn.Linear shapes of AE.__init__.

    Returns (raw f32 weights, raw f32 biases, packed bf16 weight slab,
    packed f32 bias slab).  Packed slabs are zero-padded to PAD lanes.
    """
    pairs = _layer_dims(input_dim)
    pad = _round_up(max(input_dim, LANES), LANES)

    w_raw, b_raw = [], []
    w_packed = jnp.zeros((NUM_LAYERS, pad, pad), jnp.float32)
    b_packed = jnp.zeros((NUM_LAYERS, 1, pad), jnp.float32)
    for i, (fan_in, fan_out) in enumerate(pairs):
        key, kw, kb = jax.random.split(key, 3)
        bound = 1.0 / (fan_in ** 0.5)
        # stored as (in_features, out_features) so the kernel computes h @ W + b
        w = jax.random.uniform(kw, (fan_in, fan_out), jnp.float32, -bound, bound)
        b = jax.random.uniform(kb, (fan_out,), jnp.float32, -bound, bound)
        w_raw.append(w)
        b_raw.append(b)
        w_packed = w_packed.at[i, :fan_in, :fan_out].set(w)
        b_packed = b_packed.at[i, 0, :fan_out].set(b)
    return w_raw, b_raw, w_packed.astype(jnp.bfloat16), b_packed


def _pick_tile_b(batch, target_tile):
    """Largest tile <= target that still leaves >= 2 grid tiles (v7x megacore)."""
    if batch < 16:
        return batch                       # single full-extent block is legal
    half = _round_up(pl.cdiv(batch, 2), 8)  # keep sublane-aligned rows
    return max(8, min(target_tile, half))


@functools.partial(jax.jit, static_argnames=("tile_b",))
def ae_forward(x, w_packed, b_packed, *, tile_b=512):
    batch, input_dim = x.shape
    pad = w_packed.shape[-1]
    needs_pad = input_dim != pad
    if needs_pad:
        # TODO(synk): fold this lane-padding into the kernel (masked load) to
        # avoid an extra HBM pass; unreachable when input_dim % 128 == 0.
        x = jnp.pad(x, ((0, 0), (0, pad - input_dim)))
    x = x.astype(jnp.bfloat16)             # no-op when caller already feeds bf16

    tb = _pick_tile_b(batch, tile_b)
    grid = (pl.cdiv(batch, tb),)

    cost = pl.CostEstimate(
        flops=2 * batch * NUM_LAYERS * pad * pad,
        transcendentals=batch * pad,                          # final sigmoid
        bytes_accessed=(batch * pad * 2 * 2                   # x + out (bf16)
                        + w_packed.size * 2                   # bf16 weights
                        + b_packed.size * 4),                 # f32 biases
    )

    out = pl.pallas_call(
        ae_kernel,
        out_shape=jax.ShapeDtypeStruct((batch, pad), jnp.bfloat16),
        grid=grid,
        in_specs=[
            pl.BlockSpec((tb, pad), lambda i: (i, 0)),                  # x tile
            pl.BlockSpec((NUM_LAYERS, pad, pad), lambda i: (0, 0, 0)),  # weights (resident)
            pl.BlockSpec((NUM_LAYERS, 1, pad), lambda i: (0, 0, 0)),    # biases (resident)
        ],
        out_specs=pl.BlockSpec((tb, pad), lambda i: (i, 0)),
        compiler_params=pltpu.CompilerParams(
            dimension_semantics=("parallel",)),               # megacore on v7x
        cost_estimate=cost,
    )(x, w_packed, b_packed)

    if needs_pad:
        out = out[:, :input_dim]
    return out


def ae_forward_ref_f32(x, w_raw, b_raw):
    """Pure-f32 JAX reference (PyTorch-equivalent math)."""
    h = x.astype(jnp.float32)
    for i in range(NUM_LAYERS):
        h = h @ w_raw[i] + b_raw[i]
        if i == NUM_LAYERS - 1:
            h = jax.nn.sigmoid(h)
        elif i != 5:
            h = jnp.maximum(h, 0.0)
    return h


def ae_forward_ref_matched(x, w_packed, b_packed, input_dim):
    """JAX reference using the same bf16-resident math as the kernel."""
    pad = w_packed.shape[-1]
    h = jnp.pad(x, ((0, 0), (0, pad - input_dim))) if input_dim != pad else x
    h = h.astype(jnp.bfloat16)
    for i in range(NUM_LAYERS):
        acc = jnp.dot(h, w_packed[i], preferred_element_type=jnp.float32)
        acc = acc + b_packed[i]
        if i == NUM_LAYERS - 1:
            acc = jax.nn.sigmoid(acc)
        elif i != 5:
            acc = jnp.maximum(acc, 0.0)
        h = acc.astype(jnp.bfloat16)
    return h[:, :input_dim]


if __name__ == "__main__":
    input_dim = 128    # must be divisible by 64 (module constraint); 128 => no padding
    batch = 1024       # with tile_b=512 -> 2 grid tiles (v7x megacore friendly)

    key = jax.random.PRNGKey(0)
    key, kx = jax.random.split(key)
    x_f32 = jax.random.normal(kx, (batch, input_dim), jnp.float32)
    x = x_f32.astype(jnp.bfloat16)          # feed bf16 so the wrapper cast is a no-op

    w_raw, b_raw, w_packed, b_packed = make_ae_params(input_dim, key)

    out = ae_forward(x, w_packed, b_packed, tile_b=512)
    out = jax.block_until_ready(out)
    assert out.shape == (batch, input_dim)
    out_f32 = out.astype(jnp.float32)

    # 1) Structural check against matched-precision (bf16-resident) JAX math.
    ref_matched = ae_forward_ref_matched(x, w_packed, b_packed, input_dim)
    assert jnp.allclose(out_f32, ref_matched.astype(jnp.float32),
                        atol=2e-2, rtol=2e-2), \
        "kernel mismatch vs matched-precision reference"

    # 2) Sanity check vs full-f32 PyTorch-equivalent math (loose tolerance:
    #    bf16 MXU inputs + bf16-resident activations compound rounding over
    #    12 layers; output is a sigmoid in [0, 1]).
    ref_f32 = ae_forward_ref_f32(x, w_raw, b_raw)
    assert jnp.allclose(out_f32, ref_f32, atol=8e-2, rtol=8e-2), \
        "drift vs f32 reference too large"

    # 3) Ragged-batch path (partial last tile via Pallas boundary handling).
    xr = x[:100]
    out_r = jax.block_until_ready(ae_forward(xr, w_packed, b_packed, tile_b=512))
    ref_r = ae_forward_ref_matched(xr, w_packed, b_packed, input_dim)
    assert out_r.shape == (100, input_dim)
    assert jnp.allclose(out_r.astype(jnp.float32), ref_r.astype(jnp.float32),
                        atol=2e-2, rtol=2e-2), \
        "ragged-batch kernel mismatch vs matched-precision reference"

    print("KERNEL_OK")
</pallas_src>

<mosaic_0001>
module attributes {stable_mosaic.version = 11 : i64} {
  func.func @ae_kernel(%arg0: i32, %arg1: memref<512x128xbf16, #tpu.memory_space<vmem>>, %arg2: memref<12x128x128xbf16, #tpu.memory_space<vmem>>, %arg3: memref<12x1x128xf32, #tpu.memory_space<vmem>>, %arg4: memref<512x128xbf16, #tpu.memory_space<vmem>>) attributes {dimension_semantics = [#tpu.dimension_semantics<parallel>], iteration_bounds = array<i64: 2>, scalar_prefetch = 0 : i64, scratch_operands = 0 : i64, tpu.core_type = #tpu.core_type<tc>, window_params = [{transform_indices = @transform_0, window_bounds = array<i64: 512, 128>}, {pipeline_mode = #tpu.pipeline_mode<synchronous>, transform_indices = @transform_1, window_bounds = array<i64: 12, 128, 128>}, {pipeline_mode = #tpu.pipeline_mode<synchronous>, transform_indices = @transform_2, window_bounds = array<i64: 12, 1, 128>}, {transform_indices = @transform_3, window_bounds = array<i64: 512, 128>}]} {
    %c0 = arith.constant 0 : index
    %c0_0 = arith.constant 0 : index
    %0 = vector.load %arg1[%c0, %c0_0] : memref<512x128xbf16, #tpu.memory_space<vmem>>, vector<512x128xbf16>
    %c0_1 = arith.constant 0 : index
    %c0_2 = arith.constant 0 : index
    %c0_3 = arith.constant 0 : index
    %1 = vector.load %arg2[%c0_1, %c0_2, %c0_3] : memref<12x128x128xbf16, #tpu.memory_space<vmem>>, vector<1x128x128xbf16>
    %2 = vector.shape_cast %1 : vector<1x128x128xbf16> to vector<128x128xbf16>
    %cst = arith.constant dense<0.000000e+00> : vector<512x128xf32>
    %3 = tpu.matmul %0, %2, %cst {dimension_numbers = #tpu.dot_dimension_numbers<[1], [0], [0], [1], [0, 0, 1, 1], [], []>} : vector<512x128xbf16>, vector<128x128xbf16>, vector<512x128xf32> -> vector<512x128xf32>
    %c0_4 = arith.constant 0 : index
    %c0_5 = arith.constant 0 : index
    %c0_6 = arith.constant 0 : index
    %4 = vector.load %arg3[%c0_4, %c0_5, %c0_6] : memref<12x1x128xf32, #tpu.memory_space<vmem>>, vector<1x1x128xf32>
    %5 = vector.shape_cast %4 : vector<1x1x128xf32> to vector<1x128xf32>
    %6 = vector.broadcast %5 : vector<1x128xf32> to vector<512x128xf32>
    %7 = arith.addf %3, %6 : vector<512x128xf32>
    %cst_7 = arith.constant 0.000000e+00 : f32
    %8 = vector.broadcast %cst_7 : f32 to vector<512x128xf32>
    %9 = arith.maximumf %7, %8 : vector<512x128xf32>
    %10 = arith.truncf %9 : vector<512x128xf32> to vector<512x128xbf16>
    %c1 = arith.constant 1 : index
    %c0_8 = arith.constant 0 : index
    %c0_9 = arith.constant 0 : index
    %11 = vector.load %arg2[%c1, %c0_8, %c0_9] : memref<12x128x128xbf16, #tpu.memory_space<vmem>>, vector<1x128x128xbf16>
    %12 = vector.shape_cast %11 : vector<1x128x128xbf16> to vector<128x128xbf16>
    %cst_10 = arith.constant dense<0.000000e+00> : vector<512x128xf32>
    %13 = tpu.matmul %10, %12, %cst_10 {dimension_numbers = #tpu.dot_dimension_numbers<[1], [0], [0], [1], [0, 0, 1, 1], [], []>} : vector<512x128xbf16>, vector<128x128xbf16>, vector<512x128xf32> -> vector<512x128xf32>
    %c1_11 = arith.constant 1 : index
    %c0_12 = arith.constant 0 : index
    %c0_13 = arith.constant 0 : index
    %14 = vector.load %arg3[%c1_11, %c0_12, %c0_13] : memref<12x1x128xf32, #tpu.memory_space<vmem>>, vector<1x1x128xf32>
    %15 = vector.shape_cast %14 : vector<1x1x128xf32> to vector<1x128xf32>
    %16 = vector.broadcast %15 : vector<1x128xf32> to vector<512x128xf32>
    %17 = arith.addf %13, %16 : vector<512x128xf32>
    %cst_14 = arith.constant 0.000000e+00 : f32
    %18 = vector.broadcast %cst_14 : f32 to vector<512x128xf32>
    %19 = arith.maximumf %17, %18 : vector<512x128xf32>
    %20 = arith.truncf %19 : vector<512x128xf32> to vector<512x128xbf16>
    %c2 = arith.constant 2 : index
    %c0_15 = arith.constant 0 : index
    %c0_16 = arith.constant 0 : index
    %21 = vector.load %arg2[%c2, %c0_15, %c0_16] : memref<12x128x128xbf16, #tpu.memory_space<vmem>>, vector<1x128x128xbf16>
    %22 = vector.shape_cast %21 : vector<1x128x128xbf16> to vector<128x128xbf16>
    %cst_17 = arith.constant dense<0.000000e+00> : vector<512x128xf32>
    %23 = tpu.matmul %20, %22, %cst_17 {dimension_numbers = #tpu.dot_dimension_numbers<[1], [0], [0], [1], [0, 0, 1, 1], [], []>} : vector<512x128xbf16>, vector<128x128xbf16>, vector<512x128xf32> -> vector<512x128xf32>
    %c2_18 = arith.constant 2 : index
    %c0_19 = arith.constant 0 : index
    %c0_20 = arith.constant 0 : index
    %24 = vector.load %arg3[%c2_18, %c0_19, %c0_20] : memref<12x1x128xf32, #tpu.memory_space<vmem>>, vector<1x1x128xf32>
    %25 = vector.shape_cast %24 : vector<1x1x128xf32> to vector<1x128xf32>
    %26 = vector.broadcast %25 : vector<1x128xf32> to vector<512x128xf32>
    %27 = arith.addf %23, %26 : vector<512x128xf32>
    %cst_21 = arith.constant 0.000000e+00 : f32
    %28 = vector.broadcast %cst_21 : f32 to vector<512x128xf32>
    %29 = arith.maximumf %27, %28 : vector<512x128xf32>
    %30 = arith.truncf %29 : vector<512x128xf32> to vector<512x128xbf16>
    %c3 = arith.constant 3 : index
    %c0_22 = arith.constant 0 : index
    %c0_23 = arith.constant 0 : index
    %31 = vector.load %arg2[%c3, %c0_22, %c0_23] : memref<12x128x128xbf16, #tpu.memory_space<vmem>>, vector<1x128x128xbf16>
    %32 = vector.shape_cast %31 : vector<1x128x128xbf16> to vector<128x128xbf16>
    %cst_24 = arith.constant dense<0.000000e+00> : vector<512x128xf32>
    %33 = tpu.matmul %30, %32, %cst_24 {dimension_numbers = #tpu.dot_dimension_numbers<[1], [0], [0], [1], [0, 0, 1, 1], [], []>} : vector<512x128xbf16>, vector<128x128xbf16>, vector<512x128xf32> -> vector<512x128xf32>
    %c3_25 = arith.constant 3 : index
    %c0_26 = arith.constant 0 : index
    %c0_27 = arith.constant 0 : index
    %34 = vector.load %arg3[%c3_25, %c0_26, %c0_27] : memref<12x1x128xf32, #tpu.memory_space<vmem>>, vector<1x1x128xf32>
    %35 = vector.shape_cast %34 : vector<1x1x128xf32> to vector<1x128xf32>
    %36 = vector.broadcast %35 : vector<1x128xf32> to vector<512x128xf32>
    %37 = arith.addf %33, %36 : vector<512x128xf32>
    %cst_28 = arith.constant 0.000000e+00 : f32
    %38 = vector.broadcast %cst_28 : f32 to vector<512x128xf32>
    %39 = arith.maximumf %37, %38 : vector<512x128xf32>
    %40 = arith.truncf %39 : vector<512x128xf32> to vector<512x128xbf16>
    %c4 = arith.constant 4 : index
    %c0_29 = arith.constant 0 : index
    %c0_30 = arith.constant 0 : index
    %41 = vector.load %arg2[%c4, %c0_29, %c0_30] : memref<12x128x128xbf16, #tpu.memory_space<vmem>>, vector<1x128x128xbf16>
    %42 = vector.shape_cast %41 : vector<1x128x128xbf16> to vector<128x128xbf16>
    %cst_31 = arith.constant dense<0.000000e+00> : vector<512x128xf32>
    %43 = tpu.matmul %40, %42, %cst_31 {dimension_numbers = #tpu.dot_dimension_numbers<[1], [0], [0], [1], [0, 0, 1, 1], [], []>} : vector<512x128xbf16>, vector<128x128xbf16>, vector<512x128xf32> -> vector<512x128xf32>
    %c4_32 = arith.constant 4 : index
    %c0_33 = arith.constant 0 : index
    %c0_34 = arith.constant 0 : index
    %44 = vector.load %arg3[%c4_32, %c0_33, %c0_34] : memref<12x1x128xf32, #tpu.memory_space<vmem>>, vector<1x1x128xf32>
    %45 = vector.shape_cast %44 : vector<1x1x128xf32> to vector<1x128xf32>
    %46 = vector.broadcast %45 : vector<1x128xf32> to vector<512x128xf32>
    %47 = arith.addf %43, %46 : vector<512x128xf32>
    %cst_35 = arith.constant 0.000000e+00 : f32
    %48 = vector.broadcast %cst_35 : f32 to vector<512x128xf32>
    %49 = arith.maximumf %47, %48 : vector<512x128xf32>
    %50 = arith.truncf %49 : vector<512x128xf32> to vector<512x128xbf16>
    %c5 = arith.constant 5 : index
    %c0_36 = arith.constant 0 : index
    %c0_37 = arith.constant 0 : index
    %51 = vector.load %arg2[%c5, %c0_36, %c0_37] : memref<12x128x128xbf16, #tpu.memory_space<vmem>>, vector<1x128x128xbf16>
    %52 = vector.shape_cast %51 : vector<1x128x128xbf16> to vector<128x128xbf16>
    %cst_38 = arith.constant dense<0.000000e+00> : vector<512x128xf32>
    %53 = tpu.matmul %50, %52, %cst_38 {dimension_numbers = #tpu.dot_dimension_numbers<[1], [0], [0], [1], [0, 0, 1, 1], [], []>} : vector<512x128xbf16>, vector<128x128xbf16>, vector<512x128xf32> -> vector<512x128xf32>
    %c5_39 = arith.constant 5 : index
    %c0_40 = arith.constant 0 : index
    %c0_41 = arith.constant 0 : index
    %54 = vector.load %arg3[%c5_39, %c0_40, %c0_41] : memref<12x1x128xf32, #tpu.memory_space<vmem>>, vector<1x1x128xf32>
    %55 = vector.shape_cast %54 : vector<1x1x128xf32> to vector<1x128xf32>
    %56 = vector.broadcast %55 : vector<1x128xf32> to vector<512x128xf32>
    %57 = arith.addf %53, %56 : vector<512x128xf32>
    %58 = arith.truncf %57 : vector<512x128xf32> to vector<512x128xbf16>
    %c6 = arith.constant 6 : index
    %c0_42 = arith.constant 0 : index
    %c0_43 = arith.constant 0 : index
    %59 = vector.load %arg2[%c6, %c0_42, %c0_43] : memref<12x128x128xbf16, #tpu.memory_space<vmem>>, vector<1x128x128xbf16>
    %60 = vector.shape_cast %59 : vector<1x128x128xbf16> to vector<128x128xbf16>
    %cst_44 = arith.constant dense<0.000000e+00> : vector<512x128xf32>
    %61 = tpu.matmul %58, %60, %cst_44 {dimension_numbers = #tpu.dot_dimension_numbers<[1], [0], [0], [1], [0, 0, 1, 1], [], []>} : vector<512x128xbf16>, vector<128x128xbf16>, vector<512x128xf32> -> vector<512x128xf32>
    %c6_45 = arith.constant 6 : index
    %c0_46 = arith.constant 0 : index
    %c0_47 = arith.constant 0 : index
    %62 = vector.load %arg3[%c6_45, %c0_46, %c0_47] : memref<12x1x128xf32, #tpu.memory_space<vmem>>, vector<1x1x128xf32>
    %63 = vector.shape_cast %62 : vector<1x1x128xf32> to vector<1x128xf32>
    %64 = vector.broadcast %63 : vector<1x128xf32> to vector<512x128xf32>
    %65 = arith.addf %61, %64 : vector<512x128xf32>
    %cst_48 = arith.constant 0.000000e+00 : f32
    %66 = vector.broadcast %cst_48 : f32 to vector<512x128xf32>
    %67 = arith.maximumf %65, %66 : vector<512x128xf32>
    %68 = arith.truncf %67 : vector<512x128xf32> to vector<512x128xbf16>
    %c7 = arith.constant 7 : index
    %c0_49 = arith.constant 0 : index
    %c0_50 = arith.constant 0 : index
    %69 = vector.load %arg2[%c7, %c0_49, %c0_50] : memref<12x128x128xbf16, #tpu.memory_space<vmem>>, vector<1x128x128xbf16>
    %70 = vector.shape_cast %69 : vector<1x128x128xbf16> to vector<128x128xbf16>
    %cst_51 = arith.constant dense<0.000000e+00> : vector<512x128xf32>
    %71 = tpu.matmul %68, %70, %cst_51 {dimension_numbers = #tpu.dot_dimension_numbers<[1], [0], [0], [1], [0, 0, 1, 1], [], []>} : vector<512x128xbf16>, vector<128x128xbf16>, vector<512x128xf32> -> vector<512x128xf32>
    %c7_52 = arith.constant 7 : index
    %c0_53 = arith.constant 0 : index
    %c0_54 = arith.constant 0 : index
    %72 = vector.load %arg3[%c7_52, %c0_53, %c0_54] : memref<12x1x128xf32, #tpu.memory_space<vmem>>, vector<1x1x128xf32>
    %73 = vector.shape_cast %72 : vector<1x1x128xf32> to vector<1x128xf32>
    %74 = vector.broadcast %73 : vector<1x128xf32> to vector<512x128xf32>
    %75 = arith.addf %71, %74 : vector<512x128xf32>
    %cst_55 = arith.constant 0.000000e+00 : f32
    %76 = vector.broadcast %cst_55 : f32 to vector<512x128xf32>
    %77 = arith.maximumf %75, %76 : vector<512x128xf32>
    %78 = arith.truncf %77 : vector<512x128xf32> to vector<512x128xbf16>
    %c8 = arith.constant 8 : index
    %c0_56 = arith.constant 0 : index
    %c0_57 = arith.constant 0 : index
    %79 = vector.load %arg2[%c8, %c0_56, %c0_57] : memref<12x128x128xbf16, #tpu.memory_space<vmem>>, vector<1x128x128xbf16>
    %80 = vector.shape_cast %79 : vector<1x128x128xbf16> to vector<128x128xbf16>
    %cst_58 = arith.constant dense<0.000000e+00> : vector<512x128xf32>
    %81 = tpu.matmul %78, %80, %cst_58 {dimension_numbers = #tpu.dot_dimension_numbers<[1], [0], [0], [1], [0, 0, 1, 1], [], []>} : vector<512x128xbf16>, vector<128x128xbf16>, vector<512x128xf32> -> vector<512x128xf32>
    %c8_59 = arith.constant 8 : index
    %c0_60 = arith.constant 0 : index
    %c0_61 = arith.constant 0 : index
    %82 = vector.load %arg3[%c8_59, %c0_60, %c0_61] : memref<12x1x128xf32, #tpu.memory_space<vmem>>, vector<1x1x128xf32>
    %83 = vector.shape_cast %82 : vector<1x1x128xf32> to vector<1x128xf32>
    %84 = vector.broadcast %83 : vector<1x128xf32> to vector<512x128xf32>
    %85 = arith.addf %81, %84 : vector<512x128xf32>
    %cst_62 = arith.constant 0.000000e+00 : f32
    %86 = vector.broadcast %cst_62 : f32 to vector<512x128xf32>
    %87 = arith.maximumf %85, %86 : vector<512x128xf32>
    %88 = arith.truncf %87 : vector<512x128xf32> to vector<512x128xbf16>
    %c9 = arith.constant 9 : index
    %c0_63 = arith.constant 0 : index
    %c0_64 = arith.constant 0 : index
    %89 = vector.load %arg2[%c9, %c0_63, %c0_64] : memref<12x128x128xbf16, #tpu.memory_space<vmem>>, vector<1x128x128xbf16>
    %90 = vector.shape_cast %89 : vector<1x128x128xbf16> to vector<128x128xbf16>
    %cst_65 = arith.constant dense<0.000000e+00> : vector<512x128xf32>
    %91 = tpu.matmul %88, %90, %cst_65 {dimension_numbers = #tpu.dot_dimension_numbers<[1], [0], [0], [1], [0, 0, 1, 1], [], []>} : vector<512x128xbf16>, vector<128x128xbf16>, vector<512x128xf32> -> vector<512x128xf32>
    %c9_66 = arith.constant 9 : index
    %c0_67 = arith.constant 0 : index
    %c0_68 = arith.constant 0 : index
    %92 = vector.load %arg3[%c9_66, %c0_67, %c0_68] : memref<12x1x128xf32, #tpu.memory_space<vmem>>, vector<1x1x128xf32>
    %93 = vector.shape_cast %92 : vector<1x1x128xf32> to vector<1x128xf32>
    %94 = vector.broadcast %93 : vector<1x128xf32> to vector<512x128xf32>
    %95 = arith.addf %91, %94 : vector<512x128xf32>
    %cst_69 = arith.constant 0.000000e+00 : f32
    %96 = vector.broadcast %cst_69 : f32 to vector<512x128xf32>
    %97 = arith.maximumf %95, %96 : vector<512x128xf32>
    %98 = arith.truncf %97 : vector<512x128xf32> to vector<512x128xbf16>
    %c10 = arith.constant 10 : index
    %c0_70 = arith.constant 0 : index
    %c0_71 = arith.constant 0 : index
    %99 = vector.load %arg2[%c10, %c0_70, %c0_71] : memref<12x128x128xbf16, #tpu.memory_space<vmem>>, vector<1x128x128xbf16>
    %100 = vector.shape_cast %99 : vector<1x128x128xbf16> to vector<128x128xbf16>
    %cst_72 = arith.constant dense<0.000000e+00> : vector<512x128xf32>
    %101 = tpu.matmul %98, %100, %cst_72 {dimension_numbers = #tpu.dot_dimension_numbers<[1], [0], [0], [1], [0, 0, 1, 1], [], []>} : vector<512x128xbf16>, vector<128x128xbf16>, vector<512x128xf32> -> vector<512x128xf32>
    %c10_73 = arith.constant 10 : index
    %c0_74 = arith.constant 0 : index
    %c0_75 = arith.constant 0 : index
    %102 = vector.load %arg3[%c10_73, %c0_74, %c0_75] : memref<12x1x128xf32, #tpu.memory_space<vmem>>, vector<1x1x128xf32>
    %103 = vector.shape_cast %102 : vector<1x1x128xf32> to vector<1x128xf32>
    %104 = vector.broadcast %103 : vector<1x128xf32> to vector<512x128xf32>
    %105 = arith.addf %101, %104 : vector<512x128xf32>
    %cst_76 = arith.constant 0.000000e+00 : f32
    %106 = vector.broadcast %cst_76 : f32 to vector<512x128xf32>
    %107 = arith.maximumf %105, %106 : vector<512x128xf32>
    %108 = arith.truncf %107 : vector<512x128xf32> to vector<512x128xbf16>
    %c11 = arith.constant 11 : index
    %c0_77 = arith.constant 0 : index
    %c0_78 = arith.constant 0 : index
    %109 = vector.load %arg2[%c11, %c0_77, %c0_78] : memref<12x128x128xbf16, #tpu.memory_space<vmem>>, vector<1x128x128xbf16>
    %110 = vector.shape_cast %109 : vector<1x128x128xbf16> to vector<128x128xbf16>
    %cst_79 = arith.constant dense<0.000000e+00> : vector<512x128xf32>
    %111 = tpu.matmul %108, %110, %cst_79 {dimension_numbers = #tpu.dot_dimension_numbers<[1], [0], [0], [1], [0, 0, 1, 1], [], []>} : vector<512x128xbf16>, vector<128x128xbf16>, vector<512x128xf32> -> vector<512x128xf32>
    %c11_80 = arith.constant 11 : index
    %c0_81 = arith.constant 0 : index
    %c0_82 = arith.constant 0 : index
    %112 = vector.load %arg3[%c11_80, %c0_81, %c0_82] : memref<12x1x128xf32, #tpu.memory_space<vmem>>, vector<1x1x128xf32>
    %113 = vector.shape_cast %112 : vector<1x1x128xf32> to vector<1x128xf32>
    %114 = vector.broadcast %113 : vector<1x128xf32> to vector<512x128xf32>
    %115 = arith.addf %111, %114 : vector<512x128xf32>
    %116 = arith.negf %115 : vector<512x128xf32>
    %117 = math.exp %116 : vector<512x128xf32>
    %cst_83 = arith.constant 1.000000e+00 : f32
    %118 = vector.broadcast %cst_83 : f32 to vector<512x128xf32>
    %119 = arith.addf %118, %117 : vector<512x128xf32>
    %120 = arith.divf %118, %119 : vector<512x128xf32>
    %121 = arith.truncf %120 : vector<512x128xf32> to vector<512x128xbf16>
    %c0_84 = arith.constant 0 : index
    %c0_85 = arith.constant 0 : index
    %122 = vector.load %arg4[%c0_84, %c0_85] : memref<512x128xbf16, #tpu.memory_space<vmem>>, vector<512x128xbf16>
    tpu.vector_store %arg4[%c0_84, %c0_85], %121 {strides = array<i32>} : memref<512x128xbf16, #tpu.memory_space<vmem>>, vector<512x128xbf16>,
    return
  }
  func.func @transform_0(%arg0: i32) -> (i32, i32) {
    %c0_i32 = arith.constant 0 : i32
    %c0_i32_0 = arith.constant 0 : i32
    return %arg0, %c0_i32 : i32, i32
  }
  func.func @transform_1(%arg0: i32) -> (i32, i32, i32) {
    %c0_i32 = arith.constant 0 : i32
    %c0_i32_0 = arith.constant 0 : i32
    %c0_i32_1 = arith.constant 0 : i32
    %c0_i32_2 = arith.constant 0 : i32
    return %c0_i32, %c0_i32_0, %c0_i32_1 : i32, i32, i32
  }
  func.func @transform_2(%arg0: i32) -> (i32, i32, i32) {
    %c0_i32 = arith.constant 0 : i32
    %c0_i32_0 = arith.constant 0 : i32
    %c0_i32_1 = arith.constant 0 : i32
    %c0_i32_2 = arith.constant 0 : i32
    return %c0_i32, %c0_i32_0, %c0_i32_1 : i32, i32, i32
  }
  func.func @transform_3(%arg0: i32) -> (i32, i32) {
    %c0_i32 = arith.constant 0 : i32
    %c0_i32_0 = arith.constant 0 : i32
    return %arg0, %c0_i32 : i32, i32
  }
}

</mosaic_0001>

<bundles_post_ra>
// kernel: ae_forward.1
= control target key start
LH: loop header
LB: loop body
LE: loop exit
PB: predicated region body
PF: predicated region fallthrough
CT: control target
= control target key end

     0   :  { %8 = vsyncpa [#allocation3], 0  ;;  %s10354_s0 = inlined_call_operand.hbm [shape: bf16[1024,128], index: 0, kind: input, shape index: {}]   ;;  %s10355_s1 = inlined_call_operand.hbm [shape: bf16[12,128,128], index: 1, kind: input, shape index: {}]   ;;  %s10356_s2 = inlined_call_operand.hbm [shape: f32[12,1,128], index: 2, kind: input, shape index: {}]   ;;  %s10357_s3 = inlined_call_operand.hbm [shape: bf16[1024,128], index: 3, kind: output, shape index: {}]  }
   0x1   :  { %10 = vsyncpa [#allocation3 + $0x1], 0 }
   0x2   :  { %11 = vsyncpa [#allocation6], 0 }
   0x3   :  { %12 = vsyncpa [#allocation4], 0 }
   0x4   :  { %14 = vsyncpa [#allocation4 + $0x1], 0  ;;  %s9249_s12 = smov 0   ;;  %s9251_s13 = smov 0  }
   0x5   :  { %s9253_s14 = smov 0   ;;  %s9255_s15 = smov 0  }
   0x6 LB: > { %s9270_s16 = sadd.s32 4294967295, %s9217_s15   ;;  %s6621_s17 = sadd.s32 4294967294, %s9217_s15   ;;  %s9217_s15 = sphi %s9255_s15, %s10377_s15   ;;  %s9213_s14 = sphi %s9253_s14, %s10376_s14   ;;  %s9209_s13 = sphi %s9251_s13, %s10375_s13   ;;  %s9205_s12 = sphi %s9249_s12, %s10374_s12  }
   0x7   : > { %p40_p0 = scmp.ne.s32.totalorder %s9209_s13, %s9205_s12  ;;  %p10358_p1 = scmp.eq.s32.totalorder %s9270_s16, 0 }
   0x8   : > { %p112_p3 = scmp.eq.s32.totalorder %s6621_s17, 1  ;;  %p6622_p5 = scmp.ge.s32.totalorder %s9217_s15, 1 }
   0x9   : > { %p9279_p4 = por %p10358_p1, %p40_p0  ;;  %p119_p7 = scmp.lt.s32.totalorder %s9217_s15, 3 }
   0xa   : > { %p9284_p6 = por %p112_p3, %p40_p0  ;;  %s9219_s21 = smov [#allocation5]  }
   0xb   : > { %s10361_s18 = scalar_select %p9279_p4, 1, 0 }
   0xc   : > { %s10362_s19 = scalar_select %p9284_p6, 1, 0 }
   0xd   : > { %p9289_p8 = pnand %p6622_p5, %p119_p7  ;;  %s131_s22 = sshll.u32 %s9219_s21, 4  ;;  %s9293_s22 = int_to_ptr.vmem [resolvable:$true] %s131_s22 }
   0xe   : > { %s9220_s24 = smov [#allocation7]   ;;  %s9061_s28 = scalar_lea.hbm %s10355_s1, 12288 }
   0xf   : > { %p8616_p9 = pneg %p9289_p8  ;;  %s144_s25 = sshll.u32 %s9220_s24, 4  ;;  %s9304_s25 = int_to_ptr.vmem [resolvable:$true] %s144_s25 }
  0x10   : > { %p9062_p12 = scmp.ne.s32.totalorder %s10355_s1, %s9061_s28  ;;  %p9068_p5 = scmp.lt.u32.totalorder %s9061_s28, %s10355_s1 }
  0x11   : > { %p9300_p11 = pnand %p8616_p9, %p10358_p1 }
  0x13   : > { %p9063_p13 = pneg %p9300_p11 }
  0x15   : > { %p9064_p0 = pnand %p9063_p13, %p9062_p12 }
  0x17   : > { %p9065_p3 = pneg %p9064_p0 }
  0x19   : > { %p9070_p7 = pnand %p9068_p5, %p9065_p3 }
  0x1b   : > { %9073 = shalt.err (!%p9070_p7)
}
  0x1c   : > { %s9074_s6 = scalar_lea.vmem %s9293_s22, 12288  ;;  %p9082_p2 = scmp.lt.s32.totalorder %s9293_s22, %s9293_s22 }
  0x1d   : > { %p9075_p9 = scmp.ne.s32.totalorder %s9293_s22, %s9074_s6  ;;  %p9083_p12 = scmp.lt.s32.totalorder %s9074_s6, %s9074_s6 }
  0x1f   : > { %p9077_p10 = pnand %p9075_p9, %p9063_p13  ;;  %p9084_p0 = por %p9083_p12, %p9082_p2 }
  0x21   : > { %p9078_p1 = pneg %p9077_p10 }
  0x23   : > { %p9085_p6 = pnand %p9084_p0, %p9078_p1 }
  0x25   : > { %9088 = shalt.err (!%p9085_p6)
}
  0x26   : > { %s9221_s7 = smov 64   ;;  %s9222_s8 = smov 4  }
  0x27   : > { %8619 = dma.hbm_to_vmem [thread:$0]  (!%p9300_p11), %s10355_s1, 12288, %s9293_s22, [#allocation6], %s9221_s7, %s9221_s7, %s9222_s8  }
  0x28   : > { %s9089_s21 = scalar_lea.hbm %s10356_s2, 192 }
  0x29   : > { %p9090_p1 = scmp.ne.s32.totalorder %s10356_s2, %s9089_s21  ;;  %p9096_p10 = scmp.lt.u32.totalorder %s9089_s21, %s10356_s2 }
  0x2b   : > { %p9092_p2 = pnand %p9090_p1, %p9063_p13 }
  0x2d   : > { %p9093_p6 = pneg %p9092_p2 }
  0x2f   : > { %p9098_p3 = pnand %p9096_p10, %p9093_p6 }
  0x31   : > { %9101 = shalt.err (!%p9098_p3)
}
  0x32   : > { %s9102_s22 = scalar_lea.vmem %s9304_s25, 192  ;;  %p9110_p12 = scmp.lt.s32.totalorder %s9304_s25, %s9304_s25 }
  0x33   : > { %p9103_p5 = scmp.ne.s32.totalorder %s9304_s25, %s9102_s22  ;;  %p9111_p0 = scmp.lt.s32.totalorder %s9102_s22, %s9102_s22 }
  0x35   : > { %p9105_p7 = pnand %p9103_p5, %p9063_p13  ;;  %p9112_p1 = por %p9111_p0, %p9110_p12 }
  0x37   : > { %p9106_p9 = pneg %p9105_p7 }
  0x39   : > { %p9113_p2 = pnand %p9112_p1, %p9106_p9 }
  0x3b   : > { %9116 = shalt.err (!%p9113_p2)
}
  0x3c   : > { %s9223_s29 = smov 16   ;;  %s9224_s30 = smov 1  }
  0x3d   : > { %8622 = dma.hbm_to_vmem [thread:$0]  (!%p9300_p11), %s10356_s2, 192, %s9304_s25, [#allocation6], %s9223_s29, %s9223_s29, %s9224_s30  }
  0x3e   : > { %s9362_s6 = sadd.s32 1, %s9217_s15   ;;  %s27_s10 = sadd.s32 1, %s9213_s14 }
  0x3f   : > { %s24_s9 = ssub.s32 %s9217_s15, %s9362_s6  ;;  %p34_p6 = scmp.ne.s32.totalorder %s9213_s14, %s9209_s13 }
  0x40   : > { %p25_p13 = scmp.eq.s32.totalorder %s24_s9, 0  ;;  %p35_p10 = scmp.eq.s32.totalorder %s9217_s15, 0 }
  0x41   : > { %p10365_p5 = scmp.eq.s32.totalorder %s9270_s16, 1  ;;  %p8633_p9 = scmp.lt.s32.totalorder %s9217_s15, 2 }
  0x42   : > { %s9371_s11 = scalar_select %p25_p13, %s9213_s14, %s27_s10  }
  0x43   : > { %p36_p3 = por %p35_p10, %p34_p6  ;;  %p9375_p7 = por %p10365_p5, %p34_p6 }
  0x44   : > { %s158_s23 = sand.u32 1, %s9213_s14   ;;  %s6907_s25 = sshll.u32 %s9217_s15, 12 }
  0x45   : > { %s10366_s17 = scalar_select %p9375_p7, 1, 0 }
  0x46   : > { %s6626_s21 = sshll.u32 %s158_s23, 8  ;;  %s9385_s27 = scalar_lea.hbm %s10354_s0, %s6907_s25 }
  0x47   : > { %s162_s28 = scalar_lea.vmem [#allocation2], %s6626_s21  ;;  %p9389_p11 = pnand %p8633_p9, %p36_p3 }
  0x48   : > { %s169_s22 = sshll.u32 %s162_s28, 4  ;;  %s9393_s30 = scalar_lea.sflag [#allocation3], %s158_s23  ;;  %s9387_s22 = int_to_ptr.vmem [resolvable:$true] %s169_s22 }
  0x49   : > { %s9117_s4 = scalar_lea.hbm %s9385_s27, 4096  ;;  %p9119_p0 = pneg %p9389_p11 }
  0x4a   : > { %p9118_p12 = scmp.ne.s32.totalorder %s9385_s27, %s9117_s4  ;;  %s9122_s10 = scalar_lea.hbm %s10354_s0, 8192 }
  0x4b   : > { %p9123_p13 = scmp.lt.u32.totalorder %s9385_s27, %s10354_s0  ;;  %p9124_p6 = scmp.lt.u32.totalorder %s9122_s10, %s9117_s4 }
  0x4c   : > { %p9120_p1 = pnand %p9119_p0, %p9118_p12  ;;  %p9126_p3 = scmp.lt.u32.totalorder %s9117_s4, %s9385_s27 }
  0x4d   : > { %p9125_p10 = por %p9124_p6, %p9123_p13 }
  0x4e   : > { %p9121_p2 = pneg %p9120_p1 }
  0x4f   : > { %p9127_p5 = por %p9126_p3, %p9125_p10 }
  0x51   : > { %p9128_p9 = pnand %p9127_p5, %p9121_p2 }
  0x53   : > { %9131 = shalt.err (!%p9128_p9)
}
  0x54   : > { %s9132_s23 = scalar_lea.vmem %s9387_s22, 4096  ;;  %s9225_s24 = smov [#allocation2]  }
  0x55   : > { %p9133_p12 = scmp.ne.s32.totalorder %s9387_s22, %s9132_s23  ;;  %s9137_s26 = sshll.u32 %s9225_s24, 4  ;;  %s9138_s26 = int_to_ptr.vmem [resolvable:$false] %s9137_s26 }
  0x56   : > { %s9139_s28 = scalar_lea.vmem %s9138_s26, 8192  ;;  %p9140_p4 = scmp.lt.s32.totalorder %s9387_s22, %s9138_s26 }
  0x57   : > { %p9135_p1 = pnand %p9133_p12, %p9119_p0  ;;  %p9141_p13 = scmp.lt.s32.totalorder %s9139_s28, %s9132_s23 }
  0x59   : > { %p9136_p7 = pneg %p9135_p1  ;;  %p9142_p6 = por %p9141_p13, %p9140_p4 }
  0x5b   : > { %p9143_p10 = pnand %p9142_p6, %p9136_p7 }
  0x5d   : > { %9146 = shalt.err (!%p9143_p10)
}
  0x5e   : > { %8626 = dma.hbm_to_vmem [thread:$0]  (!%p9389_p11), %s9385_s27, 4096, %s9387_s22, %s9393_s30, %s9221_s7, %s9221_s7, %s9222_s8  }
  0x5f   : > { %181 = sbr.rel (%p9289_p8) target bundleno = 2963 (0xb93), region = 32  ;;  %s9427_s4 = sand.u32 (!%p9289_p8), 1, %s9209_s13  }
  0x60   : > { %s6630_s5 = sshll.u32 (!%p9289_p8), %s9427_s4, 8  ;;  %s184_s9 = scalar_lea.sflag (!%p9289_p8), [#allocation3], %s9427_s4 }
  0x61   : > { %s9433_s29 = scalar_lea.vmem (!%p9289_p8), [#allocation2], %s6630_s5  ;;  %p10368_p4 = scmp.ne.s32.totalorder (!%p9289_p8), %s10361_s18, 0 }
  0x66   : > { %9192 = dma.done.wait (%p10368_p4), %s184_s9, 4096  }
  0x67   : > { %9194 = vsyncadd (%p10368_p4), %s184_s9, 4294963200  ;;  %p10369_p7 = scmp.eq.s32.totalorder %s9270_s16, 0 }
  0x69   : > { %9196 = dma.done.wait (%p10369_p7), [#allocation6], 12480   ;;  %p10370_p8 = pmov %p10369_p7 }
  0x6a   : > { %v8677_v0 = vld [vmem:[#allocation5] sm:$0xff]   ;;  %v8678_v1 = vld [vmem:[#allocation5 + $0x8] sm:$0xff]   ;;  %v8679_v2 = vld [vmem:[#allocation5 + $0x10] sm:$0xff]   ;;  %s10221_s18 = scalar_lea.vmem [#allocation8], %s6630_s5  ;;  %s6972_s20 = sshll.u32 %s9270_s16, 12 }
  0x6b   : > { %9198 = vsyncadd (%p10370_p8), [#allocation6], 4294954816  ;;  %7644 = vmatprep.subr.bf16.mxu0 %v8677_v0  ;;  %v8680_v3 = vld [vmem:[#allocation5 + $0x18] sm:$0xff]   ;;  %v8685_v4 = vld [vmem:[%s9433_s29] sm:$0xff]   ;;  %s6529_s7 = sshll.u32 %s10221_s18, 4  ;;  %s10306_s22 = scalar_lea.hbm %s10357_s3, %s6972_s20  ;;  %s10308_s7 = int_to_ptr.vmem [resolvable:$true] %s6529_s7 }
  0x6c   : > { %7645 = vmatpush3.bf16.msra.mxu0 %v8677_v0  ;;  %7660 = vmatprep.mubr.bf16.mxu0 %v8685_v4  ;;  %v8681_v5 = vld [vmem:[#allocation5 + $0x20] sm:$0xff]   ;;  %v8682_v6 = vld [vmem:[#allocation5 + $0x28] sm:$0xff]   ;;  %v8683_v7 = vld [vmem:[#allocation5 + $0x30] sm:$0xff]   ;;  %s6516_s30 = scalar_lea.sflag [#allocation4], %s9427_s4  ;;  %s9147_s16 = scalar_lea.vmem %s10308_s7, 4096 }
  0x6d   : > { %7646 = vmatprep.subr.bf16.mxu0 %v8678_v1  ;;  %v8684_v8 = vld [vmem:[#allocation5 + $0x38] sm:$0xff]   ;;  %v8686_v9 = vld [vmem:[%s9433_s29 + $0x8] sm:$0xff]   ;;  %v8687_v10 = vld [vmem:[%s9433_s29 + $0x10] sm:$0xff]   ;;  %p9148_p11 = scmp.ne.s32.totalorder %s10308_s7, %s9147_s16  ;;  %p10371_p0 = scmp.ne.s32.totalorder %s10366_s17, 0 }
  0x6e   : > { %v8688_v11 = vld [vmem:[%s9433_s29 + $0x18] sm:$0xff]   ;;  %v8689_v12 = vld [vmem:[%s9433_s29 + $0x20] sm:$0xff]   ;;  %v8718_v14 = vld [vmem:[#allocation5 + $0x48] sm:$0xff]   ;;  %s9226_s10 = smov [#allocation8]  }
  0x6f   : > { %v8717_v13 = vld [vmem:[#allocation5 + $0x40] sm:$0xff]   ;;  %v8690_v15 = vld [vmem:[%s9433_s29 + $0x28] sm:$0xff]   ;;  %v8719_v16 = vld [vmem:[#allocation5 + $0x50] sm:$0xff]   ;;  %p9149_p2 = pnand %p9148_p11, %p10371_p0  ;;  %s9151_s21 = sshll.u32 %s9226_s10, 4  ;;  %s9152_s21 = int_to_ptr.vmem [resolvable:$false] %s9151_s21 }
  0x70   : > { %7647 = vmatpush3.bf16.msra.mxu0 %v8678_v1  ;;  %7724 = vmatprep.subr.bf16.mxu1 %v8717_v13  ;;  %v8691_v17 = vld [vmem:[%s9433_s29 + $0x30] sm:$0xff]   ;;  %v8720_v18 = vld [vmem:[#allocation5 + $0x58] sm:$0xff]   ;;  %v8721_v19 = vld [vmem:[#allocation5 + $0x60] sm:$0xff]   ;;  %s9153_s25 = scalar_lea.vmem %s9152_s21, 8192  ;;  %p9154_p5 = scmp.lt.s32.totalorder %s10308_s7, %s9152_s21 }
  0x71   : > { %7648 = vmatprep.subr.bf16.mxu0 %v8679_v2  ;;  %7725 = vmatpush3.bf16.msra.mxu1 %v8717_v13  ;;  %v8692_v20 = vld [vmem:[%s9433_s29 + $0x38] sm:$0xff]   ;;  %v8693_v21 = vld [vmem:[%s9433_s29 + $0x40] sm:$0xff]   ;;  %v8722_v22 = vld [vmem:[#allocation5 + $0x68] sm:$0xff]   ;;  %p9150_p3 = pneg %p9149_p2  ;;  %p9155_p9 = scmp.lt.s32.totalorder %s9153_s25, %s9147_s16 }
  0x72   : > { %7726 = vmatprep.subr.bf16.mxu1 %v8718_v14  ;;  %v8694_v23 = vld [vmem:[%s9433_s29 + $0x48] sm:$0xff]   ;;  %v8695_v24 = vld [vmem:[%s9433_s29 + $0x50] sm:$0xff]   ;;  %v8696_v25 = vld [vmem:[%s9433_s29 + $0x58] sm:$0xff]  }
  0x73   : > { %v8697_v26 = vld [vmem:[%s9433_s29 + $0x60] sm:$0xff]   ;;  %v8698_v27 = vld [vmem:[%s9433_s29 + $0x68] sm:$0xff]   ;;  %v8699_v28 = vld [vmem:[%s9433_s29 + $0x70] sm:$0xff]   ;;  %p9156_p12 = por %p9155_p9, %p9154_p5 }
  0x74   : > { %7649 = vmatpush3.bf16.msra.mxu0 %v8679_v2  ;;  %v8700_v29 = vld [vmem:[%s9433_s29 + $0x78] sm:$0xff]   ;;  %v8701_v30 = vld [vmem:[%s9433_s29 + $0x80] sm:$0xff]   ;;  %v8702_v31 = vld [vmem:[%s9433_s29 + $0x88] sm:$0xff]  }
  0x75   : > { %7650 = vmatprep.subr.bf16.mxu0 %v8680_v3  ;;  %7727 = vmatpush3.bf16.msra.mxu1 %v8718_v14  ;;  %v8703_v32 = vld [vmem:[%s9433_s29 + $0x90] sm:$0xff]   ;;  %v8704_v33 = vld [vmem:[%s9433_s29 + $0x98] sm:$0xff]   ;;  %v8705_v34 = vld [vmem:[%s9433_s29 + $0xa0] sm:$0xff]   ;;  %p9157_p1 = pnand %p9156_p12, %p9150_p3 }
  0x76   : > { %7728 = vmatprep.subr.bf16.mxu1 %v8719_v16  ;;  %v8706_v35 = vld [vmem:[%s9433_s29 + $0xa8] sm:$0xff]   ;;  %v8707_v36 = vld [vmem:[%s9433_s29 + $0xb0] sm:$0xff]   ;;  %v8708_v37 = vld [vmem:[%s9433_s29 + $0xb8] sm:$0xff]  }
  0x77   : > { %v8723_v38 = vld [vmem:[#allocation5 + $0x70] sm:$0xff]   ;;  %v8709_v39 = vld [vmem:[%s9433_s29 + $0xc0] sm:$0xff]   ;;  %v8724_v40 = vld [vmem:[#allocation5 + $0x78] sm:$0xff]  }
  0x78   : > { %7651 = vmatpush3.bf16.msra.mxu0 %v8680_v3  ;;  %v8710_v41 = vld [vmem:[%s9433_s29 + $0xc8] sm:$0xff]   ;;  %v8711_v42 = vld [vmem:[%s9433_s29 + $0xd0] sm:$0xff]   ;;  %v8712_v43 = vld [vmem:[%s9433_s29 + $0xd8] sm:$0xff]  }
  0x79   : > { %7652 = vmatprep.subr.bf16.mxu0 %v8681_v5  ;;  %7729 = vmatpush3.bf16.msra.mxu1 %v8719_v16  ;;  %v8713_v44 = vld [vmem:[%s9433_s29 + $0xe0] sm:$0xff]   ;;  %v8714_v45 = vld [vmem:[%s9433_s29 + $0xe8] sm:$0xff]   ;;  %v8715_v46 = vld [vmem:[%s9433_s29 + $0xf0] sm:$0xff]  }
  0x7a   : > { %7730 = vmatprep.subr.bf16.mxu1 %v8720_v18  ;;  %v8716_v47 = vld [vmem:[%s9433_s29 + $0xf8] sm:$0xff]   ;;  %v8725_v48 = vld [vmem:[#allocation5 + $0x80] sm:$0xff]   ;;  %v8726_v49 = vld [vmem:[#allocation5 + $0x88] sm:$0xff]  }
  0x7b   : > { %v9475_v50 = vld [vmem:[#allocation7] ss:$0 sm:$0xff]  ;;  %v8727_v58 = vld [vmem:[#allocation5 + $0x90] sm:$0xff]   ;;  %v8728_v59 = vld [vmem:[#allocation5 + $0x98] sm:$0xff]  }
  0x7c   : > { %7653 = vmatpush3.bf16.msra.mxu0 %v8681_v5  ;;  %v8729_v2 = vld [vmem:[#allocation5 + $0xa0] sm:$0xff]  }
  0x7d   : > { %7654 = vmatprep.subr.bf16.mxu0 %v8682_v6  ;;  %7731 = vmatpush3.bf16.msra.mxu1 %v8720_v18  ;;  %v8731_v18 = vld [vmem:[#allocation5 + $0xb0] sm:$0xff]  }
  0x7e   : > { %7732 = vmatprep.subr.bf16.mxu1 %v8721_v19 }
  0x80   : > { %7655 = vmatpush3.bf16.msra.mxu0 %v8682_v6 }
  0x81   : > { %7656 = vmatprep.subr.bf16.mxu0 %v8683_v7  ;;  %7733 = vmatpush3.bf16.msra.mxu1 %v8721_v19 }
  0x82   : > { %7734 = vmatprep.subr.bf16.mxu1 %v8722_v22 }
  0x84   : > { %7657 = vmatpush3.bf16.msra.mxu0 %v8683_v7 }
  0x85   : > { %7658 = vmatprep.subr.bf16.mxu0 %v8684_v8  ;;  %7735 = vmatpush3.bf16.msra.mxu1 %v8722_v22 }
  0x86   : > { %7736 = vmatprep.subr.bf16.mxu1 %v8723_v38 }
  0x88   : > { %7659 = vmatpush3.bf16.msra.mxu0 %v8684_v8 }
  0x89   : > { %7737 = vmatpush3.bf16.msra.mxu1 %v8723_v38  ;;  %7804 = vmatprep.subr.bf16.mxu0 %v8725_v48 }
  0x8a   : > { %7738 = vmatprep.subr.bf16.mxu1 %v8724_v40 }
  0x8b   : > { %7661 = vmatmul.mubr.bf16.vlgmr.msra.gmra.mrb[0].mxu0 %v8686_v9 }
  0x8c   : > { %7664 = vmatprep.mubr.bf16.mxu0 %v8687_v10  ;;  %7805 = vmatpush3.bf16.msra.mxu0 %v8725_v48 }
  0x8d   : > { %7739 = vmatpush3.bf16.msra.mxu1 %v8724_v40  ;;  %7806 = vmatprep.subr.bf16.mxu0 %v8726_v49 }
  0x90   : > { %7807 = vmatpush3.bf16.msra.mxu0 %v8726_v49 }
  0x91   : > { %7808 = vmatprep.subr.bf16.mxu0 %v8727_v58 }
  0x93   : > { %7665 = vmatmul.mubr.bf16.gmra.mrb[4].mxu0 %v8688_v11  ;;  %v8730_v11 = vld [vmem:[#allocation5 + $0xa8] sm:$0xff]  }
  0x94   : > { %7668 = vmatprep.mubr.bf16.mxu0 %v8689_v12  ;;  %7809 = vmatpush3.bf16.msra.mxu0 %v8727_v58 }
  0x95   : > { %7810 = vmatprep.subr.bf16.mxu0 %v8728_v59 }
  0x98   : > { %7811 = vmatpush3.bf16.msra.mxu0 %v8728_v59 }
  0x99   : > { %7812 = vmatprep.subr.bf16.mxu0 %v8729_v2 }
  0x9b   : > { %7669 = vmatmul.mubr.bf16.gmra.mrb[8].mxu0 %v8690_v15 }
  0x9c   : > { %7672 = vmatprep.mubr.bf16.mxu0 %v8691_v17  ;;  %7813 = vmatpush3.bf16.msra.mxu0 %v8729_v2 }
  0x9d   : > { %7814 = vmatprep.subr.bf16.mxu0 %v8730_v11 }
  0xa0   : > { %7815 = vmatpush3.bf16.msra.mxu0 %v8730_v11 }
  0xa1   : > { %7816 = vmatprep.subr.bf16.mxu0 %v8731_v18 }
  0xa3   : > { %7673 = vmatmul.mubr.bf16.gmra.mrb[12].mxu0 %v8692_v20 }
  0xa4   : > { %7676 = vmatprep.mubr.bf16.mxu0 %v8693_v21  ;;  %7817 = vmatpush3.bf16.msra.mxu0 %v8731_v18 }
  0xab   : > { %7677 = vmatmul.mubr.bf16.gmra.mrb[16].mxu0 %v8694_v23 }
  0xac   : > { %7680 = vmatprep.mubr.bf16.mxu0 %v8695_v24 }
  0xb3   : > { %7681 = vmatmul.mubr.bf16.gmra.mrb[20].mxu0 %v8696_v25 }
  0xb4   : > { %7684 = vmatprep.mubr.bf16.mxu0 %v8697_v26 }
  0xbb   : > { %7685 = vmatmul.mubr.bf16.gmra.mrb[24].mxu0 %v8698_v27  ;;  %v8732_v27 = vld [vmem:[#allocation5 + $0xb8] sm:$0xff]  }
  0xbc   : > { %7688 = vmatprep.mubr.bf16.mxu0 %v8699_v28  ;;  %7818 = vmatprep.subr.bf16.mxu0 %v8732_v27 }
  0xbd   : > { %7819 = vmatpush3.bf16.msra.mxu0 %v8732_v27 }
  0xc3   : > { %7689 = vmatmul.mubr.bf16.gmra.mrb[28].mxu0 %v8700_v29 }
  0xc4   : > { %7692 = vmatprep.mubr.bf16.mxu0 %v8701_v30 }
  0xcb   : > { %7693 = vmatmul.mubr.bf16.gmra.mrb[32].mxu0 %v8702_v31 }
  0xcc   : > { %7696 = vmatprep.mubr.bf16.mxu0 %v8703_v32 }
  0xd3   : > { %7697 = vmatmul.mubr.bf16.gmra.mrb[36].mxu0 %v8704_v33 }
  0xd4   : > { %7700 = vmatprep.mubr.bf16.mxu0 %v8705_v34 }
  0xdb   : > { %7701 = vmatmul.mubr.bf16.gmra.mrb[40].mxu0 %v8706_v35 }
  0xdc   : > { %7704 = vmatprep.mubr.bf16.mxu0 %v8707_v36 }
  0xe3   : > { %7705 = vmatmul.mubr.bf16.gmra.mrb[44].mxu0 %v8708_v37 }
  0xe4   : > { %7708 = vmatprep.mubr.bf16.mxu0 %v8709_v39 }
  0xeb   : > { %7709 = vmatmul.mubr.bf16.gmra.mrb[48].mxu0 %v8710_v41 }
  0xec   : > { %7712 = vmatprep.mubr.bf16.mxu0 %v8711_v42 }
  0xf3   : > { %7713 = vmatmul.mubr.bf16.gmra.mrb[52].mxu0 %v8712_v43 }
  0xf4   : > { %7716 = vmatprep.mubr.bf16.mxu0 %v8713_v44 }
  0xfb   : > { %7717 = vmatmul.mubr.bf16.gmra.mrb[56].mxu0 %v8714_v45 }
  0xfc   : > { %7720 = vmatprep.mubr.bf16.mxu0 %v8715_v46 }
 0x103   : > { %7721 = vmatmul.mubr.bf16.gmra.mrb[60].mxu0 %v8716_v47 }
 0x15e   : > { %v7662_v51 = vpop.f32.mrb[0].mxu0 }
 0x15f   : > { %v591_v52 = vadd.f32 %v7662_v51, %v9475_v50  ;;  %v582_v53 = vpop.f32.mrb[1].mxu0 }
 0x160   : > { %v7663_v54 = vpop.f32.mrb[2].mxu0  ;;  %v583_v55 = vadd.f32 %v9475_v50, %v582_v53 }
 0x161   : > { %v594_v56 = vadd.f32 %v7663_v54, %v9475_v50  ;;  %v585_v57 = vpop.f32.mrb[3].mxu0  ;;  %v839_v61 = vmax.f32 %v591_v52, 0.0 }
 0x162   : > { %v586_v60 = vadd.f32 %v9475_v50, %v585_v57  ;;  %v837_v63 = vmax.f32 %v583_v55, 0.0 }
 0x163   : > { %v840_v62 = vmax.f32 %v594_v56, 0.0 }
 0x164   : > { %v838_v0 = vmax.f32 %v586_v60, 0.0 }
 0x165   : > { %v902_v1 = vpack.c.bf16 %v840_v62, %v839_v61 }
 0x166   : > { %v7666_v3 = vpop.f32.mrb[4].mxu0  ;;  %v901_v4 = vpack.c.bf16 %v838_v0, %v837_v63 }
 0x167   : > { %v607_v5 = vadd.f32 %v7666_v3, %v9475_v50  ;;  %v598_v6 = vpop.f32.mrb[5].mxu0 }
 0x168   : > { %v599_v7 = vadd.f32 %v9475_v50, %v598_v6  ;;  %v7667_v8 = vpop.f32.mrb[6].mxu0  ;;  %7740 = vmatprep.mubr.bf16.mxu1 %v901_v4 }
 0x169   : > { %v610_v9 = vadd.f32 %v7667_v8, %v9475_v50  ;;  %v601_v10 = vpop.f32.mrb[7].mxu0  ;;  %7741 = vmatmul.mubr.bf16.vlgmr.msra.gmra.mrb[0].mxu1 %v902_v1  ;;  %v843_v13 = vmax.f32 %v607_v5, 0.0 }
 0x16a   : > { %v602_v12 = vadd.f32 %v9475_v50, %v601_v10  ;;  %v841_v15 = vmax.f32 %v599_v7, 0.0 }
 0x16b   : > { %v844_v14 = vmax.f32 %v610_v9, 0.0 }
 0x16c   : > { %v842_v16 = vmax.f32 %v602_v12, 0.0 }
 0x16d   : > { %v904_v17 = vpack.c.bf16 %v844_v14, %v843_v13 }
 0x16e   : > { %v7670_v19 = vpop.f32.mrb[8].mxu0  ;;  %v903_v20 = vpack.c.bf16 %v842_v16, %v841_v15 }
 0x16f   : > { %v623_v21 = vadd.f32 %v7670_v19, %v9475_v50  ;;  %v614_v22 = vpop.f32.mrb[9].mxu0 }
 0x170   : > { %v615_v23 = vadd.f32 %v9475_v50, %v614_v22  ;;  %v7671_v24 = vpop.f32.mrb[10].mxu0  ;;  %7744 = vmatprep.mubr.bf16.mxu1 %v903_v20 }
 0x171   : > { %v626_v25 = vadd.f32 %v7671_v24, %v9475_v50  ;;  %v617_v26 = vpop.f32.mrb[11].mxu0  ;;  %7745 = vmatmul.mubr.bf16.gmra.mrb[4].mxu1 %v904_v17  ;;  %v847_v29 = vmax.f32 %v623_v21, 0.0 }
 0x172   : > { %v618_v28 = vadd.f32 %v9475_v50, %v617_v26  ;;  %v845_v31 = vmax.f32 %v615_v23, 0.0 }
 0x173   : > { %v848_v30 = vmax.f32 %v626_v25, 0.0 }
 0x174   : > { %v846_v32 = vmax.f32 %v618_v28, 0.0 }
 0x175   : > { %v906_v33 = vpack.c.bf16 %v848_v30, %v847_v29 }
 0x176   : > { %v7674_v34 = vpop.f32.mrb[12].mxu0  ;;  %v905_v35 = vpack.c.bf16 %v846_v32, %v845_v31 }
 0x177   : > { %v639_v36 = vadd.f32 %v7674_v34, %v9475_v50  ;;  %v630_v37 = vpop.f32.mrb[13].mxu0 }
 0x178   : > { %v631_v38 = vadd.f32 %v9475_v50, %v630_v37  ;;  %v7675_v39 = vpop.f32.mrb[14].mxu0  ;;  %7748 = vmatprep.mubr.bf16.mxu1 %v905_v35 }
 0x179   : > { %v642_v40 = vadd.f32 %v7675_v39, %v9475_v50  ;;  %v633_v41 = vpop.f32.mrb[15].mxu0  ;;  %7749 = vmatmul.mubr.bf16.gmra.mrb[8].mxu1 %v906_v33  ;;  %v851_v43 = vmax.f32 %v639_v36, 0.0 }
 0x17a   : > { %v634_v42 = vadd.f32 %v9475_v50, %v633_v41  ;;  %v849_v45 = vmax.f32 %v631_v38, 0.0 }
 0x17b   : > { %v852_v44 = vmax.f32 %v642_v40, 0.0 }
 0x17c   : > { %v850_v46 = vmax.f32 %v634_v42, 0.0 }
 0x17d   : > { %v908_v47 = vpack.c.bf16 %v852_v44, %v851_v43 }
 0x17e   : > { %v7678_v48 = vpop.f32.mrb[16].mxu0  ;;  %v907_v49 = vpack.c.bf16 %v850_v46, %v849_v45 }
 0x17f   : > { %v655_v51 = vadd.f32 %v7678_v48, %v9475_v50  ;;  %v646_v52 = vpop.f32.mrb[17].mxu0 }
 0x180   : > { %v647_v53 = vadd.f32 %v9475_v50, %v646_v52  ;;  %v7679_v54 = vpop.f32.mrb[18].mxu0  ;;  %7752 = vmatprep.mubr.bf16.mxu1 %v907_v49 }
 0x181   : > { %v658_v55 = vadd.f32 %v7679_v54, %v9475_v50  ;;  %v649_v56 = vpop.f32.mrb[19].mxu0  ;;  %7753 = vmatmul.mubr.bf16.gmra.mrb[12].mxu1 %v908_v47  ;;  %v855_v58 = vmax.f32 %v655_v51, 0.0 }
 0x182   : > { %v650_v57 = vadd.f32 %v9475_v50, %v649_v56  ;;  %v853_v60 = vmax.f32 %v647_v53, 0.0 }
 0x183   : > { %v856_v59 = vmax.f32 %v658_v55, 0.0 }
 0x184   : > { %v854_v61 = vmax.f32 %v650_v57, 0.0 }
 0x185   : > { %v910_v62 = vpack.c.bf16 %v856_v59, %v855_v58 }
 0x186   : > { %v7682_v63 = vpop.f32.mrb[20].mxu0  ;;  %v909_v0 = vpack.c.bf16 %v854_v61, %v853_v60 }
 0x187   : > { %v671_v1 = vadd.f32 %v7682_v63, %v9475_v50  ;;  %v662_v2 = vpop.f32.mrb[21].mxu0 }
 0x188   : > { %v663_v3 = vadd.f32 %v9475_v50, %v662_v2  ;;  %v7683_v4 = vpop.f32.mrb[22].mxu0  ;;  %7756 = vmatprep.mubr.bf16.mxu1 %v909_v0 }
 0x189   : > { %v674_v5 = vadd.f32 %v7683_v4, %v9475_v50  ;;  %v665_v6 = vpop.f32.mrb[23].mxu0  ;;  %7757 = vmatmul.mubr.bf16.gmra.mrb[16].mxu1 %v910_v62  ;;  %v859_v8 = vmax.f32 %v671_v1, 0.0 }
 0x18a   : > { %v666_v7 = vadd.f32 %v9475_v50, %v665_v6  ;;  %v857_v10 = vmax.f32 %v663_v3, 0.0 }
 0x18b   : > { %v860_v9 = vmax.f32 %v674_v5, 0.0 }
 0x18c   : > { %v858_v11 = vmax.f32 %v666_v7, 0.0 }
 0x18d   : > { %v912_v12 = vpack.c.bf16 %v860_v9, %v859_v8 }
 0x18e   : > { %v7686_v13 = vpop.f32.mrb[24].mxu0  ;;  %v911_v14 = vpack.c.bf16 %v858_v11, %v857_v10 }
 0x18f   : > { %v687_v15 = vadd.f32 %v7686_v13, %v9475_v50  ;;  %v678_v16 = vpop.f32.mrb[25].mxu0 }
 0x190   : > { %v679_v17 = vadd.f32 %v9475_v50, %v678_v16  ;;  %v7687_v18 = vpop.f32.mrb[26].mxu0  ;;  %7760 = vmatprep.mubr.bf16.mxu1 %v911_v14 }
 0x191   : > { %v690_v19 = vadd.f32 %v7687_v18, %v9475_v50  ;;  %v681_v20 = vpop.f32.mrb[27].mxu0  ;;  %7761 = vmatmul.mubr.bf16.gmra.mrb[20].mxu1 %v912_v12  ;;  %v863_v22 = vmax.f32 %v687_v15, 0.0 }
 0x192   : > { %v682_v21 = vadd.f32 %v9475_v50, %v681_v20  ;;  %v861_v24 = vmax.f32 %v679_v17, 0.0 }
 0x193   : > { %v864_v23 = vmax.f32 %v690_v19, 0.0 }
 0x194   : > { %v862_v25 = vmax.f32 %v682_v21, 0.0 }
 0x195   : > { %v914_v26 = vpack.c.bf16 %v864_v23, %v863_v22 }
 0x196   : > { %v7690_v27 = vpop.f32.mrb[28].mxu0  ;;  %v913_v28 = vpack.c.bf16 %v862_v25, %v861_v24 }
 0x197   : > { %v703_v29 = vadd.f32 %v7690_v27, %v9475_v50  ;;  %v694_v30 = vpop.f32.mrb[29].mxu0 }
 0x198   : > { %v695_v31 = vadd.f32 %v9475_v50, %v694_v30  ;;  %v7691_v32 = vpop.f32.mrb[30].mxu0  ;;  %7764 = vmatprep.mubr.bf16.mxu1 %v913_v28 }
 0x199   : > { %v706_v33 = vadd.f32 %v7691_v32, %v9475_v50  ;;  %v697_v34 = vpop.f32.mrb[31].mxu0  ;;  %7765 = vmatmul.mubr.bf16.gmra.mrb[24].mxu1 %v914_v26  ;;  %v867_v36 = vmax.f32 %v703_v29, 0.0 }
 0x19a   : > { %v698_v35 = vadd.f32 %v9475_v50, %v697_v34  ;;  %v865_v38 = vmax.f32 %v695_v31, 0.0 }
 0x19b   : > { %v868_v37 = vmax.f32 %v706_v33, 0.0 }
 0x19c   : > { %v866_v39 = vmax.f32 %v698_v35, 0.0 }
 0x19d   : > { %v916_v40 = vpack.c.bf16 %v868_v37, %v867_v36 }
 0x19e   : > { %v7694_v41 = vpop.f32.mrb[32].mxu0  ;;  %v915_v42 = vpack.c.bf16 %v866_v39, %v865_v38 }
 0x19f   : > { %v719_v43 = vadd.f32 %v7694_v41, %v9475_v50  ;;  %v710_v44 = vpop.f32.mrb[33].mxu0 }
 0x1a0   : > { %v711_v45 = vadd.f32 %v9475_v50, %v710_v44  ;;  %v7695_v46 = vpop.f32.mrb[34].mxu0  ;;  %7768 = vmatprep.mubr.bf16.mxu1 %v915_v42 }
 0x1a1   : > { %v722_v47 = vadd.f32 %v7695_v46, %v9475_v50  ;;  %v713_v48 = vpop.f32.mrb[35].mxu0  ;;  %7769 = vmatmul.mubr.bf16.gmra.mrb[28].mxu1 %v916_v40  ;;  %v871_v51 = vmax.f32 %v719_v43, 0.0 }
 0x1a2   : > { %v714_v49 = vadd.f32 %v9475_v50, %v713_v48  ;;  %v869_v53 = vmax.f32 %v711_v45, 0.0 }
 0x1a3   : > { %v872_v52 = vmax.f32 %v722_v47, 0.0 }
 0x1a4   : > { %v870_v54 = vmax.f32 %v714_v49, 0.0 }
 0x1a5   : > { %v918_v55 = vpack.c.bf16 %v872_v52, %v871_v51 }
 0x1a6   : > { %v7698_v56 = vpop.f32.mrb[36].mxu0  ;;  %v917_v57 = vpack.c.bf16 %v870_v54, %v869_v53 }
 0x1a7   : > { %v735_v58 = vadd.f32 %v7698_v56, %v9475_v50  ;;  %v726_v59 = vpop.f32.mrb[37].mxu0 }
 0x1a8   : > { %v727_v60 = vadd.f32 %v9475_v50, %v726_v59  ;;  %v7699_v61 = vpop.f32.mrb[38].mxu0  ;;  %7772 = vmatprep.mubr.bf16.mxu1 %v917_v57 }
 0x1a9   : > { %v738_v62 = vadd.f32 %v7699_v61, %v9475_v50  ;;  %v729_v63 = vpop.f32.mrb[39].mxu0  ;;  %7773 = vmatmul.mubr.bf16.gmra.mrb[32].mxu1 %v918_v55  ;;  %v875_v1 = vmax.f32 %v735_v58, 0.0 }
 0x1aa   : > { %v730_v0 = vadd.f32 %v9475_v50, %v729_v63  ;;  %v873_v3 = vmax.f32 %v727_v60, 0.0 }
 0x1ab   : > { %v876_v2 = vmax.f32 %v738_v62, 0.0 }
 0x1ac   : > { %v874_v4 = vmax.f32 %v730_v0, 0.0 }
 0x1ad   : > { %v920_v5 = vpack.c.bf16 %v876_v2, %v875_v1 }
 0x1ae   : > { %v7702_v6 = vpop.f32.mrb[40].mxu0  ;;  %v919_v7 = vpack.c.bf16 %v874_v4, %v873_v3 }
 0x1af   : > { %v751_v8 = vadd.f32 %v7702_v6, %v9475_v50  ;;  %v742_v9 = vpop.f32.mrb[41].mxu0 }
 0x1b0   : > { %v743_v10 = vadd.f32 %v9475_v50, %v742_v9  ;;  %v7703_v11 = vpop.f32.mrb[42].mxu0  ;;  %7776 = vmatprep.mubr.bf16.mxu1 %v919_v7 }
 0x1b1   : > { %v754_v12 = vadd.f32 %v7703_v11, %v9475_v50  ;;  %v745_v13 = vpop.f32.mrb[43].mxu0  ;;  %7777 = vmatmul.mubr.bf16.gmra.mrb[36].mxu1 %v920_v5  ;;  %v879_v15 = vmax.f32 %v751_v8, 0.0 }
 0x1b2   : > { %v746_v14 = vadd.f32 %v9475_v50, %v745_v13  ;;  %v877_v17 = vmax.f32 %v743_v10, 0.0 }
 0x1b3   : > { %v880_v16 = vmax.f32 %v754_v12, 0.0 }
 0x1b4   : > { %v878_v18 = vmax.f32 %v746_v14, 0.0 }
 0x1b5   : > { %v922_v19 = vpack.c.bf16 %v880_v16, %v879_v15 }
 0x1b6   : > { %v7706_v20 = vpop.f32.mrb[44].mxu0  ;;  %v921_v21 = vpack.c.bf16 %v878_v18, %v877_v17 }
 0x1b7   : > { %v767_v22 = vadd.f32 %v7706_v20, %v9475_v50  ;;  %v758_v23 = vpop.f32.mrb[45].mxu0 }
 0x1b8   : > { %v759_v24 = vadd.f32 %v9475_v50, %v758_v23  ;;  %v7707_v25 = vpop.f32.mrb[46].mxu0  ;;  %7780 = vmatprep.mubr.bf16.mxu1 %v921_v21 }
 0x1b9   : > { %v770_v26 = vadd.f32 %v7707_v25, %v9475_v50  ;;  %v761_v27 = vpop.f32.mrb[47].mxu0  ;;  %7781 = vmatmul.mubr.bf16.gmra.mrb[40].mxu1 %v922_v19  ;;  %v883_v29 = vmax.f32 %v767_v22, 0.0 }
 0x1ba   : > { %v762_v28 = vadd.f32 %v9475_v50, %v761_v27  ;;  %v881_v31 = vmax.f32 %v759_v24, 0.0 }
 0x1bb   : > { %v884_v30 = vmax.f32 %v770_v26, 0.0 }
 0x1bc   : > { %v882_v32 = vmax.f32 %v762_v28, 0.0  ;;  %v8733_v28 = vld [vmem:[#allocation5 + $0xc0] sm:$0xff]  }
 0x1bd   : > { %v924_v33 = vpack.c.bf16 %v884_v30, %v883_v29  ;;  %7884 = vmatprep.subr.bf16.mxu1 %v8733_v28  ;;  %v8734_v29 = vld [vmem:[#allocation5 + $0xc8] sm:$0xff]   ;;  %v9541_v30 = vld [vmem:[#allocation7 + $0x1] ss:$0 sm:$0xff] }
 0x1be   : > { %v7710_v34 = vpop.f32.mrb[48].mxu0  ;;  %v923_v35 = vpack.c.bf16 %v882_v32, %v881_v31  ;;  %7885 = vmatpush3.bf16.msra.mxu1 %v8733_v28 }
 0x1bf   : > { %v783_v36 = vadd.f32 %v7710_v34, %v9475_v50  ;;  %v774_v37 = vpop.f32.mrb[49].mxu0  ;;  %7886 = vmatprep.subr.bf16.mxu1 %v8734_v29 }
 0x1c0   : > { %v775_v38 = vadd.f32 %v9475_v50, %v774_v37  ;;  %v7711_v39 = vpop.f32.mrb[50].mxu0  ;;  %7784 = vmatprep.mubr.bf16.mxu1 %v923_v35  ;;  %v8735_v37 = vld [vmem:[#allocation5 + $0xd0] sm:$0xff]  }
 0x1c1   : > { %v786_v40 = vadd.f32 %v7711_v39, %v9475_v50  ;;  %v777_v41 = vpop.f32.mrb[51].mxu0  ;;  %7785 = vmatmul.mubr.bf16.gmra.mrb[44].mxu1 %v924_v33  ;;  %v887_v43 = vmax.f32 %v783_v36, 0.0 }
 0x1c2   : > { %v778_v42 = vadd.f32 %v9475_v50, %v777_v41  ;;  %v885_v45 = vmax.f32 %v775_v38, 0.0  ;;  %7887 = vmatpush3.bf16.msra.mxu1 %v8734_v29  ;;  %v8736_v38 = vld [vmem:[#allocation5 + $0xd8] sm:$0xff]  }
 0x1c3   : > { %v888_v44 = vmax.f32 %v786_v40, 0.0  ;;  %7888 = vmatprep.subr.bf16.mxu1 %v8735_v37 }
 0x1c4   : > { %v886_v46 = vmax.f32 %v778_v42, 0.0 }
 0x1c5   : > { %v926_v47 = vpack.c.bf16 %v888_v44, %v887_v43 }
 0x1c6   : > { %v7714_v48 = vpop.f32.mrb[52].mxu0  ;;  %v925_v49 = vpack.c.bf16 %v886_v46, %v885_v45  ;;  %7889 = vmatpush3.bf16.msra.mxu1 %v8735_v37  ;;  %v8737_v45 = vld [vmem:[#allocation5 + $0xe0] sm:$0xff]  }
 0x1c7   : > { %v799_v51 = vadd.f32 %v7714_v48, %v9475_v50  ;;  %v790_v52 = vpop.f32.mrb[53].mxu0  ;;  %7890 = vmatprep.subr.bf16.mxu1 %v8736_v38 }
 0x1c8   : > { %v791_v53 = vadd.f32 %v9475_v50, %v790_v52  ;;  %v7715_v54 = vpop.f32.mrb[54].mxu0  ;;  %7788 = vmatprep.mubr.bf16.mxu1 %v925_v49 }
 0x1c9   : > { %v802_v55 = vadd.f32 %v7715_v54, %v9475_v50  ;;  %v793_v56 = vpop.f32.mrb[55].mxu0  ;;  %7789 = vmatmul.mubr.bf16.gmra.mrb[48].mxu1 %v926_v47  ;;  %v891_v58 = vmax.f32 %v799_v51, 0.0 }
 0x1ca   : > { %v794_v57 = vadd.f32 %v9475_v50, %v793_v56  ;;  %v889_v60 = vmax.f32 %v791_v53, 0.0  ;;  %7891 = vmatpush3.bf16.msra.mxu1 %v8736_v38 }
 0x1cb   : > { %v892_v59 = vmax.f32 %v802_v55, 0.0  ;;  %7892 = vmatprep.subr.bf16.mxu1 %v8737_v45  ;;  %v8738_v55 = vld [vmem:[#allocation5 + $0xe8] sm:$0xff]  }
 0x1cc   : > { %v890_v61 = vmax.f32 %v794_v57, 0.0 }
 0x1cd   : > { %v928_v62 = vpack.c.bf16 %v892_v59, %v891_v58 }
 0x1ce   : > { %v7718_v63 = vpop.f32.mrb[56].mxu0  ;;  %v927_v0 = vpack.c.bf16 %v890_v61, %v889_v60  ;;  %7893 = vmatpush3.bf16.msra.mxu1 %v8737_v45 }
 0x1cf   : > { %v815_v1 = vadd.f32 %v7718_v63, %v9475_v50  ;;  %v806_v2 = vpop.f32.mrb[57].mxu0  ;;  %7894 = vmatprep.subr.bf16.mxu1 %v8738_v55 }
 0x1d0   : > { %v807_v3 = vadd.f32 %v9475_v50, %v806_v2  ;;  %v7719_v4 = vpop.f32.mrb[58].mxu0  ;;  %7792 = vmatprep.mubr.bf16.mxu1 %v927_v0 }
 0x1d1   : > { %v818_v5 = vadd.f32 %v7719_v4, %v9475_v50  ;;  %v809_v6 = vpop.f32.mrb[59].mxu0  ;;  %7793 = vmatmul.mubr.bf16.gmra.mrb[52].mxu1 %v928_v62  ;;  %v895_v8 = vmax.f32 %v815_v1, 0.0  ;;  %v8739_v62 = vld [vmem:[#allocation5 + $0xf0] sm:$0xff]  }
 0x1d2   : > { %v810_v7 = vadd.f32 %v9475_v50, %v809_v6  ;;  %v893_v10 = vmax.f32 %v807_v3, 0.0  ;;  %7895 = vmatpush3.bf16.msra.mxu1 %v8738_v55 }
 0x1d3   : > { %v896_v9 = vmax.f32 %v818_v5, 0.0  ;;  %7896 = vmatprep.subr.bf16.mxu1 %v8739_v62 }
 0x1d4   : > { %v894_v11 = vmax.f32 %v810_v7, 0.0  ;;  %v8740_v7 = vld [vmem:[#allocation5 + $0xf8] sm:$0xff]  }
 0x1d5   : > { %v930_v12 = vpack.c.bf16 %v896_v9, %v895_v8 }
 0x1d6   : > { %v7722_v13 = vpop.f32.mrb[60].mxu0  ;;  %v929_v14 = vpack.c.bf16 %v894_v11, %v893_v10  ;;  %7897 = vmatpush3.bf16.msra.mxu1 %v8739_v62 }
 0x1d7   : > { %v831_v15 = vadd.f32 %v7722_v13, %v9475_v50  ;;  %v822_v16 = vpop.f32.mrb[61].mxu0  ;;  %7898 = vmatprep.subr.bf16.mxu1 %v8740_v7 }
 0x1d8   : > { %v823_v17 = vadd.f32 %v9475_v50, %v822_v16  ;;  %v7723_v18 = vpop.f32.mrb[62].mxu0  ;;  %7796 = vmatprep.mubr.bf16.mxu1 %v929_v14 }
 0x1d9   : > { %v834_v19 = vadd.f32 %v7723_v18, %v9475_v50  ;;  %v825_v20 = vpop.f32.mrb[63].mxu0  ;;  %7797 = vmatmul.mubr.bf16.gmra.mrb[56].mxu1 %v930_v12  ;;  %v899_v22 = vmax.f32 %v831_v15, 0.0 }
 0x1da   : > { %v826_v21 = vadd.f32 %v9475_v50, %v825_v20  ;;  %v897_v24 = vmax.f32 %v823_v17, 0.0  ;;  %7899 = vmatpush3.bf16.msra.mxu1 %v8740_v7 }
 0x1db   : > { %v900_v23 = vmax.f32 %v834_v19, 0.0 }
 0x1dc   : > { %v898_v25 = vmax.f32 %v826_v21, 0.0 }
 0x1dd   : > { %v932_v26 = vpack.c.bf16 %v900_v23, %v899_v22 }
 0x1de   : > { %v931_v27 = vpack.c.bf16 %v898_v25, %v897_v24 }
 0x1e0   : > { %7800 = vmatprep.mubr.bf16.mxu1 %v931_v27 }
 0x1e1   : > { %7801 = vmatmul.mubr.bf16.gmra.mrb[60].mxu1 %v932_v26 }
 0x23c   : > { %v7742_v31 = vpop.f32.mrb[0].mxu1 }
 0x23d   : > { %v1049_v32 = vadd.f32 %v7742_v31, %v9541_v30  ;;  %v1040_v50 = vpop.f32.mrb[1].mxu1 }
 0x23e   : > { %v1041_v33 = vadd.f32 %v9541_v30, %v1040_v50  ;;  %v7743_v34 = vpop.f32.mrb[2].mxu1 }
 0x23f   : > { %v1052_v35 = vadd.f32 %v7743_v34, %v9541_v30  ;;  %v1043_v36 = vpop.f32.mrb[3].mxu1  ;;  %v1297_v40 = vmax.f32 %v1049_v32, 0.0 }
 0x240   : > { %v1044_v39 = vadd.f32 %v9541_v30, %v1043_v36  ;;  %v1295_v42 = vmax.f32 %v1041_v33, 0.0 }
 0x241   : > { %v1298_v41 = vmax.f32 %v1052_v35, 0.0 }
 0x242   : > { %v1296_v43 = vmax.f32 %v1044_v39, 0.0 }
 0x243   : > { %v1360_v44 = vpack.c.bf16 %v1298_v41, %v1297_v40 }
 0x244   : > { %v7746_v46 = vpop.f32.mrb[4].mxu1  ;;  %v1359_v47 = vpack.c.bf16 %v1296_v43, %v1295_v42 }
 0x245   : > { %v1065_v48 = vadd.f32 %v7746_v46, %v9541_v30  ;;  %v1056_v49 = vpop.f32.mrb[5].mxu1 }
 0x246   : > { %v1057_v51 = vadd.f32 %v9541_v30, %v1056_v49  ;;  %v7747_v52 = vpop.f32.mrb[6].mxu1  ;;  %7820 = vmatprep.mubr.bf16.mxu0 %v1359_v47 }
 0x247   : > { %v1068_v53 = vadd.f32 %v7747_v52, %v9541_v30  ;;  %v1059_v54 = vpop.f32.mrb[7].mxu1  ;;  %7821 = vmatmul.mubr.bf16.vlgmr.msra.gmra.mrb[64].mxu0 %v1360_v44  ;;  %v1301_v57 = vmax.f32 %v1065_v48, 0.0 }
 0x248   : > { %v1060_v56 = vadd.f32 %v9541_v30, %v1059_v54  ;;  %v1299_v59 = vmax.f32 %v1057_v51, 0.0 }
 0x249   : > { %v1302_v58 = vmax.f32 %v1068_v53, 0.0 }
 0x24a   : > { %v1300_v60 = vmax.f32 %v1060_v56, 0.0 }
 0x24b   : > { %v1362_v61 = vpack.c.bf16 %v1302_v58, %v1301_v57 }
 0x24c   : > { %v7750_v63 = vpop.f32.mrb[8].mxu1  ;;  %v1361_v0 = vpack.c.bf16 %v1300_v60, %v1299_v59 }
 0x24d   : > { %v1081_v1 = vadd.f32 %v7750_v63, %v9541_v30  ;;  %v1072_v2 = vpop.f32.mrb[9].mxu1 }
 0x24e   : > { %v1073_v3 = vadd.f32 %v9541_v30, %v1072_v2  ;;  %v7751_v4 = vpop.f32.mrb[10].mxu1  ;;  %7824 = vmatprep.mubr.bf16.mxu0 %v1361_v0 }
 0x24f   : > { %v1084_v5 = vadd.f32 %v7751_v4, %v9541_v30  ;;  %v1075_v6 = vpop.f32.mrb[11].mxu1  ;;  %7825 = vmatmul.mubr.bf16.gmra.mrb[68].mxu0 %v1362_v61  ;;  %v1305_v9 = vmax.f32 %v1081_v1, 0.0 }
 0x250   : > { %v1076_v8 = vadd.f32 %v9541_v30, %v1075_v6  ;;  %v1303_v11 = vmax.f32 %v1073_v3, 0.0 }
 0x251   : > { %v1306_v10 = vmax.f32 %v1084_v5, 0.0 }
 0x252   : > { %v1304_v12 = vmax.f32 %v1076_v8, 0.0 }
 0x253   : > { %v1364_v13 = vpack.c.bf16 %v1306_v10, %v1305_v9 }
 0x254   : > { %v7754_v14 = vpop.f32.mrb[12].mxu1  ;;  %v1363_v15 = vpack.c.bf16 %v1304_v12, %v1303_v11 }
 0x255   : > { %v1097_v16 = vadd.f32 %v7754_v14, %v9541_v30  ;;  %v1088_v17 = vpop.f32.mrb[13].mxu1 }
 0x256   : > { %v1089_v18 = vadd.f32 %v9541_v30, %v1088_v17  ;;  %v7755_v19 = vpop.f32.mrb[14].mxu1  ;;  %7828 = vmatprep.mubr.bf16.mxu0 %v1363_v15 }
 0x257   : > { %v1100_v20 = vadd.f32 %v7755_v19, %v9541_v30  ;;  %v1091_v21 = vpop.f32.mrb[15].mxu1  ;;  %7829 = vmatmul.mubr.bf16.gmra.mrb[72].mxu0 %v1364_v13  ;;  %v1309_v23 = vmax.f32 %v1097_v16, 0.0 }
 0x258   : > { %v1092_v22 = vadd.f32 %v9541_v30, %v1091_v21  ;;  %v1307_v25 = vmax.f32 %v1089_v18, 0.0 }
 0x259   : > { %v1310_v24 = vmax.f32 %v1100_v20, 0.0 }
 0x25a   : > { %v1308_v26 = vmax.f32 %v1092_v22, 0.0 }
 0x25b   : > { %v1366_v27 = vpack.c.bf16 %v1310_v24, %v1309_v23 }
 0x25c   : > { %v7758_v28 = vpop.f32.mrb[16].mxu1  ;;  %v1365_v29 = vpack.c.bf16 %v1308_v26, %v1307_v25 }
 0x25d   : > { %v1113_v31 = vadd.f32 %v7758_v28, %v9541_v30  ;;  %v1104_v32 = vpop.f32.mrb[17].mxu1 }
 0x25e   : > { %v1105_v50 = vadd.f32 %v9541_v30, %v1104_v32  ;;  %v7759_v33 = vpop.f32.mrb[18].mxu1  ;;  %7832 = vmatprep.mubr.bf16.mxu0 %v1365_v29 }
 0x25f   : > { %v1116_v34 = vadd.f32 %v7759_v33, %v9541_v30  ;;  %v1107_v35 = vpop.f32.mrb[19].mxu1  ;;  %7833 = vmatmul.mubr.bf16.gmra.mrb[76].mxu0 %v1366_v27  ;;  %v1313_v37 = vmax.f32 %v1113_v31, 0.0 }
 0x260   : > { %v1108_v36 = vadd.f32 %v9541_v30, %v1107_v35  ;;  %v1311_v39 = vmax.f32 %v1105_v50, 0.0 }
 0x261   : > { %v1314_v38 = vmax.f32 %v1116_v34, 0.0 }
 0x262   : > { %v1312_v40 = vmax.f32 %v1108_v36, 0.0 }
 0x263   : > { %v1368_v41 = vpack.c.bf16 %v1314_v38, %v1313_v37 }
 0x264   : > { %v7762_v42 = vpop.f32.mrb[20].mxu1  ;;  %v1367_v43 = vpack.c.bf16 %v1312_v40, %v1311_v39 }
 0x265   : > { %v1129_v44 = vadd.f32 %v7762_v42, %v9541_v30  ;;  %v1120_v45 = vpop.f32.mrb[21].mxu1 }
 0x266   : > { %v1121_v46 = vadd.f32 %v9541_v30, %v1120_v45  ;;  %v7763_v47 = vpop.f32.mrb[22].mxu1  ;;  %7836 = vmatprep.mubr.bf16.mxu0 %v1367_v43 }
 0x267   : > { %v1132_v48 = vadd.f32 %v7763_v47, %v9541_v30  ;;  %v1123_v49 = vpop.f32.mrb[23].mxu1  ;;  %7837 = vmatmul.mubr.bf16.gmra.mrb[80].mxu0 %v1368_v41  ;;  %v1317_v52 = vmax.f32 %v1129_v44, 0.0 }
 0x268   : > { %v1124_v51 = vadd.f32 %v9541_v30, %v1123_v49  ;;  %v1315_v54 = vmax.f32 %v1121_v46, 0.0 }
 0x269   : > { %v1318_v53 = vmax.f32 %v1132_v48, 0.0 }
 0x26a   : > { %v1316_v55 = vmax.f32 %v1124_v51, 0.0 }
 0x26b   : > { %v1370_v56 = vpack.c.bf16 %v1318_v53, %v1317_v52 }
 0x26c   : > { %v7766_v57 = vpop.f32.mrb[24].mxu1  ;;  %v1369_v58 = vpack.c.bf16 %v1316_v55, %v1315_v54 }
 0x26d   : > { %v1145_v59 = vadd.f32 %v7766_v57, %v9541_v30  ;;  %v1136_v60 = vpop.f32.mrb[25].mxu1 }
 0x26e   : > { %v1137_v61 = vadd.f32 %v9541_v30, %v1136_v60  ;;  %v7767_v62 = vpop.f32.mrb[26].mxu1  ;;  %7840 = vmatprep.mubr.bf16.mxu0 %v1369_v58 }
 0x26f   : > { %v1148_v63 = vadd.f32 %v7767_v62, %v9541_v30  ;;  %v1139_v0 = vpop.f32.mrb[27].mxu1  ;;  %7841 = vmatmul.mubr.bf16.gmra.mrb[84].mxu0 %v1370_v56  ;;  %v1321_v2 = vmax.f32 %v1145_v59, 0.0 }
 0x270   : > { %v1140_v1 = vadd.f32 %v9541_v30, %v1139_v0  ;;  %v1319_v4 = vmax.f32 %v1137_v61, 0.0 }
 0x271   : > { %v1322_v3 = vmax.f32 %v1148_v63, 0.0 }
 0x272   : > { %v1320_v5 = vmax.f32 %v1140_v1, 0.0 }
 0x273   : > { %v1372_v6 = vpack.c.bf16 %v1322_v3, %v1321_v2 }
 0x274   : > { %v7770_v7 = vpop.f32.mrb[28].mxu1  ;;  %v1371_v8 = vpack.c.bf16 %v1320_v5, %v1319_v4 }
 0x275   : > { %v1161_v9 = vadd.f32 %v7770_v7, %v9541_v30  ;;  %v1152_v10 = vpop.f32.mrb[29].mxu1 }
 0x276   : > { %v1153_v11 = vadd.f32 %v9541_v30, %v1152_v10  ;;  %v7771_v12 = vpop.f32.mrb[30].mxu1  ;;  %7844 = vmatprep.mubr.bf16.mxu0 %v1371_v8 }
 0x277   : > { %v1164_v13 = vadd.f32 %v7771_v12, %v9541_v30  ;;  %v1155_v14 = vpop.f32.mrb[31].mxu1  ;;  %7845 = vmatmul.mubr.bf16.gmra.mrb[88].mxu0 %v1372_v6  ;;  %v1325_v16 = vmax.f32 %v1161_v9, 0.0 }
 0x278   : > { %v1156_v15 = vadd.f32 %v9541_v30, %v1155_v14  ;;  %v1323_v18 = vmax.f32 %v1153_v11, 0.0 }
 0x279   : > { %v1326_v17 = vmax.f32 %v1164_v13, 0.0 }
 0x27a   : > { %v1324_v19 = vmax.f32 %v1156_v15, 0.0 }
 0x27b   : > { %v1374_v20 = vpack.c.bf16 %v1326_v17, %v1325_v16 }
 0x27c   : > { %v7774_v21 = vpop.f32.mrb[32].mxu1  ;;  %v1373_v22 = vpack.c.bf16 %v1324_v19, %v1323_v18 }
 0x27d   : > { %v1177_v23 = vadd.f32 %v7774_v21, %v9541_v30  ;;  %v1168_v24 = vpop.f32.mrb[33].mxu1 }
 0x27e   : > { %v1169_v25 = vadd.f32 %v9541_v30, %v1168_v24  ;;  %v7775_v26 = vpop.f32.mrb[34].mxu1  ;;  %7848 = vmatprep.mubr.bf16.mxu0 %v1373_v22 }
 0x27f   : > { %v1180_v27 = vadd.f32 %v7775_v26, %v9541_v30  ;;  %v1171_v28 = vpop.f32.mrb[35].mxu1  ;;  %7849 = vmatmul.mubr.bf16.gmra.mrb[92].mxu0 %v1374_v20  ;;  %v1329_v31 = vmax.f32 %v1177_v23, 0.0 }
 0x280   : > { %v1172_v29 = vadd.f32 %v9541_v30, %v1171_v28  ;;  %v1327_v50 = vmax.f32 %v1169_v25, 0.0 }
 0x281   : > { %v1330_v32 = vmax.f32 %v1180_v27, 0.0 }
 0x282   : > { %v1328_v33 = vmax.f32 %v1172_v29, 0.0 }
 0x283   : > { %v1376_v34 = vpack.c.bf16 %v1330_v32, %v1329_v31 }
 0x284   : > { %v7778_v35 = vpop.f32.mrb[36].mxu1  ;;  %v1375_v36 = vpack.c.bf16 %v1328_v33, %v1327_v50 }
 0x285   : > { %v1193_v37 = vadd.f32 %v7778_v35, %v9541_v30  ;;  %v1184_v38 = vpop.f32.mrb[37].mxu1 }
 0x286   : > { %v1185_v39 = vadd.f32 %v9541_v30, %v1184_v38  ;;  %v7779_v40 = vpop.f32.mrb[38].mxu1  ;;  %7852 = vmatprep.mubr.bf16.mxu0 %v1375_v36 }
 0x287   : > { %v1196_v41 = vadd.f32 %v7779_v40, %v9541_v30  ;;  %v1187_v42 = vpop.f32.mrb[39].mxu1  ;;  %7853 = vmatmul.mubr.bf16.gmra.mrb[96].mxu0 %v1376_v34  ;;  %v1333_v44 = vmax.f32 %v1193_v37, 0.0 }
 0x288   : > { %v1188_v43 = vadd.f32 %v9541_v30, %v1187_v42  ;;  %v1331_v46 = vmax.f32 %v1185_v39, 0.0 }
 0x289   : > { %v1334_v45 = vmax.f32 %v1196_v41, 0.0 }
 0x28a   : > { %v1332_v47 = vmax.f32 %v1188_v43, 0.0 }
 0x28b   : > { %v1378_v48 = vpack.c.bf16 %v1334_v45, %v1333_v44 }
 0x28c   : > { %v7782_v49 = vpop.f32.mrb[40].mxu1  ;;  %v1377_v51 = vpack.c.bf16 %v1332_v47, %v1331_v46 }
 0x28d   : > { %v1209_v52 = vadd.f32 %v7782_v49, %v9541_v30  ;;  %v1200_v53 = vpop.f32.mrb[41].mxu1 }
 0x28e   : > { %v1201_v54 = vadd.f32 %v9541_v30, %v1200_v53  ;;  %v7783_v55 = vpop.f32.mrb[42].mxu1  ;;  %7856 = vmatprep.mubr.bf16.mxu0 %v1377_v51 }
 0x28f   : > { %v1212_v56 = vadd.f32 %v7783_v55, %v9541_v30  ;;  %v1203_v57 = vpop.f32.mrb[43].mxu1  ;;  %7857 = vmatmul.mubr.bf16.gmra.mrb[100].mxu0 %v1378_v48  ;;  %v1337_v59 = vmax.f32 %v1209_v52, 0.0 }
 0x290   : > { %v1204_v58 = vadd.f32 %v9541_v30, %v1203_v57  ;;  %v1335_v61 = vmax.f32 %v1201_v54, 0.0 }
 0x291   : > { %v1338_v60 = vmax.f32 %v1212_v56, 0.0 }
 0x292   : > { %v1336_v62 = vmax.f32 %v1204_v58, 0.0 }
 0x293   : > { %v1380_v63 = vpack.c.bf16 %v1338_v60, %v1337_v59 }
 0x294   : > { %v7786_v0 = vpop.f32.mrb[44].mxu1  ;;  %v1379_v1 = vpack.c.bf16 %v1336_v62, %v1335_v61 }
 0x295   : > { %v1225_v2 = vadd.f32 %v7786_v0, %v9541_v30  ;;  %v1216_v3 = vpop.f32.mrb[45].mxu1 }
 0x296   : > { %v1217_v4 = vadd.f32 %v9541_v30, %v1216_v3  ;;  %v7787_v5 = vpop.f32.mrb[46].mxu1  ;;  %7860 = vmatprep.mubr.bf16.mxu0 %v1379_v1 }
 0x297   : > { %v1228_v6 = vadd.f32 %v7787_v5, %v9541_v30  ;;  %v1219_v7 = vpop.f32.mrb[47].mxu1  ;;  %7861 = vmatmul.mubr.bf16.gmra.mrb[104].mxu0 %v1380_v63  ;;  %v1341_v9 = vmax.f32 %v1225_v2, 0.0 }
 0x298   : > { %v1220_v8 = vadd.f32 %v9541_v30, %v1219_v7  ;;  %v1339_v11 = vmax.f32 %v1217_v4, 0.0 }
 0x299   : > { %v1342_v10 = vmax.f32 %v1228_v6, 0.0 }
 0x29a   : > { %v1340_v12 = vmax.f32 %v1220_v8, 0.0  ;;  %v8741_v8 = vld [vmem:[#allocation5 + $0x100] sm:$0xff]  }
 0x29b   : > { %v1382_v13 = vpack.c.bf16 %v1342_v10, %v1341_v9  ;;  %7964 = vmatprep.subr.bf16.mxu0 %v8741_v8  ;;  %v8742_v9 = vld [vmem:[#allocation5 + $0x108] sm:$0xff]   ;;  %v9607_v10 = vld [vmem:[#allocation7 + $0x2] ss:$0 sm:$0xff] }
 0x29c   : > { %v7790_v14 = vpop.f32.mrb[48].mxu1  ;;  %v1381_v15 = vpack.c.bf16 %v1340_v12, %v1339_v11  ;;  %7965 = vmatpush3.bf16.msra.mxu0 %v8741_v8 }
 0x29d   : > { %v1241_v16 = vadd.f32 %v7790_v14, %v9541_v30  ;;  %v1232_v17 = vpop.f32.mrb[49].mxu1  ;;  %7966 = vmatprep.subr.bf16.mxu0 %v8742_v9 }
 0x29e   : > { %v1233_v18 = vadd.f32 %v9541_v30, %v1232_v17  ;;  %v7791_v19 = vpop.f32.mrb[50].mxu1  ;;  %7864 = vmatprep.mubr.bf16.mxu0 %v1381_v15  ;;  %v8743_v17 = vld [vmem:[#allocation5 + $0x110] sm:$0xff]  }
 0x29f   : > { %v1244_v20 = vadd.f32 %v7791_v19, %v9541_v30  ;;  %v1235_v21 = vpop.f32.mrb[51].mxu1  ;;  %7865 = vmatmul.mubr.bf16.gmra.mrb[108].mxu0 %v1382_v13  ;;  %v1345_v23 = vmax.f32 %v1241_v16, 0.0 }
 0x2a0   : > { %v1236_v22 = vadd.f32 %v9541_v30, %v1235_v21  ;;  %v1343_v25 = vmax.f32 %v1233_v18, 0.0  ;;  %7967 = vmatpush3.bf16.msra.mxu0 %v8742_v9  ;;  %v8744_v18 = vld [vmem:[#allocation5 + $0x118] sm:$0xff]  }
 0x2a1   : > { %v1346_v24 = vmax.f32 %v1244_v20, 0.0  ;;  %7968 = vmatprep.subr.bf16.mxu0 %v8743_v17 }
 0x2a2   : > { %v1344_v26 = vmax.f32 %v1236_v22, 0.0 }
 0x2a3   : > { %v1384_v27 = vpack.c.bf16 %v1346_v24, %v1345_v23 }
 0x2a4   : > { %v7794_v28 = vpop.f32.mrb[52].mxu1  ;;  %v1383_v29 = vpack.c.bf16 %v1344_v26, %v1343_v25  ;;  %7969 = vmatpush3.bf16.msra.mxu0 %v8743_v17  ;;  %v8745_v25 = vld [vmem:[#allocation5 + $0x120] sm:$0xff]  }
 0x2a5   : > { %v1257_v31 = vadd.f32 %v7794_v28, %v9541_v30  ;;  %v1248_v32 = vpop.f32.mrb[53].mxu1  ;;  %7970 = vmatprep.subr.bf16.mxu0 %v8744_v18 }
 0x2a6   : > { %v1249_v50 = vadd.f32 %v9541_v30, %v1248_v32  ;;  %v7795_v33 = vpop.f32.mrb[54].mxu1  ;;  %7868 = vmatprep.mubr.bf16.mxu0 %v1383_v29 }
 0x2a7   : > { %v1260_v34 = vadd.f32 %v7795_v33, %v9541_v30  ;;  %v1251_v35 = vpop.f32.mrb[55].mxu1  ;;  %7869 = vmatmul.mubr.bf16.gmra.mrb[112].mxu0 %v1384_v27  ;;  %v1349_v37 = vmax.f32 %v1257_v31, 0.0 }
 0x2a8   : > { %v1252_v36 = vadd.f32 %v9541_v30, %v1251_v35  ;;  %v1347_v39 = vmax.f32 %v1249_v50, 0.0  ;;  %7971 = vmatpush3.bf16.msra.mxu0 %v8744_v18 }
 0x2a9   : > { %v1350_v38 = vmax.f32 %v1260_v34, 0.0  ;;  %7972 = vmatprep.subr.bf16.mxu0 %v8745_v25  ;;  %v8746_v34 = vld [vmem:[#allocation5 + $0x128] sm:$0xff]  }
 0x2aa   : > { %v1348_v40 = vmax.f32 %v1252_v36, 0.0 }
 0x2ab   : > { %v1386_v41 = vpack.c.bf16 %v1350_v38, %v1349_v37 }
 0x2ac   : > { %v7798_v42 = vpop.f32.mrb[56].mxu1  ;;  %v1385_v43 = vpack.c.bf16 %v1348_v40, %v1347_v39  ;;  %7973 = vmatpush3.bf16.msra.mxu0 %v8745_v25 }
 0x2ad   : > { %v1273_v44 = vadd.f32 %v7798_v42, %v9541_v30  ;;  %v1264_v45 = vpop.f32.mrb[57].mxu1  ;;  %7974 = vmatprep.subr.bf16.mxu0 %v8746_v34 }
 0x2ae   : > { %v1265_v46 = vadd.f32 %v9541_v30, %v1264_v45  ;;  %v7799_v47 = vpop.f32.mrb[58].mxu1  ;;  %7872 = vmatprep.mubr.bf16.mxu0 %v1385_v43 }
 0x2af   : > { %v1276_v48 = vadd.f32 %v7799_v47, %v9541_v30  ;;  %v1267_v49 = vpop.f32.mrb[59].mxu1  ;;  %7873 = vmatmul.mubr.bf16.gmra.mrb[116].mxu0 %v1386_v41  ;;  %v1353_v52 = vmax.f32 %v1273_v44, 0.0  ;;  %v8747_v41 = vld [vmem:[#allocation5 + $0x130] sm:$0xff]  }
 0x2b0   : > { %v1268_v51 = vadd.f32 %v9541_v30, %v1267_v49  ;;  %v1351_v54 = vmax.f32 %v1265_v46, 0.0  ;;  %7975 = vmatpush3.bf16.msra.mxu0 %v8746_v34 }
 0x2b1   : > { %v1354_v53 = vmax.f32 %v1276_v48, 0.0  ;;  %7976 = vmatprep.subr.bf16.mxu0 %v8747_v41 }
 0x2b2   : > { %v1352_v55 = vmax.f32 %v1268_v51, 0.0  ;;  %v8748_v51 = vld [vmem:[#allocation5 + $0x138] sm:$0xff]  }
 0x2b3   : > { %v1388_v56 = vpack.c.bf16 %v1354_v53, %v1353_v52 }
 0x2b4   : > { %v7802_v57 = vpop.f32.mrb[60].mxu1  ;;  %v1387_v58 = vpack.c.bf16 %v1352_v55, %v1351_v54  ;;  %7977 = vmatpush3.bf16.msra.mxu0 %v8747_v41 }
 0x2b5   : > { %v1289_v59 = vadd.f32 %v7802_v57, %v9541_v30  ;;  %v1280_v60 = vpop.f32.mrb[61].mxu1  ;;  %7978 = vmatprep.subr.bf16.mxu0 %v8748_v51 }
 0x2b6   : > { %v1281_v61 = vadd.f32 %v9541_v30, %v1280_v60  ;;  %v7803_v62 = vpop.f32.mrb[62].mxu1  ;;  %7876 = vmatprep.mubr.bf16.mxu0 %v1387_v58 }
 0x2b7   : > { %v1292_v63 = vadd.f32 %v7803_v62, %v9541_v30  ;;  %v1283_v0 = vpop.f32.mrb[63].mxu1  ;;  %7877 = vmatmul.mubr.bf16.gmra.mrb[120].mxu0 %v1388_v56  ;;  %v1357_v2 = vmax.f32 %v1289_v59, 0.0 }
 0x2b8   : > { %v1284_v1 = vadd.f32 %v9541_v30, %v1283_v0  ;;  %v1355_v4 = vmax.f32 %v1281_v61, 0.0  ;;  %7979 = vmatpush3.bf16.msra.mxu0 %v8748_v51 }
 0x2b9   : > { %v1358_v3 = vmax.f32 %v1292_v63, 0.0 }
 0x2ba   : > { %v1356_v5 = vmax.f32 %v1284_v1, 0.0 }
 0x2bb   : > { %v1390_v6 = vpack.c.bf16 %v1358_v3, %v1357_v2 }
 0x2bc   : > { %v1389_v7 = vpack.c.bf16 %v1356_v5, %v1355_v4 }
 0x2be   : > { %7880 = vmatprep.mubr.bf16.mxu0 %v1389_v7 }
 0x2bf   : > { %7881 = vmatmul.mubr.bf16.gmra.mrb[124].mxu0 %v1390_v6 }
 0x31a   : > { %v7822_v11 = vpop.f32.mrb[64].mxu0 }
 0x31b   : > { %v1507_v12 = vadd.f32 %v7822_v11, %v9607_v10  ;;  %v1498_v30 = vpop.f32.mrb[65].mxu0 }
 0x31c   : > { %v1499_v13 = vadd.f32 %v9607_v10, %v1498_v30  ;;  %v7823_v14 = vpop.f32.mrb[66].mxu0 }
 0x31d   : > { %v1510_v15 = vadd.f32 %v7823_v14, %v9607_v10  ;;  %v1501_v16 = vpop.f32.mrb[67].mxu0  ;;  %v1755_v20 = vmax.f32 %v1507_v12, 0.0 }
 0x31e   : > { %v1502_v19 = vadd.f32 %v9607_v10, %v1501_v16  ;;  %v1753_v22 = vmax.f32 %v1499_v13, 0.0 }
 0x31f   : > { %v1756_v21 = vmax.f32 %v1510_v15, 0.0 }
 0x320   : > { %v1754_v23 = vmax.f32 %v1502_v19, 0.0 }
 0x321   : > { %v1818_v24 = vpack.c.bf16 %v1756_v21, %v1755_v20 }
 0x322   : > { %v7826_v26 = vpop.f32.mrb[68].mxu0  ;;  %v1817_v27 = vpack.c.bf16 %v1754_v23, %v1753_v22 }
 0x323   : > { %v1523_v28 = vadd.f32 %v7826_v26, %v9607_v10  ;;  %v1514_v29 = vpop.f32.mrb[69].mxu0 }
 0x324   : > { %v1515_v31 = vadd.f32 %v9607_v10, %v1514_v29  ;;  %v7827_v32 = vpop.f32.mrb[70].mxu0  ;;  %7900 = vmatprep.mubr.bf16.mxu1 %v1817_v27 }
 0x325   : > { %v1526_v50 = vadd.f32 %v7827_v32, %v9607_v10  ;;  %v1517_v33 = vpop.f32.mrb[71].mxu0  ;;  %7901 = vmatmul.mubr.bf16.vlgmr.msra.gmra.mrb[64].mxu1 %v1818_v24  ;;  %v1759_v36 = vmax.f32 %v1523_v28, 0.0 }
 0x326   : > { %v1518_v35 = vadd.f32 %v9607_v10, %v1517_v33  ;;  %v1757_v38 = vmax.f32 %v1515_v31, 0.0 }
 0x327   : > { %v1760_v37 = vmax.f32 %v1526_v50, 0.0 }
 0x328   : > { %v1758_v39 = vmax.f32 %v1518_v35, 0.0 }
 0x329   : > { %v1820_v40 = vpack.c.bf16 %v1760_v37, %v1759_v36 }
 0x32a   : > { %v7830_v42 = vpop.f32.mrb[72].mxu0  ;;  %v1819_v43 = vpack.c.bf16 %v1758_v39, %v1757_v38 }
 0x32b   : > { %v1539_v44 = vadd.f32 %v7830_v42, %v9607_v10  ;;  %v1530_v45 = vpop.f32.mrb[73].mxu0 }
 0x32c   : > { %v1531_v46 = vadd.f32 %v9607_v10, %v1530_v45  ;;  %v7831_v47 = vpop.f32.mrb[74].mxu0  ;;  %7904 = vmatprep.mubr.bf16.mxu1 %v1819_v43 }
 0x32d   : > { %v1542_v48 = vadd.f32 %v7831_v47, %v9607_v10  ;;  %v1533_v49 = vpop.f32.mrb[75].mxu0  ;;  %7905 = vmatmul.mubr.bf16.gmra.mrb[68].mxu1 %v1820_v40  ;;  %v1763_v53 = vmax.f32 %v1539_v44, 0.0 }
 0x32e   : > { %v1534_v52 = vadd.f32 %v9607_v10, %v1533_v49  ;;  %v1761_v55 = vmax.f32 %v1531_v46, 0.0 }
 0x32f   : > { %v1764_v54 = vmax.f32 %v1542_v48, 0.0 }
 0x330   : > { %v1762_v56 = vmax.f32 %v1534_v52, 0.0 }
 0x331   : > { %v1822_v57 = vpack.c.bf16 %v1764_v54, %v1763_v53 }
 0x332   : > { %v7834_v58 = vpop.f32.mrb[76].mxu0  ;;  %v1821_v59 = vpack.c.bf16 %v1762_v56, %v1761_v55 }
 0x333   : > { %v1555_v60 = vadd.f32 %v7834_v58, %v9607_v10  ;;  %v1546_v61 = vpop.f32.mrb[77].mxu0 }
 0x334   : > { %v1547_v62 = vadd.f32 %v9607_v10, %v1546_v61  ;;  %v7835_v63 = vpop.f32.mrb[78].mxu0  ;;  %7908 = vmatprep.mubr.bf16.mxu1 %v1821_v59 }
 0x335   : > { %v1558_v0 = vadd.f32 %v7835_v63, %v9607_v10  ;;  %v1549_v1 = vpop.f32.mrb[79].mxu0  ;;  %7909 = vmatmul.mubr.bf16.gmra.mrb[72].mxu1 %v1822_v57  ;;  %v1767_v3 = vmax.f32 %v1555_v60, 0.0 }
 0x336   : > { %v1550_v2 = vadd.f32 %v9607_v10, %v1549_v1  ;;  %v1765_v5 = vmax.f32 %v1547_v62, 0.0 }
 0x337   : > { %v1768_v4 = vmax.f32 %v1558_v0, 0.0 }
 0x338   : > { %v1766_v6 = vmax.f32 %v1550_v2, 0.0 }
 0x339   : > { %v1824_v7 = vpack.c.bf16 %v1768_v4, %v1767_v3 }
 0x33a   : > { %v7838_v8 = vpop.f32.mrb[80].mxu0  ;;  %v1823_v9 = vpack.c.bf16 %v1766_v6, %v1765_v5 }
 0x33b   : > { %v1571_v11 = vadd.f32 %v7838_v8, %v9607_v10  ;;  %v1562_v12 = vpop.f32.mrb[81].mxu0 }
 0x33c   : > { %v1563_v30 = vadd.f32 %v9607_v10, %v1562_v12  ;;  %v7839_v13 = vpop.f32.mrb[82].mxu0  ;;  %7912 = vmatprep.mubr.bf16.mxu1 %v1823_v9 }
 0x33d   : > { %v1574_v14 = vadd.f32 %v7839_v13, %v9607_v10  ;;  %v1565_v15 = vpop.f32.mrb[83].mxu0  ;;  %7913 = vmatmul.mubr.bf16.gmra.mrb[76].mxu1 %v1824_v7  ;;  %v1771_v17 = vmax.f32 %v1571_v11, 0.0 }
 0x33e   : > { %v1566_v16 = vadd.f32 %v9607_v10, %v1565_v15  ;;  %v1769_v19 = vmax.f32 %v1563_v30, 0.0 }
 0x33f   : > { %v1772_v18 = vmax.f32 %v1574_v14, 0.0 }
 0x340   : > { %v1770_v20 = vmax.f32 %v1566_v16, 0.0 }
 0x341   : > { %v1826_v21 = vpack.c.bf16 %v1772_v18, %v1771_v17 }
 0x342   : > { %v7842_v22 = vpop.f32.mrb[84].mxu0  ;;  %v1825_v23 = vpack.c.bf16 %v1770_v20, %v1769_v19 }
 0x343   : > { %v1587_v24 = vadd.f32 %v7842_v22, %v9607_v10  ;;  %v1578_v25 = vpop.f32.mrb[85].mxu0 }
 0x344   : > { %v1579_v26 = vadd.f32 %v9607_v10, %v1578_v25  ;;  %v7843_v27 = vpop.f32.mrb[86].mxu0  ;;  %7916 = vmatprep.mubr.bf16.mxu1 %v1825_v23 }
 0x345   : > { %v1590_v28 = vadd.f32 %v7843_v27, %v9607_v10  ;;  %v1581_v29 = vpop.f32.mrb[87].mxu0  ;;  %7917 = vmatmul.mubr.bf16.gmra.mrb[80].mxu1 %v1826_v21  ;;  %v1775_v32 = vmax.f32 %v1587_v24, 0.0 }
 0x346   : > { %v1582_v31 = vadd.f32 %v9607_v10, %v1581_v29  ;;  %v1773_v33 = vmax.f32 %v1579_v26, 0.0 }
 0x347   : > { %v1776_v50 = vmax.f32 %v1590_v28, 0.0 }
 0x348   : > { %v1774_v34 = vmax.f32 %v1582_v31, 0.0 }
 0x349   : > { %v1828_v35 = vpack.c.bf16 %v1776_v50, %v1775_v32 }
 0x34a   : > { %v7846_v36 = vpop.f32.mrb[88].mxu0  ;;  %v1827_v37 = vpack.c.bf16 %v1774_v34, %v1773_v33 }
 0x34b   : > { %v1603_v38 = vadd.f32 %v7846_v36, %v9607_v10  ;;  %v1594_v39 = vpop.f32.mrb[89].mxu0 }
 0x34c   : > { %v1595_v40 = vadd.f32 %v9607_v10, %v1594_v39  ;;  %v7847_v41 = vpop.f32.mrb[90].mxu0  ;;  %7920 = vmatprep.mubr.bf16.mxu1 %v1827_v37 }
 0x34d   : > { %v1606_v42 = vadd.f32 %v7847_v41, %v9607_v10  ;;  %v1597_v43 = vpop.f32.mrb[91].mxu0  ;;  %7921 = vmatmul.mubr.bf16.gmra.mrb[84].mxu1 %v1828_v35  ;;  %v1779_v45 = vmax.f32 %v1603_v38, 0.0 }
 0x34e   : > { %v1598_v44 = vadd.f32 %v9607_v10, %v1597_v43  ;;  %v1777_v47 = vmax.f32 %v1595_v40, 0.0 }
 0x34f   : > { %v1780_v46 = vmax.f32 %v1606_v42, 0.0 }
 0x350   : > { %v1778_v48 = vmax.f32 %v1598_v44, 0.0 }
 0x351   : > { %v1830_v49 = vpack.c.bf16 %v1780_v46, %v1779_v45 }
 0x352   : > { %v7850_v51 = vpop.f32.mrb[92].mxu0  ;;  %v1829_v52 = vpack.c.bf16 %v1778_v48, %v1777_v47 }
 0x353   : > { %v1619_v53 = vadd.f32 %v7850_v51, %v9607_v10  ;;  %v1610_v54 = vpop.f32.mrb[93].mxu0 }
 0x354   : > { %v1611_v55 = vadd.f32 %v9607_v10, %v1610_v54  ;;  %v7851_v56 = vpop.f32.mrb[94].mxu0  ;;  %7924 = vmatprep.mubr.bf16.mxu1 %v1829_v52 }
 0x355   : > { %v1622_v57 = vadd.f32 %v7851_v56, %v9607_v10  ;;  %v1613_v58 = vpop.f32.mrb[95].mxu0  ;;  %7925 = vmatmul.mubr.bf16.gmra.mrb[88].mxu1 %v1830_v49  ;;  %v1783_v60 = vmax.f32 %v1619_v53, 0.0 }
 0x356   : > { %v1614_v59 = vadd.f32 %v9607_v10, %v1613_v58  ;;  %v1781_v62 = vmax.f32 %v1611_v55, 0.0 }
 0x357   : > { %v1784_v61 = vmax.f32 %v1622_v57, 0.0 }
 0x358   : > { %v1782_v63 = vmax.f32 %v1614_v59, 0.0 }
 0x359   : > { %v1832_v0 = vpack.c.bf16 %v1784_v61, %v1783_v60 }
 0x35a   : > { %v7854_v1 = vpop.f32.mrb[96].mxu0  ;;  %v1831_v2 = vpack.c.bf16 %v1782_v63, %v1781_v62 }
 0x35b   : > { %v1635_v3 = vadd.f32 %v7854_v1, %v9607_v10  ;;  %v1626_v4 = vpop.f32.mrb[97].mxu0 }
 0x35c   : > { %v1627_v5 = vadd.f32 %v9607_v10, %v1626_v4  ;;  %v7855_v6 = vpop.f32.mrb[98].mxu0  ;;  %7928 = vmatprep.mubr.bf16.mxu1 %v1831_v2 }
 0x35d   : > { %v1638_v7 = vadd.f32 %v7855_v6, %v9607_v10  ;;  %v1629_v8 = vpop.f32.mrb[99].mxu0  ;;  %7929 = vmatmul.mubr.bf16.gmra.mrb[92].mxu1 %v1832_v0  ;;  %v1787_v11 = vmax.f32 %v1635_v3, 0.0 }
 0x35e   : > { %v1630_v9 = vadd.f32 %v9607_v10, %v1629_v8  ;;  %v1785_v30 = vmax.f32 %v1627_v5, 0.0 }
 0x35f   : > { %v1788_v12 = vmax.f32 %v1638_v7, 0.0 }
 0x360   : > { %v1786_v13 = vmax.f32 %v1630_v9, 0.0 }
 0x361   : > { %v1834_v14 = vpack.c.bf16 %v1788_v12, %v1787_v11 }
 0x362   : > { %v7858_v15 = vpop.f32.mrb[100].mxu0  ;;  %v1833_v16 = vpack.c.bf16 %v1786_v13, %v1785_v30 }
 0x363   : > { %v1651_v17 = vadd.f32 %v7858_v15, %v9607_v10  ;;  %v1642_v18 = vpop.f32.mrb[101].mxu0 }
 0x364   : > { %v1643_v19 = vadd.f32 %v9607_v10, %v1642_v18  ;;  %v7859_v20 = vpop.f32.mrb[102].mxu0  ;;  %7932 = vmatprep.mubr.bf16.mxu1 %v1833_v16 }
 0x365   : > { %v1654_v21 = vadd.f32 %v7859_v20, %v9607_v10  ;;  %v1645_v22 = vpop.f32.mrb[103].mxu0  ;;  %7933 = vmatmul.mubr.bf16.gmra.mrb[96].mxu1 %v1834_v14  ;;  %v1791_v24 = vmax.f32 %v1651_v17, 0.0 }
 0x366   : > { %v1646_v23 = vadd.f32 %v9607_v10, %v1645_v22  ;;  %v1789_v26 = vmax.f32 %v1643_v19, 0.0 }
 0x367   : > { %v1792_v25 = vmax.f32 %v1654_v21, 0.0 }
 0x368   : > { %v1790_v27 = vmax.f32 %v1646_v23, 0.0 }
 0x369   : > { %v1836_v28 = vpack.c.bf16 %v1792_v25, %v1791_v24 }
 0x36a   : > { %v7862_v29 = vpop.f32.mrb[104].mxu0  ;;  %v1835_v31 = vpack.c.bf16 %v1790_v27, %v1789_v26 }
 0x36b   : > { %v1667_v32 = vadd.f32 %v7862_v29, %v9607_v10  ;;  %v1658_v50 = vpop.f32.mrb[105].mxu0 }
 0x36c   : > { %v1659_v33 = vadd.f32 %v9607_v10, %v1658_v50  ;;  %v7863_v34 = vpop.f32.mrb[106].mxu0  ;;  %7936 = vmatprep.mubr.bf16.mxu1 %v1835_v31 }
 0x36d   : > { %v1670_v35 = vadd.f32 %v7863_v34, %v9607_v10  ;;  %v1661_v36 = vpop.f32.mrb[107].mxu0  ;;  %7937 = vmatmul.mubr.bf16.gmra.mrb[100].mxu1 %v1836_v28  ;;  %v1795_v38 = vmax.f32 %v1667_v32, 0.0 }
 0x36e   : > { %v1662_v37 = vadd.f32 %v9607_v10, %v1661_v36  ;;  %v1793_v40 = vmax.f32 %v1659_v33, 0.0 }
 0x36f   : > { %v1796_v39 = vmax.f32 %v1670_v35, 0.0 }
 0x370   : > { %v1794_v41 = vmax.f32 %v1662_v37, 0.0 }
 0x371   : > { %v1838_v42 = vpack.c.bf16 %v1796_v39, %v1795_v38 }
 0x372   : > { %v7866_v43 = vpop.f32.mrb[108].mxu0  ;;  %v1837_v44 = vpack.c.bf16 %v1794_v41, %v1793_v40 }
 0x373   : > { %v1683_v45 = vadd.f32 %v7866_v43, %v9607_v10  ;;  %v1674_v46 = vpop.f32.mrb[109].mxu0 }
 0x374   : > { %v1675_v47 = vadd.f32 %v9607_v10, %v1674_v46  ;;  %v7867_v48 = vpop.f32.mrb[110].mxu0  ;;  %7940 = vmatprep.mubr.bf16.mxu1 %v1837_v44 }
 0x375   : > { %v1686_v49 = vadd.f32 %v7867_v48, %v9607_v10  ;;  %v1677_v51 = vpop.f32.mrb[111].mxu0  ;;  %7941 = vmatmul.mubr.bf16.gmra.mrb[104].mxu1 %v1838_v42  ;;  %v1799_v53 = vmax.f32 %v1683_v45, 0.0 }
 0x376   : > { %v1678_v52 = vadd.f32 %v9607_v10, %v1677_v51  ;;  %v1797_v55 = vmax.f32 %v1675_v47, 0.0 }
 0x377   : > { %v1800_v54 = vmax.f32 %v1686_v49, 0.0 }
 0x378   : > { %v1798_v56 = vmax.f32 %v1678_v52, 0.0  ;;  %v8749_v52 = vld [vmem:[#allocation5 + $0x140] sm:$0xff]  }
 0x379   : > { %v1840_v57 = vpack.c.bf16 %v1800_v54, %v1799_v53  ;;  %8044 = vmatprep.subr.bf16.mxu1 %v8749_v52  ;;  %v8750_v53 = vld [vmem:[#allocation5 + $0x148] sm:$0xff]   ;;  %v9673_v54 = vld [vmem:[#allocation7 + $0x3] ss:$0 sm:$0xff] }
 0x37a   : > { %v7870_v58 = vpop.f32.mrb[112].mxu0  ;;  %v1839_v59 = vpack.c.bf16 %v1798_v56, %v1797_v55  ;;  %8045 = vmatpush3.bf16.msra.mxu1 %v8749_v52 }
 0x37b   : > { %v1699_v60 = vadd.f32 %v7870_v58, %v9607_v10  ;;  %v1690_v61 = vpop.f32.mrb[113].mxu0  ;;  %8046 = vmatprep.subr.bf16.mxu1 %v8750_v53 }
 0x37c   : > { %v1691_v62 = vadd.f32 %v9607_v10, %v1690_v61  ;;  %v7871_v63 = vpop.f32.mrb[114].mxu0  ;;  %7944 = vmatprep.mubr.bf16.mxu1 %v1839_v59  ;;  %v8751_v61 = vld [vmem:[#allocation5 + $0x150] sm:$0xff]  }
 0x37d   : > { %v1702_v0 = vadd.f32 %v7871_v63, %v9607_v10  ;;  %v1693_v1 = vpop.f32.mrb[115].mxu0  ;;  %7945 = vmatmul.mubr.bf16.gmra.mrb[108].mxu1 %v1840_v57  ;;  %v1803_v3 = vmax.f32 %v1699_v60, 0.0 }
 0x37e   : > { %v1694_v2 = vadd.f32 %v9607_v10, %v1693_v1  ;;  %v1801_v5 = vmax.f32 %v1691_v62, 0.0  ;;  %8047 = vmatpush3.bf16.msra.mxu1 %v8750_v53  ;;  %v8752_v62 = vld [vmem:[#allocation5 + $0x158] sm:$0xff]  }
 0x37f   : > { %v1804_v4 = vmax.f32 %v1702_v0, 0.0  ;;  %8048 = vmatprep.subr.bf16.mxu1 %v8751_v61 }
 0x380   : > { %v1802_v6 = vmax.f32 %v1694_v2, 0.0 }
 0x381   : > { %v1842_v7 = vpack.c.bf16 %v1804_v4, %v1803_v3 }
 0x382   : > { %v7874_v8 = vpop.f32.mrb[116].mxu0  ;;  %v1841_v9 = vpack.c.bf16 %v1802_v6, %v1801_v5  ;;  %8049 = vmatpush3.bf16.msra.mxu1 %v8751_v61  ;;  %v8753_v5 = vld [vmem:[#allocation5 + $0x160] sm:$0xff]  }
 0x383   : > { %v1715_v11 = vadd.f32 %v7874_v8, %v9607_v10  ;;  %v1706_v12 = vpop.f32.mrb[117].mxu0  ;;  %8050 = vmatprep.subr.bf16.mxu1 %v8752_v62 }
 0x384   : > { %v1707_v30 = vadd.f32 %v9607_v10, %v1706_v12  ;;  %v7875_v13 = vpop.f32.mrb[118].mxu0  ;;  %7948 = vmatprep.mubr.bf16.mxu1 %v1841_v9 }
 0x385   : > { %v1718_v14 = vadd.f32 %v7875_v13, %v9607_v10  ;;  %v1709_v15 = vpop.f32.mrb[119].mxu0  ;;  %7949 = vmatmul.mubr.bf16.gmra.mrb[112].mxu1 %v1842_v7  ;;  %v1807_v17 = vmax.f32 %v1715_v11, 0.0 }
 0x386   : > { %v1710_v16 = vadd.f32 %v9607_v10, %v1709_v15  ;;  %v1805_v19 = vmax.f32 %v1707_v30, 0.0  ;;  %8051 = vmatpush3.bf16.msra.mxu1 %v8752_v62 }
 0x387   : > { %v1808_v18 = vmax.f32 %v1718_v14, 0.0  ;;  %8052 = vmatprep.subr.bf16.mxu1 %v8753_v5  ;;  %v8754_v14 = vld [vmem:[#allocation5 + $0x168] sm:$0xff]  }
 0x388   : > { %v1806_v20 = vmax.f32 %v1710_v16, 0.0 }
 0x389   : > { %v1844_v21 = vpack.c.bf16 %v1808_v18, %v1807_v17 }
 0x38a   : > { %v7878_v22 = vpop.f32.mrb[120].mxu0  ;;  %v1843_v23 = vpack.c.bf16 %v1806_v20, %v1805_v19  ;;  %8053 = vmatpush3.bf16.msra.mxu1 %v8753_v5 }
 0x38b   : > { %v1731_v24 = vadd.f32 %v7878_v22, %v9607_v10  ;;  %v1722_v25 = vpop.f32.mrb[121].mxu0  ;;  %8054 = vmatprep.subr.bf16.mxu1 %v8754_v14 }
 0x38c   : > { %v1723_v26 = vadd.f32 %v9607_v10, %v1722_v25  ;;  %v7879_v27 = vpop.f32.mrb[122].mxu0  ;;  %7952 = vmatprep.mubr.bf16.mxu1 %v1843_v23 }
 0x38d   : > { %v1734_v28 = vadd.f32 %v7879_v27, %v9607_v10  ;;  %v1725_v29 = vpop.f32.mrb[123].mxu0  ;;  %7953 = vmatmul.mubr.bf16.gmra.mrb[116].mxu1 %v1844_v21  ;;  %v1811_v32 = vmax.f32 %v1731_v24, 0.0  ;;  %v8755_v21 = vld [vmem:[#allocation5 + $0x170] sm:$0xff]  }
 0x38e   : > { %v1726_v31 = vadd.f32 %v9607_v10, %v1725_v29  ;;  %v1809_v33 = vmax.f32 %v1723_v26, 0.0  ;;  %8055 = vmatpush3.bf16.msra.mxu1 %v8754_v14 }
 0x38f   : > { %v1812_v50 = vmax.f32 %v1734_v28, 0.0  ;;  %8056 = vmatprep.subr.bf16.mxu1 %v8755_v21 }
 0x390   : > { %v1810_v34 = vmax.f32 %v1726_v31, 0.0  ;;  %v8756_v31 = vld [vmem:[#allocation5 + $0x178] sm:$0xff]  }
 0x391   : > { %v1846_v35 = vpack.c.bf16 %v1812_v50, %v1811_v32 }
 0x392   : > { %v7882_v36 = vpop.f32.mrb[124].mxu0  ;;  %v1845_v37 = vpack.c.bf16 %v1810_v34, %v1809_v33  ;;  %8057 = vmatpush3.bf16.msra.mxu1 %v8755_v21 }
 0x393   : > { %v1747_v38 = vadd.f32 %v7882_v36, %v9607_v10  ;;  %v1738_v39 = vpop.f32.mrb[125].mxu0  ;;  %8058 = vmatprep.subr.bf16.mxu1 %v8756_v31 }
 0x394   : > { %v1739_v40 = vadd.f32 %v9607_v10, %v1738_v39  ;;  %v7883_v41 = vpop.f32.mrb[126].mxu0  ;;  %7956 = vmatprep.mubr.bf16.mxu1 %v1845_v37 }
 0x395   : > { %v1750_v42 = vadd.f32 %v7883_v41, %v9607_v10  ;;  %v1741_v43 = vpop.f32.mrb[127].mxu0  ;;  %7957 = vmatmul.mubr.bf16.gmra.mrb[120].mxu1 %v1846_v35  ;;  %v1815_v45 = vmax.f32 %v1747_v38, 0.0 }
 0x396   : > { %v1742_v44 = vadd.f32 %v9607_v10, %v1741_v43  ;;  %v1813_v47 = vmax.f32 %v1739_v40, 0.0  ;;  %8059 = vmatpush3.bf16.msra.mxu1 %v8756_v31 }
 0x397   : > { %v1816_v46 = vmax.f32 %v1750_v42, 0.0 }
 0x398   : > { %v1814_v48 = vmax.f32 %v1742_v44, 0.0 }
 0x399   : > { %v1848_v49 = vpack.c.bf16 %v1816_v46, %v1815_v45 }
 0x39a   : > { %v1847_v51 = vpack.c.bf16 %v1814_v48, %v1813_v47 }
 0x39c   : > { %7960 = vmatprep.mubr.bf16.mxu1 %v1847_v51 }
 0x39d   : > { %7961 = vmatmul.mubr.bf16.gmra.mrb[124].mxu1 %v1848_v49 }
 0x3f8   : > { %v7902_v55 = vpop.f32.mrb[64].mxu1 }
 0x3f9   : > { %v1965_v56 = vadd.f32 %v7902_v55, %v9673_v54  ;;  %v1956_v10 = vpop.f32.mrb[65].mxu1 }
 0x3fa   : > { %v1957_v57 = vadd.f32 %v9673_v54, %v1956_v10  ;;  %v7903_v58 = vpop.f32.mrb[66].mxu1 }
 0x3fb   : > { %v1968_v59 = vadd.f32 %v7903_v58, %v9673_v54  ;;  %v1959_v60 = vpop.f32.mrb[67].mxu1  ;;  %v2213_v0 = vmax.f32 %v1965_v56, 0.0 }
 0x3fc   : > { %v1960_v63 = vadd.f32 %v9673_v54, %v1959_v60  ;;  %v2211_v2 = vmax.f32 %v1957_v57, 0.0 }
 0x3fd   : > { %v2214_v1 = vmax.f32 %v1968_v59, 0.0 }
 0x3fe   : > { %v2212_v3 = vmax.f32 %v1960_v63, 0.0 }
 0x3ff   : > { %v2276_v4 = vpack.c.bf16 %v2214_v1, %v2213_v0 }
 0x400   : > { %v7906_v6 = vpop.f32.mrb[68].mxu1  ;;  %v2275_v7 = vpack.c.bf16 %v2212_v3, %v2211_v2 }
 0x401   : > { %v1981_v8 = vadd.f32 %v7906_v6, %v9673_v54  ;;  %v1972_v9 = vpop.f32.mrb[69].mxu1 }
 0x402   : > { %v1973_v11 = vadd.f32 %v9673_v54, %v1972_v9  ;;  %v7907_v12 = vpop.f32.mrb[70].mxu1  ;;  %7980 = vmatprep.mubr.bf16.mxu0 %v2275_v7 }
 0x403   : > { %v1984_v30 = vadd.f32 %v7907_v12, %v9673_v54  ;;  %v1975_v13 = vpop.f32.mrb[71].mxu1  ;;  %7981 = vmatmul.mubr.bf16.vlgmr.msra.gmra.mrb[128].mxu0 %v2276_v4  ;;  %v2217_v16 = vmax.f32 %v1981_v8, 0.0 }
 0x404   : > { %v1976_v15 = vadd.f32 %v9673_v54, %v1975_v13  ;;  %v2215_v18 = vmax.f32 %v1973_v11, 0.0 }
 0x405   : > { %v2218_v17 = vmax.f32 %v1984_v30, 0.0 }
 0x406   : > { %v2216_v19 = vmax.f32 %v1976_v15, 0.0 }
 0x407   : > { %v2278_v20 = vpack.c.bf16 %v2218_v17, %v2217_v16 }
 0x408   : > { %v7910_v22 = vpop.f32.mrb[72].mxu1  ;;  %v2277_v23 = vpack.c.bf16 %v2216_v19, %v2215_v18 }
 0x409   : > { %v1997_v24 = vadd.f32 %v7910_v22, %v9673_v54  ;;  %v1988_v25 = vpop.f32.mrb[73].mxu1 }
 0x40a   : > { %v1989_v26 = vadd.f32 %v9673_v54, %v1988_v25  ;;  %v7911_v27 = vpop.f32.mrb[74].mxu1  ;;  %7984 = vmatprep.mubr.bf16.mxu0 %v2277_v23 }
 0x40b   : > { %v2000_v28 = vadd.f32 %v7911_v27, %v9673_v54  ;;  %v1991_v29 = vpop.f32.mrb[75].mxu1  ;;  %7985 = vmatmul.mubr.bf16.gmra.mrb[132].mxu0 %v2278_v20  ;;  %v2221_v50 = vmax.f32 %v1997_v24, 0.0 }
 0x40c   : > { %v1992_v32 = vadd.f32 %v9673_v54, %v1991_v29  ;;  %v2219_v34 = vmax.f32 %v1989_v26, 0.0 }
 0x40d   : > { %v2222_v33 = vmax.f32 %v2000_v28, 0.0 }
 0x40e   : > { %v2220_v35 = vmax.f32 %v1992_v32, 0.0 }
 0x40f   : > { %v2280_v36 = vpack.c.bf16 %v2222_v33, %v2221_v50 }
 0x410   : > { %v7914_v37 = vpop.f32.mrb[76].mxu1  ;;  %v2279_v38 = vpack.c.bf16 %v2220_v35, %v2219_v34 }
 0x411   : > { %v2013_v39 = vadd.f32 %v7914_v37, %v9673_v54  ;;  %v2004_v40 = vpop.f32.mrb[77].mxu1 }
 0x412   : > { %v2005_v41 = vadd.f32 %v9673_v54, %v2004_v40  ;;  %v7915_v42 = vpop.f32.mrb[78].mxu1  ;;  %7988 = vmatprep.mubr.bf16.mxu0 %v2279_v38 }
 0x413   : > { %v2016_v43 = vadd.f32 %v7915_v42, %v9673_v54  ;;  %v2007_v44 = vpop.f32.mrb[79].mxu1  ;;  %7989 = vmatmul.mubr.bf16.gmra.mrb[136].mxu0 %v2280_v36  ;;  %v2225_v46 = vmax.f32 %v2013_v39, 0.0 }
 0x414   : > { %v2008_v45 = vadd.f32 %v9673_v54, %v2007_v44  ;;  %v2223_v48 = vmax.f32 %v2005_v41, 0.0 }
 0x415   : > { %v2226_v47 = vmax.f32 %v2016_v43, 0.0 }
 0x416   : > { %v2224_v49 = vmax.f32 %v2008_v45, 0.0 }
 0x417   : > { %v2282_v51 = vpack.c.bf16 %v2226_v47, %v2225_v46 }
 0x418   : > { %v7918_v52 = vpop.f32.mrb[80].mxu1  ;;  %v2281_v53 = vpack.c.bf16 %v2224_v49, %v2223_v48 }
 0x419   : > { %v2029_v55 = vadd.f32 %v7918_v52, %v9673_v54  ;;  %v2020_v56 = vpop.f32.mrb[81].mxu1 }
 0x41a   : > { %v2021_v10 = vadd.f32 %v9673_v54, %v2020_v56  ;;  %v7919_v57 = vpop.f32.mrb[82].mxu1  ;;  %7992 = vmatprep.mubr.bf16.mxu0 %v2281_v53 }
 0x41b   : > { %v2032_v58 = vadd.f32 %v7919_v57, %v9673_v54  ;;  %v2023_v59 = vpop.f32.mrb[83].mxu1  ;;  %7993 = vmatmul.mubr.bf16.gmra.mrb[140].mxu0 %v2282_v51  ;;  %v2229_v61 = vmax.f32 %v2029_v55, 0.0 }
 0x41c   : > { %v2024_v60 = vadd.f32 %v9673_v54, %v2023_v59  ;;  %v2227_v63 = vmax.f32 %v2021_v10, 0.0 }
 0x41d   : > { %v2230_v62 = vmax.f32 %v2032_v58, 0.0 }
 0x41e   : > { %v2228_v0 = vmax.f32 %v2024_v60, 0.0 }
 0x41f   : > { %v2284_v1 = vpack.c.bf16 %v2230_v62, %v2229_v61 }
 0x420   : > { %v7922_v2 = vpop.f32.mrb[84].mxu1  ;;  %v2283_v3 = vpack.c.bf16 %v2228_v0, %v2227_v63 }
 0x421   : > { %v2045_v4 = vadd.f32 %v7922_v2, %v9673_v54  ;;  %v2036_v5 = vpop.f32.mrb[85].mxu1 }
 0x422   : > { %v2037_v6 = vadd.f32 %v9673_v54, %v2036_v5  ;;  %v7923_v7 = vpop.f32.mrb[86].mxu1  ;;  %7996 = vmatprep.mubr.bf16.mxu0 %v2283_v3 }
 0x423   : > { %v2048_v8 = vadd.f32 %v7923_v7, %v9673_v54  ;;  %v2039_v9 = vpop.f32.mrb[87].mxu1  ;;  %7997 = vmatmul.mubr.bf16.gmra.mrb[144].mxu0 %v2284_v1  ;;  %v2233_v12 = vmax.f32 %v2045_v4, 0.0 }
 0x424   : > { %v2040_v11 = vadd.f32 %v9673_v54, %v2039_v9  ;;  %v2231_v13 = vmax.f32 %v2037_v6, 0.0 }
 0x425   : > { %v2234_v30 = vmax.f32 %v2048_v8, 0.0 }
 0x426   : > { %v2232_v14 = vmax.f32 %v2040_v11, 0.0 }
 0x427   : > { %v2286_v15 = vpack.c.bf16 %v2234_v30, %v2233_v12 }
 0x428   : > { %v7926_v16 = vpop.f32.mrb[88].mxu1  ;;  %v2285_v17 = vpack.c.bf16 %v2232_v14, %v2231_v13 }
 0x429   : > { %v2061_v18 = vadd.f32 %v7926_v16, %v9673_v54  ;;  %v2052_v19 = vpop.f32.mrb[89].mxu1 }
 0x42a   : > { %v2053_v20 = vadd.f32 %v9673_v54, %v2052_v19  ;;  %v7927_v21 = vpop.f32.mrb[90].mxu1  ;;  %8000 = vmatprep.mubr.bf16.mxu0 %v2285_v17 }
 0x42b   : > { %v2064_v22 = vadd.f32 %v7927_v21, %v9673_v54  ;;  %v2055_v23 = vpop.f32.mrb[91].mxu1  ;;  %8001 = vmatmul.mubr.bf16.gmra.mrb[148].mxu0 %v2286_v15  ;;  %v2237_v25 = vmax.f32 %v2061_v18, 0.0 }
 0x42c   : > { %v2056_v24 = vadd.f32 %v9673_v54, %v2055_v23  ;;  %v2235_v27 = vmax.f32 %v2053_v20, 0.0 }
 0x42d   : > { %v2238_v26 = vmax.f32 %v2064_v22, 0.0 }
 0x42e   : > { %v2236_v28 = vmax.f32 %v2056_v24, 0.0 }
 0x42f   : > { %v2288_v29 = vpack.c.bf16 %v2238_v26, %v2237_v25 }
 0x430   : > { %v7930_v31 = vpop.f32.mrb[92].mxu1  ;;  %v2287_v32 = vpack.c.bf16 %v2236_v28, %v2235_v27 }
 0x431   : > { %v2077_v50 = vadd.f32 %v7930_v31, %v9673_v54  ;;  %v2068_v33 = vpop.f32.mrb[93].mxu1 }
 0x432   : > { %v2069_v34 = vadd.f32 %v9673_v54, %v2068_v33  ;;  %v7931_v35 = vpop.f32.mrb[94].mxu1  ;;  %8004 = vmatprep.mubr.bf16.mxu0 %v2287_v32 }
 0x433   : > { %v2080_v36 = vadd.f32 %v7931_v35, %v9673_v54  ;;  %v2071_v37 = vpop.f32.mrb[95].mxu1  ;;  %8005 = vmatmul.mubr.bf16.gmra.mrb[152].mxu0 %v2288_v29  ;;  %v2241_v39 = vmax.f32 %v2077_v50, 0.0 }
 0x434   : > { %v2072_v38 = vadd.f32 %v9673_v54, %v2071_v37  ;;  %v2239_v41 = vmax.f32 %v2069_v34, 0.0 }
 0x435   : > { %v2242_v40 = vmax.f32 %v2080_v36, 0.0 }
 0x436   : > { %v2240_v42 = vmax.f32 %v2072_v38, 0.0 }
 0x437   : > { %v2290_v43 = vpack.c.bf16 %v2242_v40, %v2241_v39 }
 0x438   : > { %v7934_v44 = vpop.f32.mrb[96].mxu1  ;;  %v2289_v45 = vpack.c.bf16 %v2240_v42, %v2239_v41 }
 0x439   : > { %v2093_v46 = vadd.f32 %v7934_v44, %v9673_v54  ;;  %v2084_v47 = vpop.f32.mrb[97].mxu1 }
 0x43a   : > { %v2085_v48 = vadd.f32 %v9673_v54, %v2084_v47  ;;  %v7935_v49 = vpop.f32.mrb[98].mxu1  ;;  %8008 = vmatprep.mubr.bf16.mxu0 %v2289_v45 }
 0x43b   : > { %v2096_v51 = vadd.f32 %v7935_v49, %v9673_v54  ;;  %v2087_v52 = vpop.f32.mrb[99].mxu1  ;;  %8009 = vmatmul.mubr.bf16.gmra.mrb[156].mxu0 %v2290_v43  ;;  %v2245_v55 = vmax.f32 %v2093_v46, 0.0 }
 0x43c   : > { %v2088_v53 = vadd.f32 %v9673_v54, %v2087_v52  ;;  %v2243_v10 = vmax.f32 %v2085_v48, 0.0 }
 0x43d   : > { %v2246_v56 = vmax.f32 %v2096_v51, 0.0 }
 0x43e   : > { %v2244_v57 = vmax.f32 %v2088_v53, 0.0 }
 0x43f   : > { %v2292_v58 = vpack.c.bf16 %v2246_v56, %v2245_v55 }
 0x440   : > { %v7938_v59 = vpop.f32.mrb[100].mxu1  ;;  %v2291_v60 = vpack.c.bf16 %v2244_v57, %v2243_v10 }
 0x441   : > { %v2109_v61 = vadd.f32 %v7938_v59, %v9673_v54  ;;  %v2100_v62 = vpop.f32.mrb[101].mxu1 }
 0x442   : > { %v2101_v63 = vadd.f32 %v9673_v54, %v2100_v62  ;;  %v7939_v0 = vpop.f32.mrb[102].mxu1  ;;  %8012 = vmatprep.mubr.bf16.mxu0 %v2291_v60 }
 0x443   : > { %v2112_v1 = vadd.f32 %v7939_v0, %v9673_v54  ;;  %v2103_v2 = vpop.f32.mrb[103].mxu1  ;;  %8013 = vmatmul.mubr.bf16.gmra.mrb[160].mxu0 %v2292_v58  ;;  %v2249_v4 = vmax.f32 %v2109_v61, 0.0 }
 0x444   : > { %v2104_v3 = vadd.f32 %v9673_v54, %v2103_v2  ;;  %v2247_v6 = vmax.f32 %v2101_v63, 0.0 }
 0x445   : > { %v2250_v5 = vmax.f32 %v2112_v1, 0.0 }
 0x446   : > { %v2248_v7 = vmax.f32 %v2104_v3, 0.0 }
 0x447   : > { %v2294_v8 = vpack.c.bf16 %v2250_v5, %v2249_v4 }
 0x448   : > { %v7942_v9 = vpop.f32.mrb[104].mxu1  ;;  %v2293_v11 = vpack.c.bf16 %v2248_v7, %v2247_v6 }
 0x449   : > { %v2125_v12 = vadd.f32 %v7942_v9, %v9673_v54  ;;  %v2116_v30 = vpop.f32.mrb[105].mxu1 }
 0x44a   : > { %v2117_v13 = vadd.f32 %v9673_v54, %v2116_v30  ;;  %v7943_v14 = vpop.f32.mrb[106].mxu1  ;;  %8016 = vmatprep.mubr.bf16.mxu0 %v2293_v11 }
 0x44b   : > { %v2128_v15 = vadd.f32 %v7943_v14, %v9673_v54  ;;  %v2119_v16 = vpop.f32.mrb[107].mxu1  ;;  %8017 = vmatmul.mubr.bf16.gmra.mrb[164].mxu0 %v2294_v8  ;;  %v2253_v18 = vmax.f32 %v2125_v12, 0.0 }
 0x44c   : > { %v2120_v17 = vadd.f32 %v9673_v54, %v2119_v16  ;;  %v2251_v20 = vmax.f32 %v2117_v13, 0.0 }
 0x44d   : > { %v2254_v19 = vmax.f32 %v2128_v15, 0.0 }
 0x44e   : > { %v2252_v21 = vmax.f32 %v2120_v17, 0.0 }
 0x44f   : > { %v2296_v22 = vpack.c.bf16 %v2254_v19, %v2253_v18 }
 0x450   : > { %v7946_v23 = vpop.f32.mrb[108].mxu1  ;;  %v2295_v24 = vpack.c.bf16 %v2252_v21, %v2251_v20 }
 0x451   : > { %v2141_v25 = vadd.f32 %v7946_v23, %v9673_v54  ;;  %v2132_v26 = vpop.f32.mrb[109].mxu1 }
 0x452   : > { %v2133_v27 = vadd.f32 %v9673_v54, %v2132_v26  ;;  %v7947_v28 = vpop.f32.mrb[110].mxu1  ;;  %8020 = vmatprep.mubr.bf16.mxu0 %v2295_v24 }
 0x453   : > { %v2144_v29 = vadd.f32 %v7947_v28, %v9673_v54  ;;  %v2135_v31 = vpop.f32.mrb[111].mxu1  ;;  %8021 = vmatmul.mubr.bf16.gmra.mrb[168].mxu0 %v2296_v22  ;;  %v2257_v50 = vmax.f32 %v2141_v25, 0.0 }
 0x454   : > { %v2136_v32 = vadd.f32 %v9673_v54, %v2135_v31  ;;  %v2255_v34 = vmax.f32 %v2133_v27, 0.0 }
 0x455   : > { %v2258_v33 = vmax.f32 %v2144_v29, 0.0 }
 0x456   : > { %v2256_v35 = vmax.f32 %v2136_v32, 0.0  ;;  %v8757_v32 = vld [vmem:[#allocation5 + $0x180] sm:$0xff]  }
 0x457   : > { %v2298_v36 = vpack.c.bf16 %v2258_v33, %v2257_v50  ;;  %8124 = vmatprep.subr.bf16.mxu0 %v8757_v32  ;;  %v8758_v50 = vld [vmem:[#allocation5 + $0x188] sm:$0xff]   ;;  %v9739_v33 = vld [vmem:[#allocation7 + $0x4] ss:$0 sm:$0xff] }
 0x458   : > { %v7950_v37 = vpop.f32.mrb[112].mxu1  ;;  %v2297_v38 = vpack.c.bf16 %v2256_v35, %v2255_v34  ;;  %8125 = vmatpush3.bf16.msra.mxu0 %v8757_v32 }
 0x459   : > { %v2157_v39 = vadd.f32 %v7950_v37, %v9673_v54  ;;  %v2148_v40 = vpop.f32.mrb[113].mxu1  ;;  %8126 = vmatprep.subr.bf16.mxu0 %v8758_v50 }
 0x45a   : > { %v2149_v41 = vadd.f32 %v9673_v54, %v2148_v40  ;;  %v7951_v42 = vpop.f32.mrb[114].mxu1  ;;  %8024 = vmatprep.mubr.bf16.mxu0 %v2297_v38  ;;  %v8759_v40 = vld [vmem:[#allocation5 + $0x190] sm:$0xff]  }
 0x45b   : > { %v2160_v43 = vadd.f32 %v7951_v42, %v9673_v54  ;;  %v2151_v44 = vpop.f32.mrb[115].mxu1  ;;  %8025 = vmatmul.mubr.bf16.gmra.mrb[172].mxu0 %v2298_v36  ;;  %v2261_v46 = vmax.f32 %v2157_v39, 0.0 }
 0x45c   : > { %v2152_v45 = vadd.f32 %v9673_v54, %v2151_v44  ;;  %v2259_v48 = vmax.f32 %v2149_v41, 0.0  ;;  %8127 = vmatpush3.bf16.msra.mxu0 %v8758_v50  ;;  %v8760_v41 = vld [vmem:[#allocation5 + $0x198] sm:$0xff]  }
 0x45d   : > { %v2262_v47 = vmax.f32 %v2160_v43, 0.0  ;;  %8128 = vmatprep.subr.bf16.mxu0 %v8759_v40 }
 0x45e   : > { %v2260_v49 = vmax.f32 %v2152_v45, 0.0 }
 0x45f   : > { %v2300_v51 = vpack.c.bf16 %v2262_v47, %v2261_v46 }
 0x460   : > { %v7954_v52 = vpop.f32.mrb[116].mxu1  ;;  %v2299_v53 = vpack.c.bf16 %v2260_v49, %v2259_v48  ;;  %8129 = vmatpush3.bf16.msra.mxu0 %v8759_v40  ;;  %v8761_v48 = vld [vmem:[#allocation5 + $0x1a0] sm:$0xff]  }
 0x461   : > { %v2173_v55 = vadd.f32 %v7954_v52, %v9673_v54  ;;  %v2164_v56 = vpop.f32.mrb[117].mxu1  ;;  %8130 = vmatprep.subr.bf16.mxu0 %v8760_v41 }
 0x462   : > { %v2165_v10 = vadd.f32 %v9673_v54, %v2164_v56  ;;  %v7955_v57 = vpop.f32.mrb[118].mxu1  ;;  %8028 = vmatprep.mubr.bf16.mxu0 %v2299_v53 }
 0x463   : > { %v2176_v58 = vadd.f32 %v7955_v57, %v9673_v54  ;;  %v2167_v59 = vpop.f32.mrb[119].mxu1  ;;  %8029 = vmatmul.mubr.bf16.gmra.mrb[176].mxu0 %v2300_v51  ;;  %v2265_v61 = vmax.f32 %v2173_v55, 0.0 }
 0x464   : > { %v2168_v60 = vadd.f32 %v9673_v54, %v2167_v59  ;;  %v2263_v63 = vmax.f32 %v2165_v10, 0.0  ;;  %8131 = vmatpush3.bf16.msra.mxu0 %v8760_v41 }
 0x465   : > { %v2266_v62 = vmax.f32 %v2176_v58, 0.0  ;;  %8132 = vmatprep.subr.bf16.mxu0 %v8761_v48  ;;  %v8762_v58 = vld [vmem:[#allocation5 + $0x1a8] sm:$0xff]  }
 0x466   : > { %v2264_v0 = vmax.f32 %v2168_v60, 0.0 }
 0x467   : > { %v2302_v1 = vpack.c.bf16 %v2266_v62, %v2265_v61 }
 0x468   : > { %v7958_v2 = vpop.f32.mrb[120].mxu1  ;;  %v2301_v3 = vpack.c.bf16 %v2264_v0, %v2263_v63  ;;  %8133 = vmatpush3.bf16.msra.mxu0 %v8761_v48 }
 0x469   : > { %v2189_v4 = vadd.f32 %v7958_v2, %v9673_v54  ;;  %v2180_v5 = vpop.f32.mrb[121].mxu1  ;;  %8134 = vmatprep.subr.bf16.mxu0 %v8762_v58 }
 0x46a   : > { %v2181_v6 = vadd.f32 %v9673_v54, %v2180_v5  ;;  %v7959_v7 = vpop.f32.mrb[122].mxu1  ;;  %8032 = vmatprep.mubr.bf16.mxu0 %v2301_v3 }
 0x46b   : > { %v2192_v8 = vadd.f32 %v7959_v7, %v9673_v54  ;;  %v2183_v9 = vpop.f32.mrb[123].mxu1  ;;  %8033 = vmatmul.mubr.bf16.gmra.mrb[180].mxu0 %v2302_v1  ;;  %v2269_v12 = vmax.f32 %v2189_v4, 0.0  ;;  %v8763_v1 = vld [vmem:[#allocation5 + $0x1b0] sm:$0xff]  }
 0x46c   : > { %v2184_v11 = vadd.f32 %v9673_v54, %v2183_v9  ;;  %v2267_v13 = vmax.f32 %v2181_v6, 0.0  ;;  %8135 = vmatpush3.bf16.msra.mxu0 %v8762_v58 }
 0x46d   : > { %v2270_v30 = vmax.f32 %v2192_v8, 0.0  ;;  %8136 = vmatprep.subr.bf16.mxu0 %v8763_v1 }
 0x46e   : > { %v2268_v14 = vmax.f32 %v2184_v11, 0.0  ;;  %v8764_v11 = vld [vmem:[#allocation5 + $0x1b8] sm:$0xff]  }
 0x46f   : > { %v2304_v15 = vpack.c.bf16 %v2270_v30, %v2269_v12 }
 0x470   : > { %v7962_v16 = vpop.f32.mrb[124].mxu1  ;;  %v2303_v17 = vpack.c.bf16 %v2268_v14, %v2267_v13  ;;  %8137 = vmatpush3.bf16.msra.mxu0 %v8763_v1 }
 0x471   : > { %v2205_v18 = vadd.f32 %v7962_v16, %v9673_v54  ;;  %v2196_v19 = vpop.f32.mrb[125].mxu1  ;;  %8138 = vmatprep.subr.bf16.mxu0 %v8764_v11 }
 0x472   : > { %v2197_v20 = vadd.f32 %v9673_v54, %v2196_v19  ;;  %v7963_v21 = vpop.f32.mrb[126].mxu1  ;;  %8036 = vmatprep.mubr.bf16.mxu0 %v2303_v17 }
 0x473   : > { %v2208_v22 = vadd.f32 %v7963_v21, %v9673_v54  ;;  %v2199_v23 = vpop.f32.mrb[127].mxu1  ;;  %8037 = vmatmul.mubr.bf16.gmra.mrb[184].mxu0 %v2304_v15  ;;  %v2273_v25 = vmax.f32 %v2205_v18, 0.0 }
 0x474   : > { %v2200_v24 = vadd.f32 %v9673_v54, %v2199_v23  ;;  %v2271_v27 = vmax.f32 %v2197_v20, 0.0  ;;  %8139 = vmatpush3.bf16.msra.mxu0 %v8764_v11 }
 0x475   : > { %v2274_v26 = vmax.f32 %v2208_v22, 0.0 }
 0x476   : > { %v2272_v28 = vmax.f32 %v2200_v24, 0.0 }
 0x477   : > { %v2306_v29 = vpack.c.bf16 %v2274_v26, %v2273_v25 }
 0x478   : > { %v2305_v31 = vpack.c.bf16 %v2272_v28, %v2271_v27 }
 0x47a   : > { %8040 = vmatprep.mubr.bf16.mxu0 %v2305_v31 }
 0x47b   : > { %8041 = vmatmul.mubr.bf16.gmra.mrb[188].mxu0 %v2306_v29 }
 0x4d6   : > { %v7982_v34 = vpop.f32.mrb[128].mxu0 }
 0x4d7   : > { %v2423_v35 = vadd.f32 %v7982_v34, %v9739_v33  ;;  %v2414_v54 = vpop.f32.mrb[129].mxu0 }
 0x4d8   : > { %v2415_v36 = vadd.f32 %v9739_v33, %v2414_v54  ;;  %v7983_v37 = vpop.f32.mrb[130].mxu0 }
 0x4d9   : > { %v2426_v38 = vadd.f32 %v7983_v37, %v9739_v33  ;;  %v2417_v39 = vpop.f32.mrb[131].mxu0  ;;  %v2671_v43 = vmax.f32 %v2423_v35, 0.0 }
 0x4da   : > { %v2418_v42 = vadd.f32 %v9739_v33, %v2417_v39  ;;  %v2669_v45 = vmax.f32 %v2415_v36, 0.0 }
 0x4db   : > { %v2672_v44 = vmax.f32 %v2426_v38, 0.0 }
 0x4dc   : > { %v2670_v46 = vmax.f32 %v2418_v42, 0.0 }
 0x4dd   : > { %v2734_v47 = vpack.c.bf16 %v2672_v44, %v2671_v43 }
 0x4de   : > { %v2733_v49 = vpack.c.bf16 %v2670_v46, %v2669_v45  ;;  %v7986_v51 = vpop.f32.mrb[132].mxu0 }
 0x4df   : > { %v2439_v52 = vadd.f32 %v7986_v51, %v9739_v33  ;;  %v2430_v53 = vpop.f32.mrb[133].mxu0 }
 0x4e0   : > { %v2431_v55 = vadd.f32 %v9739_v33, %v2430_v53  ;;  %v7987_v56 = vpop.f32.mrb[134].mxu0  ;;  %8060 = vmatprep.mubr.bf16.mxu1 %v2733_v49 }
 0x4e1   : > { %v2442_v10 = vadd.f32 %v7987_v56, %v9739_v33  ;;  %v2433_v57 = vpop.f32.mrb[135].mxu0  ;;  %8061 = vmatmul.mubr.bf16.vlgmr.msra.gmra.mrb[128].mxu1 %v2734_v47  ;;  %v2675_v60 = vmax.f32 %v2439_v52, 0.0 }
 0x4e2   : > { %v2434_v59 = vadd.f32 %v9739_v33, %v2433_v57  ;;  %v2673_v62 = vmax.f32 %v2431_v55, 0.0 }
 0x4e3   : > { %v2676_v61 = vmax.f32 %v2442_v10, 0.0 }
 0x4e4   : > { %v2674_v63 = vmax.f32 %v2434_v59, 0.0 }
 0x4e5   : > { %v2736_v0 = vpack.c.bf16 %v2676_v61, %v2675_v60 }
 0x4e6   : > { %v2735_v2 = vpack.c.bf16 %v2674_v63, %v2673_v62  ;;  %v7990_v3 = vpop.f32.mrb[136].mxu0 }
 0x4e7   : > { %v2455_v4 = vadd.f32 %v7990_v3, %v9739_v33  ;;  %v2446_v5 = vpop.f32.mrb[137].mxu0 }
 0x4e8   : > { %v2447_v6 = vadd.f32 %v9739_v33, %v2446_v5  ;;  %v7991_v7 = vpop.f32.mrb[138].mxu0  ;;  %8064 = vmatprep.mubr.bf16.mxu1 %v2735_v2 }
 0x4e9   : > { %v2458_v8 = vadd.f32 %v7991_v7, %v9739_v33  ;;  %v2449_v9 = vpop.f32.mrb[139].mxu0  ;;  %8065 = vmatmul.mubr.bf16.gmra.mrb[132].mxu1 %v2736_v0  ;;  %v2679_v30 = vmax.f32 %v2455_v4, 0.0 }
 0x4ea   : > { %v2450_v12 = vadd.f32 %v9739_v33, %v2449_v9  ;;  %v2677_v14 = vmax.f32 %v2447_v6, 0.0 }
 0x4eb   : > { %v2680_v13 = vmax.f32 %v2458_v8, 0.0 }
 0x4ec   : > { %v2678_v15 = vmax.f32 %v2450_v12, 0.0 }
 0x4ed   : > { %v2738_v16 = vpack.c.bf16 %v2680_v13, %v2679_v30 }
 0x4ee   : > { %v2737_v17 = vpack.c.bf16 %v2678_v15, %v2677_v14  ;;  %v7994_v18 = vpop.f32.mrb[140].mxu0 }
 0x4ef   : > { %v2471_v19 = vadd.f32 %v7994_v18, %v9739_v33  ;;  %v2462_v20 = vpop.f32.mrb[141].mxu0 }
 0x4f0   : > { %v2463_v21 = vadd.f32 %v9739_v33, %v2462_v20  ;;  %v7995_v22 = vpop.f32.mrb[142].mxu0  ;;  %8068 = vmatprep.mubr.bf16.mxu1 %v2737_v17 }
 0x4f1   : > { %v2474_v23 = vadd.f32 %v7995_v22, %v9739_v33  ;;  %v2465_v24 = vpop.f32.mrb[143].mxu0  ;;  %8069 = vmatmul.mubr.bf16.gmra.mrb[136].mxu1 %v2738_v16  ;;  %v2683_v26 = vmax.f32 %v2471_v19, 0.0 }
 0x4f2   : > { %v2466_v25 = vadd.f32 %v9739_v33, %v2465_v24  ;;  %v2681_v28 = vmax.f32 %v2463_v21, 0.0 }
 0x4f3   : > { %v2684_v27 = vmax.f32 %v2474_v23, 0.0 }
 0x4f4   : > { %v2682_v29 = vmax.f32 %v2466_v25, 0.0 }
 0x4f5   : > { %v2740_v31 = vpack.c.bf16 %v2684_v27, %v2683_v26 }
 0x4f6   : > { %v2739_v32 = vpack.c.bf16 %v2682_v29, %v2681_v28  ;;  %v7998_v50 = vpop.f32.mrb[144].mxu0 }
 0x4f7   : > { %v2487_v34 = vadd.f32 %v7998_v50, %v9739_v33  ;;  %v2478_v35 = vpop.f32.mrb[145].mxu0 }
 0x4f8   : > { %v2479_v54 = vadd.f32 %v9739_v33, %v2478_v35  ;;  %v7999_v36 = vpop.f32.mrb[146].mxu0  ;;  %8072 = vmatprep.mubr.bf16.mxu1 %v2739_v32 }
 0x4f9   : > { %v2490_v37 = vadd.f32 %v7999_v36, %v9739_v33  ;;  %v2481_v38 = vpop.f32.mrb[147].mxu0  ;;  %8073 = vmatmul.mubr.bf16.gmra.mrb[140].mxu1 %v2740_v31  ;;  %v2687_v40 = vmax.f32 %v2487_v34, 0.0 }
 0x4fa   : > { %v2482_v39 = vadd.f32 %v9739_v33, %v2481_v38  ;;  %v2685_v42 = vmax.f32 %v2479_v54, 0.0 }
 0x4fb   : > { %v2688_v41 = vmax.f32 %v2490_v37, 0.0 }
 0x4fc   : > { %v2686_v43 = vmax.f32 %v2482_v39, 0.0 }
 0x4fd   : > { %v2742_v44 = vpack.c.bf16 %v2688_v41, %v2687_v40 }
 0x4fe   : > { %v2741_v45 = vpack.c.bf16 %v2686_v43, %v2685_v42  ;;  %v8002_v46 = vpop.f32.mrb[148].mxu0 }
 0x4ff   : > { %v2503_v47 = vadd.f32 %v8002_v46, %v9739_v33  ;;  %v2494_v48 = vpop.f32.mrb[149].mxu0 }
 0x500   : > { %v2495_v49 = vadd.f32 %v9739_v33, %v2494_v48  ;;  %v8003_v51 = vpop.f32.mrb[150].mxu0  ;;  %8076 = vmatprep.mubr.bf16.mxu1 %v2741_v45 }
 0x501   : > { %v2506_v52 = vadd.f32 %v8003_v51, %v9739_v33  ;;  %v2497_v53 = vpop.f32.mrb[151].mxu0  ;;  %8077 = vmatmul.mubr.bf16.gmra.mrb[144].mxu1 %v2742_v44  ;;  %v2691_v56 = vmax.f32 %v2503_v47, 0.0 }
 0x502   : > { %v2498_v55 = vadd.f32 %v9739_v33, %v2497_v53  ;;  %v2689_v57 = vmax.f32 %v2495_v49, 0.0 }
 0x503   : > { %v2692_v10 = vmax.f32 %v2506_v52, 0.0 }
 0x504   : > { %v2690_v58 = vmax.f32 %v2498_v55, 0.0 }
 0x505   : > { %v2744_v59 = vpack.c.bf16 %v2692_v10, %v2691_v56 }
 0x506   : > { %v2743_v60 = vpack.c.bf16 %v2690_v58, %v2689_v57  ;;  %v8006_v61 = vpop.f32.mrb[152].mxu0 }
 0x507   : > { %v2519_v62 = vadd.f32 %v8006_v61, %v9739_v33  ;;  %v2510_v63 = vpop.f32.mrb[153].mxu0 }
 0x508   : > { %v2511_v0 = vadd.f32 %v9739_v33, %v2510_v63  ;;  %v8007_v1 = vpop.f32.mrb[154].mxu0  ;;  %8080 = vmatprep.mubr.bf16.mxu1 %v2743_v60 }
 0x509   : > { %v2522_v2 = vadd.f32 %v8007_v1, %v9739_v33  ;;  %v2513_v3 = vpop.f32.mrb[155].mxu0  ;;  %8081 = vmatmul.mubr.bf16.gmra.mrb[148].mxu1 %v2744_v59  ;;  %v2695_v5 = vmax.f32 %v2519_v62, 0.0 }
 0x50a   : > { %v2514_v4 = vadd.f32 %v9739_v33, %v2513_v3  ;;  %v2693_v7 = vmax.f32 %v2511_v0, 0.0 }
 0x50b   : > { %v2696_v6 = vmax.f32 %v2522_v2, 0.0 }
 0x50c   : > { %v2694_v8 = vmax.f32 %v2514_v4, 0.0 }
 0x50d   : > { %v2746_v9 = vpack.c.bf16 %v2696_v6, %v2695_v5 }
 0x50e   : > { %v2745_v11 = vpack.c.bf16 %v2694_v8, %v2693_v7  ;;  %v8010_v12 = vpop.f32.mrb[156].mxu0 }
 0x50f   : > { %v2535_v30 = vadd.f32 %v8010_v12, %v9739_v33  ;;  %v2526_v13 = vpop.f32.mrb[157].mxu0 }
 0x510   : > { %v2527_v14 = vadd.f32 %v9739_v33, %v2526_v13  ;;  %v8011_v15 = vpop.f32.mrb[158].mxu0  ;;  %8084 = vmatprep.mubr.bf16.mxu1 %v2745_v11 }
 0x511   : > { %v2538_v16 = vadd.f32 %v8011_v15, %v9739_v33  ;;  %v2529_v17 = vpop.f32.mrb[159].mxu0  ;;  %8085 = vmatmul.mubr.bf16.gmra.mrb[152].mxu1 %v2746_v9  ;;  %v2699_v19 = vmax.f32 %v2535_v30, 0.0 }
 0x512   : > { %v2530_v18 = vadd.f32 %v9739_v33, %v2529_v17  ;;  %v2697_v21 = vmax.f32 %v2527_v14, 0.0 }
 0x513   : > { %v2700_v20 = vmax.f32 %v2538_v16, 0.0 }
 0x514   : > { %v2698_v22 = vmax.f32 %v2530_v18, 0.0 }
 0x515   : > { %v2748_v23 = vpack.c.bf16 %v2700_v20, %v2699_v19 }
 0x516   : > { %v2747_v24 = vpack.c.bf16 %v2698_v22, %v2697_v21  ;;  %v8014_v25 = vpop.f32.mrb[160].mxu0 }
 0x517   : > { %v2551_v26 = vadd.f32 %v8014_v25, %v9739_v33  ;;  %v2542_v27 = vpop.f32.mrb[161].mxu0 }
 0x518   : > { %v2543_v28 = vadd.f32 %v9739_v33, %v2542_v27  ;;  %v8015_v29 = vpop.f32.mrb[162].mxu0  ;;  %8088 = vmatprep.mubr.bf16.mxu1 %v2747_v24 }
 0x519   : > { %v2554_v31 = vadd.f32 %v8015_v29, %v9739_v33  ;;  %v2545_v32 = vpop.f32.mrb[163].mxu0  ;;  %8089 = vmatmul.mubr.bf16.gmra.mrb[156].mxu1 %v2748_v23  ;;  %v2703_v34 = vmax.f32 %v2551_v26, 0.0 }
 0x51a   : > { %v2546_v50 = vadd.f32 %v9739_v33, %v2545_v32  ;;  %v2701_v54 = vmax.f32 %v2543_v28, 0.0 }
 0x51b   : > { %v2704_v35 = vmax.f32 %v2554_v31, 0.0 }
 0x51c   : > { %v2702_v36 = vmax.f32 %v2546_v50, 0.0 }
 0x51d   : > { %v2750_v37 = vpack.c.bf16 %v2704_v35, %v2703_v34 }
 0x51e   : > { %v2749_v38 = vpack.c.bf16 %v2702_v36, %v2701_v54  ;;  %v8018_v39 = vpop.f32.mrb[164].mxu0 }
 0x51f   : > { %v2567_v40 = vadd.f32 %v8018_v39, %v9739_v33  ;;  %v2558_v41 = vpop.f32.mrb[165].mxu0 }
 0x520   : > { %v2559_v42 = vadd.f32 %v9739_v33, %v2558_v41  ;;  %v8019_v43 = vpop.f32.mrb[166].mxu0  ;;  %8092 = vmatprep.mubr.bf16.mxu1 %v2749_v38 }
 0x521   : > { %v2570_v44 = vadd.f32 %v8019_v43, %v9739_v33  ;;  %v2561_v45 = vpop.f32.mrb[167].mxu0  ;;  %8093 = vmatmul.mubr.bf16.gmra.mrb[160].mxu1 %v2750_v37  ;;  %v2707_v47 = vmax.f32 %v2567_v40, 0.0 }
 0x522   : > { %v2562_v46 = vadd.f32 %v9739_v33, %v2561_v45  ;;  %v2705_v49 = vmax.f32 %v2559_v42, 0.0 }
 0x523   : > { %v2708_v48 = vmax.f32 %v2570_v44, 0.0 }
 0x524   : > { %v2706_v51 = vmax.f32 %v2562_v46, 0.0 }
 0x525   : > { %v2752_v52 = vpack.c.bf16 %v2708_v48, %v2707_v47 }
 0x526   : > { %v2751_v53 = vpack.c.bf16 %v2706_v51, %v2705_v49  ;;  %v8022_v55 = vpop.f32.mrb[168].mxu0 }
 0x527   : > { %v2583_v56 = vadd.f32 %v8022_v55, %v9739_v33  ;;  %v2574_v10 = vpop.f32.mrb[169].mxu0 }
 0x528   : > { %v2575_v57 = vadd.f32 %v9739_v33, %v2574_v10  ;;  %v8023_v58 = vpop.f32.mrb[170].mxu0  ;;  %8096 = vmatprep.mubr.bf16.mxu1 %v2751_v53 }
 0x529   : > { %v2586_v59 = vadd.f32 %v8023_v58, %v9739_v33  ;;  %v2577_v60 = vpop.f32.mrb[171].mxu0  ;;  %8097 = vmatmul.mubr.bf16.gmra.mrb[164].mxu1 %v2752_v52  ;;  %v2711_v62 = vmax.f32 %v2583_v56, 0.0 }
 0x52a   : > { %v2578_v61 = vadd.f32 %v9739_v33, %v2577_v60  ;;  %v2709_v0 = vmax.f32 %v2575_v57, 0.0 }
 0x52b   : > { %v2712_v63 = vmax.f32 %v2586_v59, 0.0 }
 0x52c   : > { %v2710_v1 = vmax.f32 %v2578_v61, 0.0 }
 0x52d   : > { %v2754_v2 = vpack.c.bf16 %v2712_v63, %v2711_v62 }
 0x52e   : > { %v2753_v3 = vpack.c.bf16 %v2710_v1, %v2709_v0  ;;  %v8026_v4 = vpop.f32.mrb[172].mxu0 }
 0x52f   : > { %v2599_v5 = vadd.f32 %v8026_v4, %v9739_v33  ;;  %v2590_v6 = vpop.f32.mrb[173].mxu0 }
 0x530   : > { %v2591_v7 = vadd.f32 %v9739_v33, %v2590_v6  ;;  %v8027_v8 = vpop.f32.mrb[174].mxu0  ;;  %8100 = vmatprep.mubr.bf16.mxu1 %v2753_v3 }
 0x531   : > { %v2602_v9 = vadd.f32 %v8027_v8, %v9739_v33  ;;  %v2593_v11 = vpop.f32.mrb[175].mxu0  ;;  %8101 = vmatmul.mubr.bf16.gmra.mrb[168].mxu1 %v2754_v2  ;;  %v2715_v30 = vmax.f32 %v2599_v5, 0.0 }
 0x532   : > { %v2594_v12 = vadd.f32 %v9739_v33, %v2593_v11  ;;  %v2713_v14 = vmax.f32 %v2591_v7, 0.0 }
 0x533   : > { %v2716_v13 = vmax.f32 %v2602_v9, 0.0 }
 0x534   : > { %v2714_v15 = vmax.f32 %v2594_v12, 0.0  ;;  %v8765_v12 = vld [vmem:[#allocation5 + $0x1c0] sm:$0xff]  }
 0x535   : > { %v2756_v16 = vpack.c.bf16 %v2716_v13, %v2715_v30  ;;  %8204 = vmatprep.subr.bf16.mxu1 %v8765_v12  ;;  %v8766_v30 = vld [vmem:[#allocation5 + $0x1c8] sm:$0xff]  }
 0x536   : > { %v2755_v17 = vpack.c.bf16 %v2714_v15, %v2713_v14  ;;  %v8030_v18 = vpop.f32.mrb[176].mxu0  ;;  %8205 = vmatpush3.bf16.msra.mxu1 %v8765_v12  ;;  %v9805_v14 = vld [vmem:[#allocation7 + $0x5] ss:$0 sm:$0xff] }
 0x537   : > { %v2615_v19 = vadd.f32 %v8030_v18, %v9739_v33  ;;  %v2606_v20 = vpop.f32.mrb[177].mxu0  ;;  %8206 = vmatprep.subr.bf16.mxu1 %v8766_v30 }
 0x538   : > { %v2607_v21 = vadd.f32 %v9739_v33, %v2606_v20  ;;  %v8031_v22 = vpop.f32.mrb[178].mxu0  ;;  %8104 = vmatprep.mubr.bf16.mxu1 %v2755_v17 }
 0x539   : > { %v2618_v23 = vadd.f32 %v8031_v22, %v9739_v33  ;;  %v2609_v24 = vpop.f32.mrb[179].mxu0  ;;  %8105 = vmatmul.mubr.bf16.gmra.mrb[172].mxu1 %v2756_v16  ;;  %v2719_v26 = vmax.f32 %v2615_v19, 0.0  ;;  %v8767_v16 = vld [vmem:[#allocation5 + $0x1d0] sm:$0xff]  }
 0x53a   : > { %v2610_v25 = vadd.f32 %v9739_v33, %v2609_v24  ;;  %v2717_v28 = vmax.f32 %v2607_v21, 0.0  ;;  %8207 = vmatpush3.bf16.msra.mxu1 %v8766_v30  ;;  %v8769_v24 = vld [vmem:[#allocation5 + $0x1e0] sm:$0xff]  }
 0x53b   : > { %v2720_v27 = vmax.f32 %v2618_v23, 0.0  ;;  %8208 = vmatprep.subr.bf16.mxu1 %v8767_v16 }
 0x53c   : > { %v2718_v29 = vmax.f32 %v2610_v25, 0.0 }
 0x53d   : > { %v2758_v31 = vpack.c.bf16 %v2720_v27, %v2719_v26 }
 0x53e   : > { %v2757_v32 = vpack.c.bf16 %v2718_v29, %v2717_v28  ;;  %v8034_v50 = vpop.f32.mrb[180].mxu0  ;;  %8209 = vmatpush3.bf16.msra.mxu1 %v8767_v16  ;;  %v8770_v28 = vld [vmem:[#allocation5 + $0x1e8] sm:$0xff]  }
 0x53f   : > { %v2631_v34 = vadd.f32 %v8034_v50, %v9739_v33  ;;  %v2622_v35 = vpop.f32.mrb[181].mxu0 }
 0x540   : > { %v2623_v54 = vadd.f32 %v9739_v33, %v2622_v35  ;;  %v8035_v36 = vpop.f32.mrb[182].mxu0  ;;  %8108 = vmatprep.mubr.bf16.mxu1 %v2757_v32 }
 0x541   : > { %v2634_v37 = vadd.f32 %v8035_v36, %v9739_v33  ;;  %v2625_v38 = vpop.f32.mrb[183].mxu0  ;;  %8109 = vmatmul.mubr.bf16.gmra.mrb[176].mxu1 %v2758_v31  ;;  %v2723_v40 = vmax.f32 %v2631_v34, 0.0  ;;  %v8771_v36 = vld [vmem:[#allocation5 + $0x1f0] sm:$0xff]  }
 0x542   : > { %v2626_v39 = vadd.f32 %v9739_v33, %v2625_v38  ;;  %v2721_v42 = vmax.f32 %v2623_v54, 0.0 }
 0x543   : > { %v2724_v41 = vmax.f32 %v2634_v37, 0.0 }
 0x544   : > { %v2722_v43 = vmax.f32 %v2626_v39, 0.0 }
 0x545   : > { %v2760_v44 = vpack.c.bf16 %v2724_v41, %v2723_v40  ;;  %v8772_v40 = vld [vmem:[#allocation5 + $0x1f8] sm:$0xff]  }
 0x546   : > { %v2759_v45 = vpack.c.bf16 %v2722_v43, %v2721_v42  ;;  %v8038_v46 = vpop.f32.mrb[184].mxu0 }
 0x547   : > { %v2647_v47 = vadd.f32 %v8038_v46, %v9739_v33  ;;  %v2638_v48 = vpop.f32.mrb[185].mxu0 }
 0x548   : > { %v2639_v49 = vadd.f32 %v9739_v33, %v2638_v48  ;;  %v8039_v51 = vpop.f32.mrb[186].mxu0  ;;  %8112 = vmatprep.mubr.bf16.mxu1 %v2759_v45 }
 0x549   : > { %v2650_v52 = vadd.f32 %v8039_v51, %v9739_v33  ;;  %v2641_v53 = vpop.f32.mrb[187].mxu0  ;;  %8113 = vmatmul.mubr.bf16.gmra.mrb[180].mxu1 %v2760_v44  ;;  %v2727_v56 = vmax.f32 %v2647_v47, 0.0 }
 0x54a   : > { %v2642_v55 = vadd.f32 %v9739_v33, %v2641_v53  ;;  %v2725_v57 = vmax.f32 %v2639_v49, 0.0 }
 0x54b   : > { %v2728_v10 = vmax.f32 %v2650_v52, 0.0 }
 0x54c   : > { %v2726_v58 = vmax.f32 %v2642_v55, 0.0 }
 0x54d   : > { %v2762_v59 = vpack.c.bf16 %v2728_v10, %v2727_v56 }
 0x54e   : > { %v2761_v60 = vpack.c.bf16 %v2726_v58, %v2725_v57  ;;  %v8042_v61 = vpop.f32.mrb[188].mxu0 }
 0x54f   : > { %v2663_v62 = vadd.f32 %v8042_v61, %v9739_v33  ;;  %v2654_v63 = vpop.f32.mrb[189].mxu0 }
 0x550   : > { %v2655_v0 = vadd.f32 %v9739_v33, %v2654_v63  ;;  %v8043_v1 = vpop.f32.mrb[190].mxu0  ;;  %8116 = vmatprep.mubr.bf16.mxu1 %v2761_v60 }
 0x551   : > { %v2666_v2 = vadd.f32 %v8043_v1, %v9739_v33  ;;  %v2657_v3 = vpop.f32.mrb[191].mxu0  ;;  %8117 = vmatmul.mubr.bf16.gmra.mrb[184].mxu1 %v2762_v59  ;;  %v2731_v5 = vmax.f32 %v2663_v62, 0.0 }
 0x552   : > { %v2658_v4 = vadd.f32 %v9739_v33, %v2657_v3  ;;  %v2729_v7 = vmax.f32 %v2655_v0, 0.0  ;;  %v8768_v33 = vld [vmem:[#allocation5 + $0x1d8] sm:$0xff]  }
 0x553   : > { %v2732_v6 = vmax.f32 %v2666_v2, 0.0  ;;  %8210 = vmatprep.subr.bf16.mxu1 %v8768_v33 }
 0x554   : > { %v2730_v8 = vmax.f32 %v2658_v4, 0.0  ;;  %8211 = vmatpush3.bf16.msra.mxu1 %v8768_v33 }
 0x555   : > { %v2764_v9 = vpack.c.bf16 %v2732_v6, %v2731_v5  ;;  %8212 = vmatprep.subr.bf16.mxu1 %v8769_v24 }
 0x556   : > { %v2763_v11 = vpack.c.bf16 %v2730_v8, %v2729_v7 }
 0x558   : > { %8120 = vmatprep.mubr.bf16.mxu1 %v2763_v11  ;;  %8213 = vmatpush3.bf16.msra.mxu1 %v8769_v24 }
 0x559   : > { %8121 = vmatmul.mubr.bf16.gmra.mrb[188].mxu1 %v2764_v9  ;;  %8214 = vmatprep.subr.bf16.mxu1 %v8770_v28 }
 0x55c   : > { %8215 = vmatpush3.bf16.msra.mxu1 %v8770_v28 }
 0x55d   : > { %8216 = vmatprep.subr.bf16.mxu1 %v8771_v36 }
 0x560   : > { %8217 = vmatpush3.bf16.msra.mxu1 %v8771_v36 }
 0x561   : > { %8218 = vmatprep.subr.bf16.mxu1 %v8772_v40 }
 0x564   : > { %8219 = vmatpush3.bf16.msra.mxu1 %v8772_v40 }
 0x5b4   : > { %v8062_v13 = vpop.f32.mrb[128].mxu1 }
 0x5b5   : > { %v2872_v15 = vpop.f32.mrb[129].mxu1  ;;  %v2881_v18 = vadd.f32 %v8062_v13, %v9805_v14 }
 0x5b6   : > { %v8063_v17 = vpop.f32.mrb[130].mxu1  ;;  %v2873_v21 = vadd.f32 %v9805_v14, %v2872_v15 }
 0x5b7   : > { %v2884_v19 = vadd.f32 %v8063_v17, %v9805_v14  ;;  %v2875_v20 = vpop.f32.mrb[131].mxu1 }
 0x5b8   : > { %v2876_v22 = vadd.f32 %v9805_v14, %v2875_v20 }
 0x5b9   : > { %v3128_v23 = vpack.c.bf16 %v2884_v19, %v2881_v18 }
 0x5ba   : > { %v3127_v25 = vpack.c.bf16 %v2876_v22, %v2873_v21 }
 0x5bc   : > { %v8066_v26 = vpop.f32.mrb[132].mxu1  ;;  %8140 = vmatprep.mubr.bf16.mxu0 %v3127_v25 }
 0x5bd   : > { %v2888_v27 = vpop.f32.mrb[133].mxu1  ;;  %8141 = vmatmul.mubr.bf16.vlgmr.msra.gmra.mrb[192].mxu0 %v3128_v23  ;;  %v2897_v31 = vadd.f32 %v8066_v26, %v9805_v14 }
 0x5be   : > { %v8067_v29 = vpop.f32.mrb[134].mxu1  ;;  %v2889_v34 = vadd.f32 %v9805_v14, %v2888_v27 }
 0x5bf   : > { %v2900_v32 = vadd.f32 %v8067_v29, %v9805_v14  ;;  %v2891_v50 = vpop.f32.mrb[135].mxu1 }
 0x5c0   : > { %v2892_v35 = vadd.f32 %v9805_v14, %v2891_v50 }
 0x5c1   : > { %v3130_v54 = vpack.c.bf16 %v2900_v32, %v2897_v31 }
 0x5c2   : > { %v3129_v37 = vpack.c.bf16 %v2892_v35, %v2889_v34 }
 0x5c4   : > { %v8070_v38 = vpop.f32.mrb[136].mxu1  ;;  %8144 = vmatprep.mubr.bf16.mxu0 %v3129_v37 }
 0x5c5   : > { %v2904_v39 = vpop.f32.mrb[137].mxu1  ;;  %8145 = vmatmul.mubr.bf16.gmra.mrb[196].mxu0 %v3130_v54  ;;  %v2913_v42 = vadd.f32 %v8070_v38, %v9805_v14 }
 0x5c6   : > { %v8071_v41 = vpop.f32.mrb[138].mxu1  ;;  %v2905_v45 = vadd.f32 %v9805_v14, %v2904_v39 }
 0x5c7   : > { %v2916_v43 = vadd.f32 %v8071_v41, %v9805_v14  ;;  %v2907_v44 = vpop.f32.mrb[139].mxu1 }
 0x5c8   : > { %v2908_v46 = vadd.f32 %v9805_v14, %v2907_v44 }
 0x5c9   : > { %v3132_v47 = vpack.c.bf16 %v2916_v43, %v2913_v42 }
 0x5ca   : > { %v3131_v48 = vpack.c.bf16 %v2908_v46, %v2905_v45 }
 0x5cc   : > { %v8074_v49 = vpop.f32.mrb[140].mxu1  ;;  %8148 = vmatprep.mubr.bf16.mxu0 %v3131_v48 }
 0x5cd   : > { %v2920_v51 = vpop.f32.mrb[141].mxu1  ;;  %8149 = vmatmul.mubr.bf16.gmra.mrb[200].mxu0 %v3132_v47  ;;  %v2929_v53 = vadd.f32 %v8074_v49, %v9805_v14 }
 0x5ce   : > { %v8075_v52 = vpop.f32.mrb[142].mxu1  ;;  %v2921_v10 = vadd.f32 %v9805_v14, %v2920_v51 }
 0x5cf   : > { %v2932_v55 = vadd.f32 %v8075_v52, %v9805_v14  ;;  %v2923_v56 = vpop.f32.mrb[143].mxu1 }
 0x5d0   : > { %v2924_v57 = vadd.f32 %v9805_v14, %v2923_v56 }
 0x5d1   : > { %v3134_v58 = vpack.c.bf16 %v2932_v55, %v2929_v53 }
 0x5d2   : > { %v3133_v59 = vpack.c.bf16 %v2924_v57, %v2921_v10 }
 0x5d4   : > { %v8078_v60 = vpop.f32.mrb[144].mxu1  ;;  %8152 = vmatprep.mubr.bf16.mxu0 %v3133_v59 }
 0x5d5   : > { %v2936_v61 = vpop.f32.mrb[145].mxu1  ;;  %8153 = vmatmul.mubr.bf16.gmra.mrb[204].mxu0 %v3134_v58  ;;  %v2945_v63 = vadd.f32 %v8078_v60, %v9805_v14 }
 0x5d6   : > { %v8079_v62 = vpop.f32.mrb[146].mxu1  ;;  %v2937_v2 = vadd.f32 %v9805_v14, %v2936_v61 }
 0x5d7   : > { %v2948_v0 = vadd.f32 %v8079_v62, %v9805_v14  ;;  %v2939_v1 = vpop.f32.mrb[147].mxu1 }
 0x5d8   : > { %v2940_v3 = vadd.f32 %v9805_v14, %v2939_v1 }
 0x5d9   : > { %v3136_v4 = vpack.c.bf16 %v2948_v0, %v2945_v63 }
 0x5da   : > { %v3135_v5 = vpack.c.bf16 %v2940_v3, %v2937_v2 }
 0x5dc   : > { %v8082_v6 = vpop.f32.mrb[148].mxu1  ;;  %8156 = vmatprep.mubr.bf16.mxu0 %v3135_v5 }
 0x5dd   : > { %v2952_v7 = vpop.f32.mrb[149].mxu1  ;;  %8157 = vmatmul.mubr.bf16.gmra.mrb[208].mxu0 %v3136_v4  ;;  %v2961_v9 = vadd.f32 %v8082_v6, %v9805_v14 }
 0x5de   : > { %v8083_v8 = vpop.f32.mrb[150].mxu1  ;;  %v2953_v30 = vadd.f32 %v9805_v14, %v2952_v7 }
 0x5df   : > { %v2964_v11 = vadd.f32 %v8083_v8, %v9805_v14  ;;  %v2955_v12 = vpop.f32.mrb[151].mxu1 }
 0x5e0   : > { %v2956_v13 = vadd.f32 %v9805_v14, %v2955_v12 }
 0x5e1   : > { %v3138_v15 = vpack.c.bf16 %v2964_v11, %v2961_v9 }
 0x5e2   : > { %v3137_v16 = vpack.c.bf16 %v2956_v13, %v2953_v30 }
 0x5e4   : > { %v8086_v33 = vpop.f32.mrb[152].mxu1  ;;  %8160 = vmatprep.mubr.bf16.mxu0 %v3137_v16 }
 0x5e5   : > { %v2968_v17 = vpop.f32.mrb[153].mxu1  ;;  %8161 = vmatmul.mubr.bf16.gmra.mrb[212].mxu0 %v3138_v15  ;;  %v2977_v19 = vadd.f32 %v8086_v33, %v9805_v14 }
 0x5e6   : > { %v8087_v18 = vpop.f32.mrb[154].mxu1  ;;  %v2969_v22 = vadd.f32 %v9805_v14, %v2968_v17 }
 0x5e7   : > { %v2980_v20 = vadd.f32 %v8087_v18, %v9805_v14  ;;  %v2971_v21 = vpop.f32.mrb[155].mxu1 }
 0x5e8   : > { %v2972_v23 = vadd.f32 %v9805_v14, %v2971_v21 }
 0x5e9   : > { %v3140_v24 = vpack.c.bf16 %v2980_v20, %v2977_v19 }
 0x5ea   : > { %v3139_v25 = vpack.c.bf16 %v2972_v23, %v2969_v22 }
 0x5ec   : > { %v8090_v26 = vpop.f32.mrb[156].mxu1  ;;  %8164 = vmatprep.mubr.bf16.mxu0 %v3139_v25 }
 0x5ed   : > { %v2984_v27 = vpop.f32.mrb[157].mxu1  ;;  %8165 = vmatmul.mubr.bf16.gmra.mrb[216].mxu0 %v3140_v24  ;;  %v2993_v29 = vadd.f32 %v8090_v26, %v9805_v14 }
 0x5ee   : > { %v8091_v28 = vpop.f32.mrb[158].mxu1  ;;  %v2985_v50 = vadd.f32 %v9805_v14, %v2984_v27 }
 0x5ef   : > { %v2996_v31 = vadd.f32 %v8091_v28, %v9805_v14  ;;  %v2987_v32 = vpop.f32.mrb[159].mxu1 }
 0x5f0   : > { %v2988_v34 = vadd.f32 %v9805_v14, %v2987_v32 }
 0x5f1   : > { %v3142_v35 = vpack.c.bf16 %v2996_v31, %v2993_v29 }
 0x5f2   : > { %v3141_v54 = vpack.c.bf16 %v2988_v34, %v2985_v50 }
 0x5f4   : > { %v8094_v36 = vpop.f32.mrb[160].mxu1  ;;  %8168 = vmatprep.mubr.bf16.mxu0 %v3141_v54 }
 0x5f5   : > { %v3000_v37 = vpop.f32.mrb[161].mxu1  ;;  %8169 = vmatmul.mubr.bf16.gmra.mrb[220].mxu0 %v3142_v35  ;;  %v3009_v39 = vadd.f32 %v8094_v36, %v9805_v14 }
 0x5f6   : > { %v8095_v38 = vpop.f32.mrb[162].mxu1  ;;  %v3001_v42 = vadd.f32 %v9805_v14, %v3000_v37 }
 0x5f7   : > { %v3012_v40 = vadd.f32 %v8095_v38, %v9805_v14  ;;  %v3003_v41 = vpop.f32.mrb[163].mxu1 }
 0x5f8   : > { %v3004_v43 = vadd.f32 %v9805_v14, %v3003_v41 }
 0x5f9   : > { %v3144_v44 = vpack.c.bf16 %v3012_v40, %v3009_v39 }
 0x5fa   : > { %v3143_v45 = vpack.c.bf16 %v3004_v43, %v3001_v42 }
 0x5fc   : > { %v8098_v46 = vpop.f32.mrb[164].mxu1  ;;  %8172 = vmatprep.mubr.bf16.mxu0 %v3143_v45 }
 0x5fd   : > { %v3016_v47 = vpop.f32.mrb[165].mxu1  ;;  %8173 = vmatmul.mubr.bf16.gmra.mrb[224].mxu0 %v3144_v44  ;;  %v3025_v49 = vadd.f32 %v8098_v46, %v9805_v14 }
 0x5fe   : > { %v8099_v48 = vpop.f32.mrb[166].mxu1  ;;  %v3017_v53 = vadd.f32 %v9805_v14, %v3016_v47 }
 0x5ff   : > { %v3028_v51 = vadd.f32 %v8099_v48, %v9805_v14  ;;  %v3019_v52 = vpop.f32.mrb[167].mxu1 }
 0x600   : > { %v3020_v55 = vadd.f32 %v9805_v14, %v3019_v52 }
 0x601   : > { %v3146_v56 = vpack.c.bf16 %v3028_v51, %v3025_v49 }
 0x602   : > { %v3145_v10 = vpack.c.bf16 %v3020_v55, %v3017_v53  ;;  %v8773_v55 = vld [vmem:[#allocation5 + $0x200] sm:$0xff]  }
 0x603   : > { %8284 = vmatprep.subr.bf16.mxu0 %v8773_v55 }
 0x604   : > { %v8102_v57 = vpop.f32.mrb[168].mxu1  ;;  %8176 = vmatprep.mubr.bf16.mxu0 %v3145_v10  ;;  %8285 = vmatpush3.bf16.msra.mxu0 %v8773_v55  ;;  %v9871_v10 = vld [vmem:[#allocation7 + $0x6] ss:$0 sm:$0xff] }
 0x605   : > { %v3032_v58 = vpop.f32.mrb[169].mxu1  ;;  %8177 = vmatmul.mubr.bf16.gmra.mrb[228].mxu0 %v3146_v56  ;;  %v3041_v60 = vadd.f32 %v8102_v57, %v9805_v14  ;;  %v8774_v56 = vld [vmem:[#allocation5 + $0x208] sm:$0xff]  }
 0x606   : > { %v8103_v59 = vpop.f32.mrb[170].mxu1  ;;  %v3033_v63 = vadd.f32 %v9805_v14, %v3032_v58  ;;  %8286 = vmatprep.subr.bf16.mxu0 %v8774_v56 }
 0x607   : > { %v3044_v61 = vadd.f32 %v8103_v59, %v9805_v14  ;;  %v3035_v62 = vpop.f32.mrb[171].mxu1 }
 0x608   : > { %v3036_v0 = vadd.f32 %v9805_v14, %v3035_v62  ;;  %8287 = vmatpush3.bf16.msra.mxu0 %v8774_v56 }
 0x609   : > { %v3148_v1 = vpack.c.bf16 %v3044_v61, %v3041_v60 }
 0x60a   : > { %v3147_v2 = vpack.c.bf16 %v3036_v0, %v3033_v63  ;;  %v8775_v63 = vld [vmem:[#allocation5 + $0x210] sm:$0xff]   ;;  %v8776_v0 = vld [vmem:[#allocation5 + $0x218] sm:$0xff]  }
 0x60b   : > { %8288 = vmatprep.subr.bf16.mxu0 %v8775_v63 }
 0x60c   : > { %v8106_v3 = vpop.f32.mrb[172].mxu1  ;;  %8180 = vmatprep.mubr.bf16.mxu0 %v3147_v2  ;;  %8289 = vmatpush3.bf16.msra.mxu0 %v8775_v63 }
 0x60d   : > { %v3048_v4 = vpop.f32.mrb[173].mxu1  ;;  %8181 = vmatmul.mubr.bf16.gmra.mrb[232].mxu0 %v3148_v1  ;;  %v3057_v6 = vadd.f32 %v8106_v3, %v9805_v14  ;;  %8290 = vmatprep.subr.bf16.mxu0 %v8776_v0 }
 0x60e   : > { %v8107_v5 = vpop.f32.mrb[174].mxu1  ;;  %v3049_v9 = vadd.f32 %v9805_v14, %v3048_v4 }
 0x60f   : > { %v3060_v7 = vadd.f32 %v8107_v5, %v9805_v14  ;;  %v3051_v8 = vpop.f32.mrb[175].mxu1 }
 0x610   : > { %v3052_v11 = vadd.f32 %v9805_v14, %v3051_v8  ;;  %8291 = vmatpush3.bf16.msra.mxu0 %v8776_v0 }
 0x611   : > { %v3150_v12 = vpack.c.bf16 %v3060_v7, %v3057_v6  ;;  %v8777_v7 = vld [vmem:[#allocation5 + $0x220] sm:$0xff]  }
 0x612   : > { %v3149_v30 = vpack.c.bf16 %v3052_v11, %v3049_v9  ;;  %8292 = vmatprep.subr.bf16.mxu0 %v8777_v7 }
 0x614   : > { %v8110_v13 = vpop.f32.mrb[176].mxu1  ;;  %8184 = vmatprep.mubr.bf16.mxu0 %v3149_v30  ;;  %8293 = vmatpush3.bf16.msra.mxu0 %v8777_v7 }
 0x615   : > { %v3064_v15 = vpop.f32.mrb[177].mxu1  ;;  %8185 = vmatmul.mubr.bf16.gmra.mrb[236].mxu0 %v3150_v12  ;;  %v3073_v33 = vadd.f32 %v8110_v13, %v9805_v14 }
 0x616   : > { %v8111_v16 = vpop.f32.mrb[178].mxu1  ;;  %v3065_v19 = vadd.f32 %v9805_v14, %v3064_v15 }
 0x617   : > { %v3076_v17 = vadd.f32 %v8111_v16, %v9805_v14  ;;  %v3067_v18 = vpop.f32.mrb[179].mxu1 }
 0x618   : > { %v3068_v20 = vadd.f32 %v9805_v14, %v3067_v18 }
 0x619   : > { %v3152_v21 = vpack.c.bf16 %v3076_v17, %v3073_v33  ;;  %v8778_v33 = vld [vmem:[#allocation5 + $0x228] sm:$0xff]  }
 0x61a   : > { %v3151_v22 = vpack.c.bf16 %v3068_v20, %v3065_v19  ;;  %8294 = vmatprep.subr.bf16.mxu0 %v8778_v33 }
 0x61b   : > { %8295 = vmatpush3.bf16.msra.mxu0 %v8778_v33 }
 0x61c   : > { %v8114_v23 = vpop.f32.mrb[180].mxu1  ;;  %8188 = vmatprep.mubr.bf16.mxu0 %v3151_v22 }
 0x61d   : > { %v3080_v24 = vpop.f32.mrb[181].mxu1  ;;  %8189 = vmatmul.mubr.bf16.gmra.mrb[240].mxu0 %v3152_v21  ;;  %v3089_v26 = vadd.f32 %v8114_v23, %v9805_v14  ;;  %v8779_v23 = vld [vmem:[#allocation5 + $0x230] sm:$0xff]  }
 0x61e   : > { %v8115_v25 = vpop.f32.mrb[182].mxu1  ;;  %v3081_v29 = vadd.f32 %v9805_v14, %v3080_v24  ;;  %8296 = vmatprep.subr.bf16.mxu0 %v8779_v23 }
 0x61f   : > { %v3092_v27 = vadd.f32 %v8115_v25, %v9805_v14  ;;  %v3083_v28 = vpop.f32.mrb[183].mxu1  ;;  %8297 = vmatpush3.bf16.msra.mxu0 %v8779_v23 }
 0x620   : > { %v3084_v31 = vadd.f32 %v9805_v14, %v3083_v28 }
 0x621   : > { %v3154_v32 = vpack.c.bf16 %v3092_v27, %v3089_v26 }
 0x622   : > { %v3153_v50 = vpack.c.bf16 %v3084_v31, %v3081_v29 }
 0x624   : > { %v8118_v34 = vpop.f32.mrb[184].mxu1  ;;  %8192 = vmatprep.mubr.bf16.mxu0 %v3153_v50  ;;  %v8780_v50 = vld [vmem:[#allocation5 + $0x238] sm:$0xff]  }
 0x625   : > { %v3096_v35 = vpop.f32.mrb[185].mxu1  ;;  %8193 = vmatmul.mubr.bf16.gmra.mrb[244].mxu0 %v3154_v32  ;;  %v3105_v36 = vadd.f32 %v8118_v34, %v9805_v14  ;;  %8298 = vmatprep.subr.bf16.mxu0 %v8780_v50 }
 0x626   : > { %v8119_v54 = vpop.f32.mrb[186].mxu1  ;;  %v3097_v39 = vadd.f32 %v9805_v14, %v3096_v35  ;;  %8299 = vmatpush3.bf16.msra.mxu0 %v8780_v50 }
 0x627   : > { %v3108_v37 = vadd.f32 %v8119_v54, %v9805_v14  ;;  %v3099_v38 = vpop.f32.mrb[187].mxu1 }
 0x628   : > { %v3100_v40 = vadd.f32 %v9805_v14, %v3099_v38 }
 0x629   : > { %v3156_v41 = vpack.c.bf16 %v3108_v37, %v3105_v36 }
 0x62a   : > { %v3155_v42 = vpack.c.bf16 %v3100_v40, %v3097_v39 }
 0x62c   : > { %v8122_v43 = vpop.f32.mrb[188].mxu1  ;;  %8196 = vmatprep.mubr.bf16.mxu0 %v3155_v42 }
 0x62d   : > { %v3112_v44 = vpop.f32.mrb[189].mxu1  ;;  %8197 = vmatmul.mubr.bf16.gmra.mrb[248].mxu0 %v3156_v41  ;;  %v3121_v46 = vadd.f32 %v8122_v43, %v9805_v14 }
 0x62e   : > { %v8123_v45 = vpop.f32.mrb[190].mxu1  ;;  %v3113_v49 = vadd.f32 %v9805_v14, %v3112_v44 }
 0x62f   : > { %v3124_v47 = vadd.f32 %v8123_v45, %v9805_v14  ;;  %v3115_v48 = vpop.f32.mrb[191].mxu1 }
 0x630   : > { %v3116_v51 = vadd.f32 %v9805_v14, %v3115_v48 }
 0x631   : > { %v3158_v52 = vpack.c.bf16 %v3124_v47, %v3121_v46 }
 0x632   : > { %v3157_v53 = vpack.c.bf16 %v3116_v51, %v3113_v49 }
 0x634   : > { %8200 = vmatprep.mubr.bf16.mxu0 %v3157_v53 }
 0x635   : > { %8201 = vmatmul.mubr.bf16.gmra.mrb[252].mxu0 %v3158_v52 }
 0x690   : > { %v8142_v57 = vpop.f32.mrb[192].mxu0 }
 0x691   : > { %v3275_v58 = vadd.f32 %v8142_v57, %v9871_v10  ;;  %v3266_v59 = vpop.f32.mrb[193].mxu0 }
 0x692   : > { %v3267_v60 = vadd.f32 %v9871_v10, %v3266_v59  ;;  %v8143_v61 = vpop.f32.mrb[194].mxu0 }
 0x693   : > { %v3278_v14 = vadd.f32 %v8143_v61, %v9871_v10  ;;  %v3269_v62 = vpop.f32.mrb[195].mxu0  ;;  %v3523_v2 = vmax.f32 %v3275_v58, 0.0 }
 0x694   : > { %v3270_v1 = vadd.f32 %v9871_v10, %v3269_v62  ;;  %v3521_v4 = vmax.f32 %v3267_v60, 0.0 }
 0x695   : > { %v3524_v3 = vmax.f32 %v3278_v14, 0.0 }
 0x696   : > { %v3522_v5 = vmax.f32 %v3270_v1, 0.0 }
 0x697   : > { %v3586_v6 = vpack.c.bf16 %v3524_v3, %v3523_v2 }
 0x698   : > { %v3585_v8 = vpack.c.bf16 %v3522_v5, %v3521_v4  ;;  %v8146_v9 = vpop.f32.mrb[196].mxu0 }
 0x699   : > { %v3291_v11 = vadd.f32 %v8146_v9, %v9871_v10  ;;  %v3282_v12 = vpop.f32.mrb[197].mxu0 }
 0x69a   : > { %v3283_v30 = vadd.f32 %v9871_v10, %v3282_v12  ;;  %v8147_v13 = vpop.f32.mrb[198].mxu0  ;;  %8220 = vmatprep.mubr.bf16.mxu1 %v3585_v8 }
 0x69b   : > { %v3294_v15 = vadd.f32 %v8147_v13, %v9871_v10  ;;  %v3285_v16 = vpop.f32.mrb[199].mxu0  ;;  %8221 = vmatmul.mubr.bf16.vlgmr.msra.gmra.mrb[192].mxu1 %v3586_v6  ;;  %v3527_v18 = vmax.f32 %v3291_v11, 0.0 }
 0x69c   : > { %v3286_v17 = vadd.f32 %v9871_v10, %v3285_v16  ;;  %v3525_v20 = vmax.f32 %v3283_v30, 0.0 }
 0x69d   : > { %v3528_v19 = vmax.f32 %v3294_v15, 0.0 }
 0x69e   : > { %v3526_v21 = vmax.f32 %v3286_v17, 0.0 }
 0x69f   : > { %v3588_v22 = vpack.c.bf16 %v3528_v19, %v3527_v18 }
 0x6a0   : > { %v3587_v24 = vpack.c.bf16 %v3526_v21, %v3525_v20  ;;  %v8150_v25 = vpop.f32.mrb[200].mxu0 }
 0x6a1   : > { %v3307_v26 = vadd.f32 %v8150_v25, %v9871_v10  ;;  %v3298_v27 = vpop.f32.mrb[201].mxu0 }
 0x6a2   : > { %v3299_v28 = vadd.f32 %v9871_v10, %v3298_v27  ;;  %v8151_v29 = vpop.f32.mrb[202].mxu0  ;;  %8224 = vmatprep.mubr.bf16.mxu1 %v3587_v24 }
 0x6a3   : > { %v3310_v31 = vadd.f32 %v8151_v29, %v9871_v10  ;;  %v3301_v32 = vpop.f32.mrb[203].mxu0  ;;  %8225 = vmatmul.mubr.bf16.gmra.mrb[196].mxu1 %v3588_v22  ;;  %v3531_v35 = vmax.f32 %v3307_v26, 0.0 }
 0x6a4   : > { %v3302_v34 = vadd.f32 %v9871_v10, %v3301_v32  ;;  %v3529_v36 = vmax.f32 %v3299_v28, 0.0 }
 0x6a5   : > { %v3532_v54 = vmax.f32 %v3310_v31, 0.0 }
 0x6a6   : > { %v3530_v37 = vmax.f32 %v3302_v34, 0.0 }
 0x6a7   : > { %v3590_v38 = vpack.c.bf16 %v3532_v54, %v3531_v35 }
 0x6a8   : > { %v3589_v39 = vpack.c.bf16 %v3530_v37, %v3529_v36  ;;  %v8154_v40 = vpop.f32.mrb[204].mxu0 }
 0x6a9   : > { %v3323_v41 = vadd.f32 %v8154_v40, %v9871_v10  ;;  %v3314_v42 = vpop.f32.mrb[205].mxu0 }
 0x6aa   : > { %v3315_v43 = vadd.f32 %v9871_v10, %v3314_v42  ;;  %v8155_v44 = vpop.f32.mrb[206].mxu0  ;;  %8228 = vmatprep.mubr.bf16.mxu1 %v3589_v39 }
 0x6ab   : > { %v3326_v45 = vadd.f32 %v8155_v44, %v9871_v10  ;;  %v3317_v46 = vpop.f32.mrb[207].mxu0  ;;  %8229 = vmatmul.mubr.bf16.gmra.mrb[200].mxu1 %v3590_v38  ;;  %v3535_v48 = vmax.f32 %v3323_v41, 0.0 }
 0x6ac   : > { %v3318_v47 = vadd.f32 %v9871_v10, %v3317_v46  ;;  %v3533_v51 = vmax.f32 %v3315_v43, 0.0 }
 0x6ad   : > { %v3536_v49 = vmax.f32 %v3326_v45, 0.0 }
 0x6ae   : > { %v3534_v52 = vmax.f32 %v3318_v47, 0.0 }
 0x6af   : > { %v3592_v53 = vpack.c.bf16 %v3536_v49, %v3535_v48 }
 0x6b0   : > { %v3591_v55 = vpack.c.bf16 %v3534_v52, %v3533_v51  ;;  %v8158_v56 = vpop.f32.mrb[208].mxu0 }
 0x6b1   : > { %v3339_v57 = vadd.f32 %v8158_v56, %v9871_v10  ;;  %v3330_v58 = vpop.f32.mrb[209].mxu0 }
 0x6b2   : > { %v3331_v59 = vadd.f32 %v9871_v10, %v3330_v58  ;;  %v8159_v60 = vpop.f32.mrb[210].mxu0  ;;  %8232 = vmatprep.mubr.bf16.mxu1 %v3591_v55 }
 0x6b3   : > { %v3342_v61 = vadd.f32 %v8159_v60, %v9871_v10  ;;  %v3333_v14 = vpop.f32.mrb[211].mxu0  ;;  %8233 = vmatmul.mubr.bf16.gmra.mrb[204].mxu1 %v3592_v53  ;;  %v3539_v63 = vmax.f32 %v3339_v57, 0.0 }
 0x6b4   : > { %v3334_v62 = vadd.f32 %v9871_v10, %v3333_v14  ;;  %v3537_v1 = vmax.f32 %v3331_v59, 0.0 }
 0x6b5   : > { %v3540_v0 = vmax.f32 %v3342_v61, 0.0 }
 0x6b6   : > { %v3538_v2 = vmax.f32 %v3334_v62, 0.0 }
 0x6b7   : > { %v3594_v3 = vpack.c.bf16 %v3540_v0, %v3539_v63 }
 0x6b8   : > { %v3593_v4 = vpack.c.bf16 %v3538_v2, %v3537_v1  ;;  %v8162_v5 = vpop.f32.mrb[212].mxu0 }
 0x6b9   : > { %v3355_v6 = vadd.f32 %v8162_v5, %v9871_v10  ;;  %v3346_v7 = vpop.f32.mrb[213].mxu0 }
 0x6ba   : > { %v3347_v8 = vadd.f32 %v9871_v10, %v3346_v7  ;;  %v8163_v9 = vpop.f32.mrb[214].mxu0  ;;  %8236 = vmatprep.mubr.bf16.mxu1 %v3593_v4 }
 0x6bb   : > { %v3358_v11 = vadd.f32 %v8163_v9, %v9871_v10  ;;  %v3349_v12 = vpop.f32.mrb[215].mxu0  ;;  %8237 = vmatmul.mubr.bf16.gmra.mrb[208].mxu1 %v3594_v3  ;;  %v3543_v13 = vmax.f32 %v3355_v6, 0.0 }
 0x6bc   : > { %v3350_v30 = vadd.f32 %v9871_v10, %v3349_v12  ;;  %v3541_v16 = vmax.f32 %v3347_v8, 0.0 }
 0x6bd   : > { %v3544_v15 = vmax.f32 %v3358_v11, 0.0 }
 0x6be   : > { %v3542_v33 = vmax.f32 %v3350_v30, 0.0 }
 0x6bf   : > { %v3596_v17 = vpack.c.bf16 %v3544_v15, %v3543_v13 }
 0x6c0   : > { %v3595_v18 = vpack.c.bf16 %v3542_v33, %v3541_v16  ;;  %v8166_v19 = vpop.f32.mrb[216].mxu0 }
 0x6c1   : > { %v3371_v20 = vadd.f32 %v8166_v19, %v9871_v10  ;;  %v3362_v21 = vpop.f32.mrb[217].mxu0 }
 0x6c2   : > { %v3363_v22 = vadd.f32 %v9871_v10, %v3362_v21  ;;  %v8167_v23 = vpop.f32.mrb[218].mxu0  ;;  %8240 = vmatprep.mubr.bf16.mxu1 %v3595_v18 }
 0x6c3   : > { %v3374_v24 = vadd.f32 %v8167_v23, %v9871_v10  ;;  %v3365_v25 = vpop.f32.mrb[219].mxu0  ;;  %8241 = vmatmul.mubr.bf16.gmra.mrb[212].mxu1 %v3596_v17  ;;  %v3547_v27 = vmax.f32 %v3371_v20, 0.0 }
 0x6c4   : > { %v3366_v26 = vadd.f32 %v9871_v10, %v3365_v25  ;;  %v3545_v29 = vmax.f32 %v3363_v22, 0.0 }
 0x6c5   : > { %v3548_v28 = vmax.f32 %v3374_v24, 0.0 }
 0x6c6   : > { %v3546_v31 = vmax.f32 %v3366_v26, 0.0 }
 0x6c7   : > { %v3598_v32 = vpack.c.bf16 %v3548_v28, %v3547_v27 }
 0x6c8   : > { %v3597_v50 = vpack.c.bf16 %v3546_v31, %v3545_v29  ;;  %v8170_v34 = vpop.f32.mrb[220].mxu0 }
 0x6c9   : > { %v3387_v35 = vadd.f32 %v8170_v34, %v9871_v10  ;;  %v3378_v54 = vpop.f32.mrb[221].mxu0 }
 0x6ca   : > { %v3379_v36 = vadd.f32 %v9871_v10, %v3378_v54  ;;  %v8171_v37 = vpop.f32.mrb[222].mxu0  ;;  %8244 = vmatprep.mubr.bf16.mxu1 %v3597_v50 }
 0x6cb   : > { %v3390_v38 = vadd.f32 %v8171_v37, %v9871_v10  ;;  %v3381_v39 = vpop.f32.mrb[223].mxu0  ;;  %8245 = vmatmul.mubr.bf16.gmra.mrb[216].mxu1 %v3598_v32  ;;  %v3551_v41 = vmax.f32 %v3387_v35, 0.0 }
 0x6cc   : > { %v3382_v40 = vadd.f32 %v9871_v10, %v3381_v39  ;;  %v3549_v43 = vmax.f32 %v3379_v36, 0.0 }
 0x6cd   : > { %v3552_v42 = vmax.f32 %v3390_v38, 0.0 }
 0x6ce   : > { %v3550_v44 = vmax.f32 %v3382_v40, 0.0 }
 0x6cf   : > { %v3600_v45 = vpack.c.bf16 %v3552_v42, %v3551_v41 }
 0x6d0   : > { %v3599_v46 = vpack.c.bf16 %v3550_v44, %v3549_v43  ;;  %v8174_v47 = vpop.f32.mrb[224].mxu0 }
 0x6d1   : > { %v3403_v48 = vadd.f32 %v8174_v47, %v9871_v10  ;;  %v3394_v49 = vpop.f32.mrb[225].mxu0 }
 0x6d2   : > { %v3395_v51 = vadd.f32 %v9871_v10, %v3394_v49  ;;  %v8175_v52 = vpop.f32.mrb[226].mxu0  ;;  %8248 = vmatprep.mubr.bf16.mxu1 %v3599_v46 }
 0x6d3   : > { %v3406_v53 = vadd.f32 %v8175_v52, %v9871_v10  ;;  %v3397_v55 = vpop.f32.mrb[227].mxu0  ;;  %8249 = vmatmul.mubr.bf16.gmra.mrb[220].mxu1 %v3600_v45  ;;  %v3555_v57 = vmax.f32 %v3403_v48, 0.0 }
 0x6d4   : > { %v3398_v56 = vadd.f32 %v9871_v10, %v3397_v55  ;;  %v3553_v59 = vmax.f32 %v3395_v51, 0.0 }
 0x6d5   : > { %v3556_v58 = vmax.f32 %v3406_v53, 0.0 }
 0x6d6   : > { %v3554_v60 = vmax.f32 %v3398_v56, 0.0 }
 0x6d7   : > { %v3602_v61 = vpack.c.bf16 %v3556_v58, %v3555_v57 }
 0x6d8   : > { %v3601_v14 = vpack.c.bf16 %v3554_v60, %v3553_v59  ;;  %v8178_v62 = vpop.f32.mrb[228].mxu0 }
 0x6d9   : > { %v3419_v63 = vadd.f32 %v8178_v62, %v9871_v10  ;;  %v3410_v0 = vpop.f32.mrb[229].mxu0 }
 0x6da   : > { %v3411_v1 = vadd.f32 %v9871_v10, %v3410_v0  ;;  %v8179_v2 = vpop.f32.mrb[230].mxu0  ;;  %8252 = vmatprep.mubr.bf16.mxu1 %v3601_v14 }
 0x6db   : > { %v3422_v3 = vadd.f32 %v8179_v2, %v9871_v10  ;;  %v3413_v4 = vpop.f32.mrb[231].mxu0  ;;  %8253 = vmatmul.mubr.bf16.gmra.mrb[224].mxu1 %v3602_v61  ;;  %v3559_v6 = vmax.f32 %v3419_v63, 0.0 }
 0x6dc   : > { %v3414_v5 = vadd.f32 %v9871_v10, %v3413_v4  ;;  %v3557_v8 = vmax.f32 %v3411_v1, 0.0 }
 0x6dd   : > { %v3560_v7 = vmax.f32 %v3422_v3, 0.0 }
 0x6de   : > { %v3558_v9 = vmax.f32 %v3414_v5, 0.0 }
 0x6df   : > { %v3604_v11 = vpack.c.bf16 %v3560_v7, %v3559_v6 }
 0x6e0   : > { %v3603_v12 = vpack.c.bf16 %v3558_v9, %v3557_v8  ;;  %v8182_v30 = vpop.f32.mrb[232].mxu0 }
 0x6e1   : > { %v3435_v13 = vadd.f32 %v8182_v30, %v9871_v10  ;;  %v3426_v15 = vpop.f32.mrb[233].mxu0 }
 0x6e2   : > { %v3427_v16 = vadd.f32 %v9871_v10, %v3426_v15  ;;  %v8183_v33 = vpop.f32.mrb[234].mxu0  ;;  %8256 = vmatprep.mubr.bf16.mxu1 %v3603_v12 }
 0x6e3   : > { %v3438_v17 = vadd.f32 %v8183_v33, %v9871_v10  ;;  %v3429_v18 = vpop.f32.mrb[235].mxu0  ;;  %8257 = vmatmul.mubr.bf16.gmra.mrb[228].mxu1 %v3604_v11  ;;  %v3563_v20 = vmax.f32 %v3435_v13, 0.0 }
 0x6e4   : > { %v3430_v19 = vadd.f32 %v9871_v10, %v3429_v18  ;;  %v3561_v22 = vmax.f32 %v3427_v16, 0.0 }
 0x6e5   : > { %v3564_v21 = vmax.f32 %v3438_v17, 0.0 }
 0x6e6   : > { %v3562_v23 = vmax.f32 %v3430_v19, 0.0 }
 0x6e7   : > { %v3606_v24 = vpack.c.bf16 %v3564_v21, %v3563_v20 }
 0x6e8   : > { %v3605_v25 = vpack.c.bf16 %v3562_v23, %v3561_v22  ;;  %v8186_v26 = vpop.f32.mrb[236].mxu0 }
 0x6e9   : > { %v3451_v27 = vadd.f32 %v8186_v26, %v9871_v10  ;;  %v3442_v28 = vpop.f32.mrb[237].mxu0 }
 0x6ea   : > { %v3443_v29 = vadd.f32 %v9871_v10, %v3442_v28  ;;  %v8187_v31 = vpop.f32.mrb[238].mxu0  ;;  %8260 = vmatprep.mubr.bf16.mxu1 %v3605_v25 }
 0x6eb   : > { %v3454_v32 = vadd.f32 %v8187_v31, %v9871_v10  ;;  %v3445_v50 = vpop.f32.mrb[239].mxu0  ;;  %8261 = vmatmul.mubr.bf16.gmra.mrb[232].mxu1 %v3606_v24  ;;  %v3567_v35 = vmax.f32 %v3451_v27, 0.0 }
 0x6ec   : > { %v3446_v34 = vadd.f32 %v9871_v10, %v3445_v50  ;;  %v3565_v36 = vmax.f32 %v3443_v29, 0.0 }
 0x6ed   : > { %v3568_v54 = vmax.f32 %v3454_v32, 0.0 }
 0x6ee   : > { %v3566_v37 = vmax.f32 %v3446_v34, 0.0  ;;  %v8781_v34 = vld [vmem:[#allocation5 + $0x240] sm:$0xff]  }
 0x6ef   : > { %v3608_v38 = vpack.c.bf16 %v3568_v54, %v3567_v35  ;;  %8364 = vmatprep.subr.bf16.mxu1 %v8781_v34  ;;  %v8782_v35 = vld [vmem:[#allocation5 + $0x248] sm:$0xff]   ;;  %v9937_v54 = vld [vmem:[#allocation7 + $0x7] ss:$0 sm:$0xff] }
 0x6f0   : > { %v3607_v39 = vpack.c.bf16 %v3566_v37, %v3565_v36  ;;  %v8190_v40 = vpop.f32.mrb[240].mxu0  ;;  %8365 = vmatpush3.bf16.msra.mxu1 %v8781_v34 }
 0x6f1   : > { %v3467_v41 = vadd.f32 %v8190_v40, %v9871_v10  ;;  %v3458_v42 = vpop.f32.mrb[241].mxu0  ;;  %8366 = vmatprep.subr.bf16.mxu1 %v8782_v35 }
 0x6f2   : > { %v3459_v43 = vadd.f32 %v9871_v10, %v3458_v42  ;;  %v8191_v44 = vpop.f32.mrb[242].mxu0  ;;  %8264 = vmatprep.mubr.bf16.mxu1 %v3607_v39  ;;  %v8783_v42 = vld [vmem:[#allocation5 + $0x250] sm:$0xff]  }
 0x6f3   : > { %v3470_v45 = vadd.f32 %v8191_v44, %v9871_v10  ;;  %v3461_v46 = vpop.f32.mrb[243].mxu0  ;;  %8265 = vmatmul.mubr.bf16.gmra.mrb[236].mxu1 %v3608_v38  ;;  %v3571_v48 = vmax.f32 %v3467_v41, 0.0 }
 0x6f4   : > { %v3462_v47 = vadd.f32 %v9871_v10, %v3461_v46  ;;  %v3569_v51 = vmax.f32 %v3459_v43, 0.0  ;;  %8367 = vmatpush3.bf16.msra.mxu1 %v8782_v35  ;;  %v8784_v43 = vld [vmem:[#allocation5 + $0x258] sm:$0xff]  }
 0x6f5   : > { %v3572_v49 = vmax.f32 %v3470_v45, 0.0  ;;  %8368 = vmatprep.subr.bf16.mxu1 %v8783_v42 }
 0x6f6   : > { %v3570_v52 = vmax.f32 %v3462_v47, 0.0 }
 0x6f7   : > { %v3610_v53 = vpack.c.bf16 %v3572_v49, %v3571_v48 }
 0x6f8   : > { %v3609_v55 = vpack.c.bf16 %v3570_v52, %v3569_v51  ;;  %v8194_v56 = vpop.f32.mrb[244].mxu0  ;;  %8369 = vmatpush3.bf16.msra.mxu1 %v8783_v42  ;;  %v8785_v51 = vld [vmem:[#allocation5 + $0x260] sm:$0xff]  }
 0x6f9   : > { %v3483_v57 = vadd.f32 %v8194_v56, %v9871_v10  ;;  %v3474_v58 = vpop.f32.mrb[245].mxu0  ;;  %8370 = vmatprep.subr.bf16.mxu1 %v8784_v43 }
 0x6fa   : > { %v3475_v59 = vadd.f32 %v9871_v10, %v3474_v58  ;;  %v8195_v60 = vpop.f32.mrb[246].mxu0  ;;  %8268 = vmatprep.mubr.bf16.mxu1 %v3609_v55 }
 0x6fb   : > { %v3486_v61 = vadd.f32 %v8195_v60, %v9871_v10  ;;  %v3477_v14 = vpop.f32.mrb[247].mxu0  ;;  %8269 = vmatmul.mubr.bf16.gmra.mrb[240].mxu1 %v3610_v53  ;;  %v3575_v63 = vmax.f32 %v3483_v57, 0.0 }
 0x6fc   : > { %v3478_v62 = vadd.f32 %v9871_v10, %v3477_v14  ;;  %v3573_v1 = vmax.f32 %v3475_v59, 0.0  ;;  %8371 = vmatpush3.bf16.msra.mxu1 %v8784_v43 }
 0x6fd   : > { %v3576_v0 = vmax.f32 %v3486_v61, 0.0  ;;  %8372 = vmatprep.subr.bf16.mxu1 %v8785_v51  ;;  %v8786_v61 = vld [vmem:[#allocation5 + $0x268] sm:$0xff]  }
 0x6fe   : > { %v3574_v2 = vmax.f32 %v3478_v62, 0.0 }
 0x6ff   : > { %v3612_v3 = vpack.c.bf16 %v3576_v0, %v3575_v63 }
 0x700   : > { %v3611_v4 = vpack.c.bf16 %v3574_v2, %v3573_v1  ;;  %v8198_v5 = vpop.f32.mrb[248].mxu0  ;;  %8373 = vmatpush3.bf16.msra.mxu1 %v8785_v51 }
 0x701   : > { %v3499_v6 = vadd.f32 %v8198_v5, %v9871_v10  ;;  %v3490_v7 = vpop.f32.mrb[249].mxu0  ;;  %8374 = vmatprep.subr.bf16.mxu1 %v8786_v61 }
 0x702   : > { %v3491_v8 = vadd.f32 %v9871_v10, %v3490_v7  ;;  %v8199_v9 = vpop.f32.mrb[250].mxu0  ;;  %8272 = vmatprep.mubr.bf16.mxu1 %v3611_v4 }
 0x703   : > { %v3502_v11 = vadd.f32 %v8199_v9, %v9871_v10  ;;  %v3493_v12 = vpop.f32.mrb[251].mxu0  ;;  %8273 = vmatmul.mubr.bf16.gmra.mrb[244].mxu1 %v3612_v3  ;;  %v3579_v13 = vmax.f32 %v3499_v6, 0.0  ;;  %v8787_v3 = vld [vmem:[#allocation5 + $0x270] sm:$0xff]  }
 0x704   : > { %v3494_v30 = vadd.f32 %v9871_v10, %v3493_v12  ;;  %v3577_v16 = vmax.f32 %v3491_v8, 0.0  ;;  %8375 = vmatpush3.bf16.msra.mxu1 %v8786_v61 }
 0x705   : > { %v3580_v15 = vmax.f32 %v3502_v11, 0.0  ;;  %8376 = vmatprep.subr.bf16.mxu1 %v8787_v3 }
 0x706   : > { %v3578_v33 = vmax.f32 %v3494_v30, 0.0  ;;  %v8788_v30 = vld [vmem:[#allocation5 + $0x278] sm:$0xff]  }
 0x707   : > { %v3614_v17 = vpack.c.bf16 %v3580_v15, %v3579_v13 }
 0x708   : > { %v3613_v18 = vpack.c.bf16 %v3578_v33, %v3577_v16  ;;  %v8202_v19 = vpop.f32.mrb[252].mxu0  ;;  %8377 = vmatpush3.bf16.msra.mxu1 %v8787_v3 }
 0x709   : > { %v3515_v20 = vadd.f32 %v8202_v19, %v9871_v10  ;;  %v3506_v21 = vpop.f32.mrb[253].mxu0  ;;  %8378 = vmatprep.subr.bf16.mxu1 %v8788_v30 }
 0x70a   : > { %v3507_v22 = vadd.f32 %v9871_v10, %v3506_v21  ;;  %v8203_v23 = vpop.f32.mrb[254].mxu0  ;;  %8276 = vmatprep.mubr.bf16.mxu1 %v3613_v18 }
 0x70b   : > { %v3518_v24 = vadd.f32 %v8203_v23, %v9871_v10  ;;  %v3509_v25 = vpop.f32.mrb[255].mxu0  ;;  %8277 = vmatmul.mubr.bf16.gmra.mrb[248].mxu1 %v3614_v17  ;;  %v3583_v27 = vmax.f32 %v3515_v20, 0.0 }
 0x70c   : > { %v3510_v26 = vadd.f32 %v9871_v10, %v3509_v25  ;;  %v3581_v29 = vmax.f32 %v3507_v22, 0.0  ;;  %8379 = vmatpush3.bf16.msra.mxu1 %v8788_v30 }
 0x70d   : > { %v3584_v28 = vmax.f32 %v3518_v24, 0.0 }
 0x70e   : > { %v3582_v31 = vmax.f32 %v3510_v26, 0.0 }
 0x70f   : > { %v3616_v32 = vpack.c.bf16 %v3584_v28, %v3583_v27 }
 0x710   : > { %v3615_v50 = vpack.c.bf16 %v3582_v31, %v3581_v29 }
 0x712   : > { %8280 = vmatprep.mubr.bf16.mxu1 %v3615_v50 }
 0x713   : > { %8281 = vmatmul.mubr.bf16.gmra.mrb[252].mxu1 %v3616_v32 }
 0x76e   : > { %v8222_v36 = vpop.f32.mrb[192].mxu1 }
 0x76f   : > { %v3733_v37 = vadd.f32 %v8222_v36, %v9937_v54  ;;  %v3724_v10 = vpop.f32.mrb[193].mxu1 }
 0x770   : > { %v3725_v38 = vadd.f32 %v9937_v54, %v3724_v10  ;;  %v8223_v39 = vpop.f32.mrb[194].mxu1 }
 0x771   : > { %v3736_v40 = vadd.f32 %v8223_v39, %v9937_v54  ;;  %v3727_v41 = vpop.f32.mrb[195].mxu1  ;;  %v3981_v45 = vmax.f32 %v3733_v37, 0.0 }
 0x772   : > { %v3728_v44 = vadd.f32 %v9937_v54, %v3727_v41  ;;  %v3979_v47 = vmax.f32 %v3725_v38, 0.0 }
 0x773   : > { %v3982_v46 = vmax.f32 %v3736_v40, 0.0 }
 0x774   : > { %v3980_v48 = vmax.f32 %v3728_v44, 0.0 }
 0x775   : > { %v4044_v49 = vpack.c.bf16 %v3982_v46, %v3981_v45 }
 0x776   : > { %v4043_v52 = vpack.c.bf16 %v3980_v48, %v3979_v47  ;;  %v8226_v53 = vpop.f32.mrb[196].mxu1 }
 0x777   : > { %v3749_v55 = vadd.f32 %v8226_v53, %v9937_v54  ;;  %v3740_v56 = vpop.f32.mrb[197].mxu1 }
 0x778   : > { %v3741_v57 = vadd.f32 %v9937_v54, %v3740_v56  ;;  %v8227_v58 = vpop.f32.mrb[198].mxu1  ;;  %8300 = vmatprep.mubr.bf16.mxu0 %v4043_v52 }
 0x779   : > { %v3752_v59 = vadd.f32 %v8227_v58, %v9937_v54  ;;  %v3743_v60 = vpop.f32.mrb[199].mxu1  ;;  %8301 = vmatmul.mubr.bf16.vlgmr.msra.gmra.mrb[0].mxu0 %v4044_v49  ;;  %v3985_v62 = vmax.f32 %v3749_v55, 0.0 }
 0x77a   : > { %v3744_v14 = vadd.f32 %v9937_v54, %v3743_v60  ;;  %v3983_v0 = vmax.f32 %v3741_v57, 0.0 }
 0x77b   : > { %v3986_v63 = vmax.f32 %v3752_v59, 0.0 }
 0x77c   : > { %v3984_v1 = vmax.f32 %v3744_v14, 0.0 }
 0x77d   : > { %v4046_v2 = vpack.c.bf16 %v3986_v63, %v3985_v62 }
 0x77e   : > { %v4045_v4 = vpack.c.bf16 %v3984_v1, %v3983_v0  ;;  %v8230_v5 = vpop.f32.mrb[200].mxu1 }
 0x77f   : > { %v3765_v6 = vadd.f32 %v8230_v5, %v9937_v54  ;;  %v3756_v7 = vpop.f32.mrb[201].mxu1 }
 0x780   : > { %v3757_v8 = vadd.f32 %v9937_v54, %v3756_v7  ;;  %v8231_v9 = vpop.f32.mrb[202].mxu1  ;;  %8304 = vmatprep.mubr.bf16.mxu0 %v4045_v4 }
 0x781   : > { %v3768_v11 = vadd.f32 %v8231_v9, %v9937_v54  ;;  %v3759_v12 = vpop.f32.mrb[203].mxu1  ;;  %8305 = vmatmul.mubr.bf16.gmra.mrb[4].mxu0 %v4046_v2  ;;  %v3989_v15 = vmax.f32 %v3765_v6, 0.0 }
 0x782   : > { %v3760_v13 = vadd.f32 %v9937_v54, %v3759_v12  ;;  %v3987_v33 = vmax.f32 %v3757_v8, 0.0 }
 0x783   : > { %v3990_v16 = vmax.f32 %v3768_v11, 0.0 }
 0x784   : > { %v3988_v17 = vmax.f32 %v3760_v13, 0.0 }
 0x785   : > { %v4048_v18 = vpack.c.bf16 %v3990_v16, %v3989_v15 }
 0x786   : > { %v4047_v19 = vpack.c.bf16 %v3988_v17, %v3987_v33  ;;  %v8234_v20 = vpop.f32.mrb[204].mxu1 }
 0x787   : > { %v3781_v21 = vadd.f32 %v8234_v20, %v9937_v54  ;;  %v3772_v22 = vpop.f32.mrb[205].mxu1 }
 0x788   : > { %v3773_v23 = vadd.f32 %v9937_v54, %v3772_v22  ;;  %v8235_v24 = vpop.f32.mrb[206].mxu1  ;;  %8308 = vmatprep.mubr.bf16.mxu0 %v4047_v19 }
 0x789   : > { %v3784_v25 = vadd.f32 %v8235_v24, %v9937_v54  ;;  %v3775_v26 = vpop.f32.mrb[207].mxu1  ;;  %8309 = vmatmul.mubr.bf16.gmra.mrb[8].mxu0 %v4048_v18  ;;  %v3993_v28 = vmax.f32 %v3781_v21, 0.0 }
 0x78a   : > { %v3776_v27 = vadd.f32 %v9937_v54, %v3775_v26  ;;  %v3991_v31 = vmax.f32 %v3773_v23, 0.0 }
 0x78b   : > { %v3994_v29 = vmax.f32 %v3784_v25, 0.0 }
 0x78c   : > { %v3992_v32 = vmax.f32 %v3776_v27, 0.0 }
 0x78d   : > { %v4050_v50 = vpack.c.bf16 %v3994_v29, %v3993_v28 }
 0x78e   : > { %v4049_v34 = vpack.c.bf16 %v3992_v32, %v3991_v31  ;;  %v8238_v35 = vpop.f32.mrb[208].mxu1 }
 0x78f   : > { %v3797_v36 = vadd.f32 %v8238_v35, %v9937_v54  ;;  %v3788_v37 = vpop.f32.mrb[209].mxu1 }
 0x790   : > { %v3789_v10 = vadd.f32 %v9937_v54, %v3788_v37  ;;  %v8239_v38 = vpop.f32.mrb[210].mxu1  ;;  %8312 = vmatprep.mubr.bf16.mxu0 %v4049_v34 }
 0x791   : > { %v3800_v39 = vadd.f32 %v8239_v38, %v9937_v54  ;;  %v3791_v40 = vpop.f32.mrb[211].mxu1  ;;  %8313 = vmatmul.mubr.bf16.gmra.mrb[12].mxu0 %v4050_v50  ;;  %v3997_v42 = vmax.f32 %v3797_v36, 0.0 }
 0x792   : > { %v3792_v41 = vadd.f32 %v9937_v54, %v3791_v40  ;;  %v3995_v44 = vmax.f32 %v3789_v10, 0.0 }
 0x793   : > { %v3998_v43 = vmax.f32 %v3800_v39, 0.0 }
 0x794   : > { %v3996_v45 = vmax.f32 %v3792_v41, 0.0 }
 0x795   : > { %v4052_v46 = vpack.c.bf16 %v3998_v43, %v3997_v42 }
 0x796   : > { %v4051_v47 = vpack.c.bf16 %v3996_v45, %v3995_v44  ;;  %v8242_v48 = vpop.f32.mrb[212].mxu1 }
 0x797   : > { %v3813_v49 = vadd.f32 %v8242_v48, %v9937_v54  ;;  %v3804_v51 = vpop.f32.mrb[213].mxu1 }
 0x798   : > { %v3805_v52 = vadd.f32 %v9937_v54, %v3804_v51  ;;  %v8243_v53 = vpop.f32.mrb[214].mxu1  ;;  %8316 = vmatprep.mubr.bf16.mxu0 %v4051_v47 }
 0x799   : > { %v3816_v55 = vadd.f32 %v8243_v53, %v9937_v54  ;;  %v3807_v56 = vpop.f32.mrb[215].mxu1  ;;  %8317 = vmatmul.mubr.bf16.gmra.mrb[16].mxu0 %v4052_v46  ;;  %v4001_v58 = vmax.f32 %v3813_v49, 0.0 }
 0x79a   : > { %v3808_v57 = vadd.f32 %v9937_v54, %v3807_v56  ;;  %v3999_v60 = vmax.f32 %v3805_v52, 0.0 }
 0x79b   : > { %v4002_v59 = vmax.f32 %v3816_v55, 0.0 }
 0x79c   : > { %v4000_v61 = vmax.f32 %v3808_v57, 0.0 }
 0x79d   : > { %v4054_v14 = vpack.c.bf16 %v4002_v59, %v4001_v58 }
 0x79e   : > { %v4053_v62 = vpack.c.bf16 %v4000_v61, %v3999_v60  ;;  %v8246_v63 = vpop.f32.mrb[216].mxu1 }
 0x79f   : > { %v3829_v0 = vadd.f32 %v8246_v63, %v9937_v54  ;;  %v3820_v1 = vpop.f32.mrb[217].mxu1 }
 0x7a0   : > { %v3821_v2 = vadd.f32 %v9937_v54, %v3820_v1  ;;  %v8247_v3 = vpop.f32.mrb[218].mxu1  ;;  %8320 = vmatprep.mubr.bf16.mxu0 %v4053_v62 }
 0x7a1   : > { %v3832_v4 = vadd.f32 %v8247_v3, %v9937_v54  ;;  %v3823_v5 = vpop.f32.mrb[219].mxu1  ;;  %8321 = vmatmul.mubr.bf16.gmra.mrb[20].mxu0 %v4054_v14  ;;  %v4005_v7 = vmax.f32 %v3829_v0, 0.0 }
 0x7a2   : > { %v3824_v6 = vadd.f32 %v9937_v54, %v3823_v5  ;;  %v4003_v9 = vmax.f32 %v3821_v2, 0.0 }
 0x7a3   : > { %v4006_v8 = vmax.f32 %v3832_v4, 0.0 }
 0x7a4   : > { %v4004_v11 = vmax.f32 %v3824_v6, 0.0 }
 0x7a5   : > { %v4056_v12 = vpack.c.bf16 %v4006_v8, %v4005_v7 }
 0x7a6   : > { %v4055_v30 = vpack.c.bf16 %v4004_v11, %v4003_v9  ;;  %v8250_v13 = vpop.f32.mrb[220].mxu1 }
 0x7a7   : > { %v3845_v15 = vadd.f32 %v8250_v13, %v9937_v54  ;;  %v3836_v16 = vpop.f32.mrb[221].mxu1 }
 0x7a8   : > { %v3837_v33 = vadd.f32 %v9937_v54, %v3836_v16  ;;  %v8251_v17 = vpop.f32.mrb[222].mxu1  ;;  %8324 = vmatprep.mubr.bf16.mxu0 %v4055_v30 }
 0x7a9   : > { %v3848_v18 = vadd.f32 %v8251_v17, %v9937_v54  ;;  %v3839_v19 = vpop.f32.mrb[223].mxu1  ;;  %8325 = vmatmul.mubr.bf16.gmra.mrb[24].mxu0 %v4056_v12  ;;  %v4009_v21 = vmax.f32 %v3845_v15, 0.0 }
 0x7aa   : > { %v3840_v20 = vadd.f32 %v9937_v54, %v3839_v19  ;;  %v4007_v23 = vmax.f32 %v3837_v33, 0.0 }
 0x7ab   : > { %v4010_v22 = vmax.f32 %v3848_v18, 0.0 }
 0x7ac   : > { %v4008_v24 = vmax.f32 %v3840_v20, 0.0 }
 0x7ad   : > { %v4058_v25 = vpack.c.bf16 %v4010_v22, %v4009_v21 }
 0x7ae   : > { %v4057_v26 = vpack.c.bf16 %v4008_v24, %v4007_v23  ;;  %v8254_v27 = vpop.f32.mrb[224].mxu1 }
 0x7af   : > { %v3861_v28 = vadd.f32 %v8254_v27, %v9937_v54  ;;  %v3852_v29 = vpop.f32.mrb[225].mxu1 }
 0x7b0   : > { %v3853_v31 = vadd.f32 %v9937_v54, %v3852_v29  ;;  %v8255_v32 = vpop.f32.mrb[226].mxu1  ;;  %8328 = vmatprep.mubr.bf16.mxu0 %v4057_v26 }
 0x7b1   : > { %v3864_v50 = vadd.f32 %v8255_v32, %v9937_v54  ;;  %v3855_v34 = vpop.f32.mrb[227].mxu1  ;;  %8329 = vmatmul.mubr.bf16.gmra.mrb[28].mxu0 %v4058_v25  ;;  %v4013_v36 = vmax.f32 %v3861_v28, 0.0 }
 0x7b2   : > { %v3856_v35 = vadd.f32 %v9937_v54, %v3855_v34  ;;  %v4011_v10 = vmax.f32 %v3853_v31, 0.0 }
 0x7b3   : > { %v4014_v37 = vmax.f32 %v3864_v50, 0.0 }
 0x7b4   : > { %v4012_v38 = vmax.f32 %v3856_v35, 0.0 }
 0x7b5   : > { %v4060_v39 = vpack.c.bf16 %v4014_v37, %v4013_v36 }
 0x7b6   : > { %v4059_v40 = vpack.c.bf16 %v4012_v38, %v4011_v10  ;;  %v8258_v41 = vpop.f32.mrb[228].mxu1 }
 0x7b7   : > { %v3877_v42 = vadd.f32 %v8258_v41, %v9937_v54  ;;  %v3868_v43 = vpop.f32.mrb[229].mxu1 }
 0x7b8   : > { %v3869_v44 = vadd.f32 %v9937_v54, %v3868_v43  ;;  %v8259_v45 = vpop.f32.mrb[230].mxu1  ;;  %8332 = vmatprep.mubr.bf16.mxu0 %v4059_v40 }
 0x7b9   : > { %v3880_v46 = vadd.f32 %v8259_v45, %v9937_v54  ;;  %v3871_v47 = vpop.f32.mrb[231].mxu1  ;;  %8333 = vmatmul.mubr.bf16.gmra.mrb[32].mxu0 %v4060_v39  ;;  %v4017_v49 = vmax.f32 %v3877_v42, 0.0 }
 0x7ba   : > { %v3872_v48 = vadd.f32 %v9937_v54, %v3871_v47  ;;  %v4015_v52 = vmax.f32 %v3869_v44, 0.0 }
 0x7bb   : > { %v4018_v51 = vmax.f32 %v3880_v46, 0.0 }
 0x7bc   : > { %v4016_v53 = vmax.f32 %v3872_v48, 0.0 }
 0x7bd   : > { %v4062_v55 = vpack.c.bf16 %v4018_v51, %v4017_v49 }
 0x7be   : > { %v4061_v56 = vpack.c.bf16 %v4016_v53, %v4015_v52  ;;  %v8262_v57 = vpop.f32.mrb[232].mxu1 }
 0x7bf   : > { %v3893_v58 = vadd.f32 %v8262_v57, %v9937_v54  ;;  %v3884_v59 = vpop.f32.mrb[233].mxu1 }
 0x7c0   : > { %v3885_v60 = vadd.f32 %v9937_v54, %v3884_v59  ;;  %v8263_v61 = vpop.f32.mrb[234].mxu1  ;;  %8336 = vmatprep.mubr.bf16.mxu0 %v4061_v56 }
 0x7c1   : > { %v3896_v14 = vadd.f32 %v8263_v61, %v9937_v54  ;;  %v3887_v62 = vpop.f32.mrb[235].mxu1  ;;  %8337 = vmatmul.mubr.bf16.gmra.mrb[36].mxu0 %v4062_v55  ;;  %v4021_v0 = vmax.f32 %v3893_v58, 0.0 }
 0x7c2   : > { %v3888_v63 = vadd.f32 %v9937_v54, %v3887_v62  ;;  %v4019_v2 = vmax.f32 %v3885_v60, 0.0 }
 0x7c3   : > { %v4022_v1 = vmax.f32 %v3896_v14, 0.0 }
 0x7c4   : > { %v4020_v3 = vmax.f32 %v3888_v63, 0.0 }
 0x7c5   : > { %v4064_v4 = vpack.c.bf16 %v4022_v1, %v4021_v0 }
 0x7c6   : > { %v4063_v5 = vpack.c.bf16 %v4020_v3, %v4019_v2  ;;  %v8266_v6 = vpop.f32.mrb[236].mxu1 }
 0x7c7   : > { %v3909_v7 = vadd.f32 %v8266_v6, %v9937_v54  ;;  %v3900_v8 = vpop.f32.mrb[237].mxu1 }
 0x7c8   : > { %v3901_v9 = vadd.f32 %v9937_v54, %v3900_v8  ;;  %v8267_v11 = vpop.f32.mrb[238].mxu1  ;;  %8340 = vmatprep.mubr.bf16.mxu0 %v4063_v5 }
 0x7c9   : > { %v3912_v12 = vadd.f32 %v8267_v11, %v9937_v54  ;;  %v3903_v30 = vpop.f32.mrb[239].mxu1  ;;  %8341 = vmatmul.mubr.bf16.gmra.mrb[40].mxu0 %v4064_v4  ;;  %v4025_v15 = vmax.f32 %v3909_v7, 0.0 }
 0x7ca   : > { %v3904_v13 = vadd.f32 %v9937_v54, %v3903_v30  ;;  %v4023_v33 = vmax.f32 %v3901_v9, 0.0 }
 0x7cb   : > { %v4026_v16 = vmax.f32 %v3912_v12, 0.0 }
 0x7cc   : > { %v4024_v17 = vmax.f32 %v3904_v13, 0.0  ;;  %v8789_v13 = vld [vmem:[#allocation5 + $0x280] sm:$0xff]  }
 0x7cd   : > { %v4066_v18 = vpack.c.bf16 %v4026_v16, %v4025_v15  ;;  %8444 = vmatprep.subr.bf16.mxu0 %v8789_v13  ;;  %v8790_v15 = vld [vmem:[#allocation5 + $0x288] sm:$0xff]  }
 0x7ce   : > { %v4065_v19 = vpack.c.bf16 %v4024_v17, %v4023_v33  ;;  %v8270_v20 = vpop.f32.mrb[240].mxu1  ;;  %8445 = vmatpush3.bf16.msra.mxu0 %v8789_v13  ;;  %v10003_v16 = vld [vmem:[#allocation7 + $0x8] ss:$0 sm:$0xff] }
 0x7cf   : > { %v3925_v21 = vadd.f32 %v8270_v20, %v9937_v54  ;;  %v3916_v22 = vpop.f32.mrb[241].mxu1  ;;  %8446 = vmatprep.subr.bf16.mxu0 %v8790_v15 }
 0x7d0   : > { %v3917_v23 = vadd.f32 %v9937_v54, %v3916_v22  ;;  %v8271_v24 = vpop.f32.mrb[242].mxu1  ;;  %8344 = vmatprep.mubr.bf16.mxu0 %v4065_v19  ;;  %v8791_v22 = vld [vmem:[#allocation5 + $0x290] sm:$0xff]  }
 0x7d1   : > { %v3928_v25 = vadd.f32 %v8271_v24, %v9937_v54  ;;  %v3919_v26 = vpop.f32.mrb[243].mxu1  ;;  %8345 = vmatmul.mubr.bf16.gmra.mrb[44].mxu0 %v4066_v18  ;;  %v4029_v28 = vmax.f32 %v3925_v21, 0.0 }
 0x7d2   : > { %v3920_v27 = vadd.f32 %v9937_v54, %v3919_v26  ;;  %v4027_v31 = vmax.f32 %v3917_v23, 0.0  ;;  %8447 = vmatpush3.bf16.msra.mxu0 %v8790_v15  ;;  %v8792_v23 = vld [vmem:[#allocation5 + $0x298] sm:$0xff]  }
 0x7d3   : > { %v4030_v29 = vmax.f32 %v3928_v25, 0.0  ;;  %8448 = vmatprep.subr.bf16.mxu0 %v8791_v22 }
 0x7d4   : > { %v4028_v32 = vmax.f32 %v3920_v27, 0.0 }
 0x7d5   : > { %v4068_v50 = vpack.c.bf16 %v4030_v29, %v4029_v28 }
 0x7d6   : > { %v4067_v34 = vpack.c.bf16 %v4028_v32, %v4027_v31  ;;  %v8274_v35 = vpop.f32.mrb[244].mxu1  ;;  %8449 = vmatpush3.bf16.msra.mxu0 %v8791_v22  ;;  %v8793_v31 = vld [vmem:[#allocation5 + $0x2a0] sm:$0xff]  }
 0x7d7   : > { %v3941_v36 = vadd.f32 %v8274_v35, %v9937_v54  ;;  %v3932_v37 = vpop.f32.mrb[245].mxu1  ;;  %8450 = vmatprep.subr.bf16.mxu0 %v8792_v23 }
 0x7d8   : > { %v3933_v10 = vadd.f32 %v9937_v54, %v3932_v37  ;;  %v8275_v38 = vpop.f32.mrb[246].mxu1  ;;  %8348 = vmatprep.mubr.bf16.mxu0 %v4067_v34 }
 0x7d9   : > { %v3944_v39 = vadd.f32 %v8275_v38, %v9937_v54  ;;  %v3935_v40 = vpop.f32.mrb[247].mxu1  ;;  %8349 = vmatmul.mubr.bf16.gmra.mrb[48].mxu0 %v4068_v50  ;;  %v4033_v42 = vmax.f32 %v3941_v36, 0.0 }
 0x7da   : > { %v3936_v41 = vadd.f32 %v9937_v54, %v3935_v40  ;;  %v4031_v44 = vmax.f32 %v3933_v10, 0.0  ;;  %8451 = vmatpush3.bf16.msra.mxu0 %v8792_v23 }
 0x7db   : > { %v4034_v43 = vmax.f32 %v3944_v39, 0.0  ;;  %8452 = vmatprep.subr.bf16.mxu0 %v8793_v31  ;;  %v8794_v39 = vld [vmem:[#allocation5 + $0x2a8] sm:$0xff]  }
 0x7dc   : > { %v4032_v45 = vmax.f32 %v3936_v41, 0.0 }
 0x7dd   : > { %v4070_v46 = vpack.c.bf16 %v4034_v43, %v4033_v42 }
 0x7de   : > { %v4069_v47 = vpack.c.bf16 %v4032_v45, %v4031_v44  ;;  %v8278_v48 = vpop.f32.mrb[248].mxu1  ;;  %8453 = vmatpush3.bf16.msra.mxu0 %v8793_v31 }
 0x7df   : > { %v3957_v49 = vadd.f32 %v8278_v48, %v9937_v54  ;;  %v3948_v51 = vpop.f32.mrb[249].mxu1  ;;  %8454 = vmatprep.subr.bf16.mxu0 %v8794_v39 }
 0x7e0   : > { %v3949_v52 = vadd.f32 %v9937_v54, %v3948_v51  ;;  %v8279_v53 = vpop.f32.mrb[250].mxu1  ;;  %8352 = vmatprep.mubr.bf16.mxu0 %v4069_v47 }
 0x7e1   : > { %v3960_v55 = vadd.f32 %v8279_v53, %v9937_v54  ;;  %v3951_v56 = vpop.f32.mrb[251].mxu1  ;;  %8353 = vmatmul.mubr.bf16.gmra.mrb[52].mxu0 %v4070_v46  ;;  %v4037_v58 = vmax.f32 %v3957_v49, 0.0  ;;  %v8795_v46 = vld [vmem:[#allocation5 + $0x2b0] sm:$0xff]  }
 0x7e2   : > { %v3952_v57 = vadd.f32 %v9937_v54, %v3951_v56  ;;  %v4035_v60 = vmax.f32 %v3949_v52, 0.0  ;;  %8455 = vmatpush3.bf16.msra.mxu0 %v8794_v39 }
 0x7e3   : > { %v4038_v59 = vmax.f32 %v3960_v55, 0.0  ;;  %8456 = vmatprep.subr.bf16.mxu0 %v8795_v46 }
 0x7e4   : > { %v4036_v61 = vmax.f32 %v3952_v57, 0.0  ;;  %v8796_v57 = vld [vmem:[#allocation5 + $0x2b8] sm:$0xff]  }
 0x7e5   : > { %v4072_v14 = vpack.c.bf16 %v4038_v59, %v4037_v58 }
 0x7e6   : > { %v4071_v62 = vpack.c.bf16 %v4036_v61, %v4035_v60  ;;  %v8282_v63 = vpop.f32.mrb[252].mxu1  ;;  %8457 = vmatpush3.bf16.msra.mxu0 %v8795_v46 }
 0x7e7   : > { %v3973_v0 = vadd.f32 %v8282_v63, %v9937_v54  ;;  %v3964_v1 = vpop.f32.mrb[253].mxu1  ;;  %8458 = vmatprep.subr.bf16.mxu0 %v8796_v57 }
 0x7e8   : > { %v3965_v2 = vadd.f32 %v9937_v54, %v3964_v1  ;;  %v8283_v3 = vpop.f32.mrb[254].mxu1  ;;  %8356 = vmatprep.mubr.bf16.mxu0 %v4071_v62 }
 0x7e9   : > { %v3976_v4 = vadd.f32 %v8283_v3, %v9937_v54  ;;  %v3967_v5 = vpop.f32.mrb[255].mxu1  ;;  %8357 = vmatmul.mubr.bf16.gmra.mrb[56].mxu0 %v4072_v14  ;;  %v4041_v7 = vmax.f32 %v3973_v0, 0.0 }
 0x7ea   : > { %v3968_v6 = vadd.f32 %v9937_v54, %v3967_v5  ;;  %v4039_v9 = vmax.f32 %v3965_v2, 0.0  ;;  %8459 = vmatpush3.bf16.msra.mxu0 %v8796_v57 }
 0x7eb   : > { %v4042_v8 = vmax.f32 %v3976_v4, 0.0 }
 0x7ec   : > { %v4040_v11 = vmax.f32 %v3968_v6, 0.0 }
 0x7ed   : > { %v4074_v12 = vpack.c.bf16 %v4042_v8, %v4041_v7 }
 0x7ee   : > { %v4073_v30 = vpack.c.bf16 %v4040_v11, %v4039_v9 }
 0x7f0   : > { %8360 = vmatprep.mubr.bf16.mxu0 %v4073_v30 }
 0x7f1   : > { %8361 = vmatmul.mubr.bf16.gmra.mrb[60].mxu0 %v4074_v12 }
 0x84c   : > { %v8302_v33 = vpop.f32.mrb[0].mxu0 }
 0x84d   : > { %v4191_v17 = vadd.f32 %v8302_v33, %v10003_v16  ;;  %v4182_v54 = vpop.f32.mrb[1].mxu0 }
 0x84e   : > { %v4183_v18 = vadd.f32 %v10003_v16, %v4182_v54  ;;  %v8303_v19 = vpop.f32.mrb[2].mxu0 }
 0x84f   : > { %v4194_v20 = vadd.f32 %v8303_v19, %v10003_v16  ;;  %v4185_v21 = vpop.f32.mrb[3].mxu0  ;;  %v4439_v25 = vmax.f32 %v4191_v17, 0.0 }
 0x850   : > { %v4186_v24 = vadd.f32 %v10003_v16, %v4185_v21  ;;  %v4437_v27 = vmax.f32 %v4183_v18, 0.0 }
 0x851   : > { %v4440_v26 = vmax.f32 %v4194_v20, 0.0 }
 0x852   : > { %v4438_v28 = vmax.f32 %v4186_v24, 0.0 }
 0x853   : > { %v4502_v29 = vpack.c.bf16 %v4440_v26, %v4439_v25 }
 0x854   : > { %v4501_v32 = vpack.c.bf16 %v4438_v28, %v4437_v27  ;;  %v8306_v50 = vpop.f32.mrb[4].mxu0 }
 0x855   : > { %v4207_v34 = vadd.f32 %v8306_v50, %v10003_v16  ;;  %v4198_v35 = vpop.f32.mrb[5].mxu0 }
 0x856   : > { %v4199_v36 = vadd.f32 %v10003_v16, %v4198_v35  ;;  %v8307_v37 = vpop.f32.mrb[6].mxu0  ;;  %8380 = vmatprep.mubr.bf16.mxu1 %v4501_v32 }
 0x857   : > { %v4210_v10 = vadd.f32 %v8307_v37, %v10003_v16  ;;  %v4201_v38 = vpop.f32.mrb[7].mxu0  ;;  %8381 = vmatmul.mubr.bf16.vlgmr.msra.gmra.mrb[0].mxu1 %v4502_v29  ;;  %v4443_v41 = vmax.f32 %v4207_v34, 0.0 }
 0x858   : > { %v4202_v40 = vadd.f32 %v10003_v16, %v4201_v38  ;;  %v4441_v43 = vmax.f32 %v4199_v36, 0.0 }
 0x859   : > { %v4444_v42 = vmax.f32 %v4210_v10, 0.0 }
 0x85a   : > { %v4442_v44 = vmax.f32 %v4202_v40, 0.0 }
 0x85b   : > { %v4504_v45 = vpack.c.bf16 %v4444_v42, %v4443_v41 }
 0x85c   : > { %v4503_v47 = vpack.c.bf16 %v4442_v44, %v4441_v43  ;;  %v8310_v48 = vpop.f32.mrb[8].mxu0 }
 0x85d   : > { %v4223_v49 = vadd.f32 %v8310_v48, %v10003_v16  ;;  %v4214_v51 = vpop.f32.mrb[9].mxu0 }
 0x85e   : > { %v4215_v52 = vadd.f32 %v10003_v16, %v4214_v51  ;;  %v8311_v53 = vpop.f32.mrb[10].mxu0  ;;  %8384 = vmatprep.mubr.bf16.mxu1 %v4503_v47 }
 0x85f   : > { %v4226_v55 = vadd.f32 %v8311_v53, %v10003_v16  ;;  %v4217_v56 = vpop.f32.mrb[11].mxu0  ;;  %8385 = vmatmul.mubr.bf16.gmra.mrb[4].mxu1 %v4504_v45  ;;  %v4447_v59 = vmax.f32 %v4223_v49, 0.0 }
 0x860   : > { %v4218_v58 = vadd.f32 %v10003_v16, %v4217_v56  ;;  %v4445_v61 = vmax.f32 %v4215_v52, 0.0 }
 0x861   : > { %v4448_v60 = vmax.f32 %v4226_v55, 0.0 }
 0x862   : > { %v4446_v14 = vmax.f32 %v4218_v58, 0.0 }
 0x863   : > { %v4506_v62 = vpack.c.bf16 %v4448_v60, %v4447_v59 }
 0x864   : > { %v4505_v63 = vpack.c.bf16 %v4446_v14, %v4445_v61  ;;  %v8314_v0 = vpop.f32.mrb[12].mxu0 }
 0x865   : > { %v4239_v1 = vadd.f32 %v8314_v0, %v10003_v16  ;;  %v4230_v2 = vpop.f32.mrb[13].mxu0 }
 0x866   : > { %v4231_v3 = vadd.f32 %v10003_v16, %v4230_v2  ;;  %v8315_v4 = vpop.f32.mrb[14].mxu0  ;;  %8388 = vmatprep.mubr.bf16.mxu1 %v4505_v63 }
 0x867   : > { %v4242_v5 = vadd.f32 %v8315_v4, %v10003_v16  ;;  %v4233_v6 = vpop.f32.mrb[15].mxu0  ;;  %8389 = vmatmul.mubr.bf16.gmra.mrb[8].mxu1 %v4506_v62  ;;  %v4451_v8 = vmax.f32 %v4239_v1, 0.0 }
 0x868   : > { %v4234_v7 = vadd.f32 %v10003_v16, %v4233_v6  ;;  %v4449_v11 = vmax.f32 %v4231_v3, 0.0 }
 0x869   : > { %v4452_v9 = vmax.f32 %v4242_v5, 0.0 }
 0x86a   : > { %v4450_v12 = vmax.f32 %v4234_v7, 0.0 }
 0x86b   : > { %v4508_v30 = vpack.c.bf16 %v4452_v9, %v4451_v8 }
 0x86c   : > { %v4507_v13 = vpack.c.bf16 %v4450_v12, %v4449_v11  ;;  %v8318_v15 = vpop.f32.mrb[16].mxu0 }
 0x86d   : > { %v4255_v33 = vadd.f32 %v8318_v15, %v10003_v16  ;;  %v4246_v17 = vpop.f32.mrb[17].mxu0 }
 0x86e   : > { %v4247_v54 = vadd.f32 %v10003_v16, %v4246_v17  ;;  %v8319_v18 = vpop.f32.mrb[18].mxu0  ;;  %8392 = vmatprep.mubr.bf16.mxu1 %v4507_v13 }
 0x86f   : > { %v4258_v19 = vadd.f32 %v8319_v18, %v10003_v16  ;;  %v4249_v20 = vpop.f32.mrb[19].mxu0  ;;  %8393 = vmatmul.mubr.bf16.gmra.mrb[12].mxu1 %v4508_v30  ;;  %v4455_v22 = vmax.f32 %v4255_v33, 0.0 }
 0x870   : > { %v4250_v21 = vadd.f32 %v10003_v16, %v4249_v20  ;;  %v4453_v24 = vmax.f32 %v4247_v54, 0.0 }
 0x871   : > { %v4456_v23 = vmax.f32 %v4258_v19, 0.0 }
 0x872   : > { %v4454_v25 = vmax.f32 %v4250_v21, 0.0 }
 0x873   : > { %v4510_v26 = vpack.c.bf16 %v4456_v23, %v4455_v22 }
 0x874   : > { %v4509_v27 = vpack.c.bf16 %v4454_v25, %v4453_v24  ;;  %v8322_v28 = vpop.f32.mrb[20].mxu0 }
 0x875   : > { %v4271_v29 = vadd.f32 %v8322_v28, %v10003_v16  ;;  %v4262_v31 = vpop.f32.mrb[21].mxu0 }
 0x876   : > { %v4263_v32 = vadd.f32 %v10003_v16, %v4262_v31  ;;  %v8323_v50 = vpop.f32.mrb[22].mxu0  ;;  %8396 = vmatprep.mubr.bf16.mxu1 %v4509_v27 }
 0x877   : > { %v4274_v34 = vadd.f32 %v8323_v50, %v10003_v16  ;;  %v4265_v35 = vpop.f32.mrb[23].mxu0  ;;  %8397 = vmatmul.mubr.bf16.gmra.mrb[16].mxu1 %v4510_v26  ;;  %v4459_v37 = vmax.f32 %v4271_v29, 0.0 }
 0x878   : > { %v4266_v36 = vadd.f32 %v10003_v16, %v4265_v35  ;;  %v4457_v38 = vmax.f32 %v4263_v32, 0.0 }
 0x879   : > { %v4460_v10 = vmax.f32 %v4274_v34, 0.0 }
 0x87a   : > { %v4458_v39 = vmax.f32 %v4266_v36, 0.0 }
 0x87b   : > { %v4512_v40 = vpack.c.bf16 %v4460_v10, %v4459_v37 }
 0x87c   : > { %v4511_v41 = vpack.c.bf16 %v4458_v39, %v4457_v38  ;;  %v8326_v42 = vpop.f32.mrb[24].mxu0 }
 0x87d   : > { %v4287_v43 = vadd.f32 %v8326_v42, %v10003_v16  ;;  %v4278_v44 = vpop.f32.mrb[25].mxu0 }
 0x87e   : > { %v4279_v45 = vadd.f32 %v10003_v16, %v4278_v44  ;;  %v8327_v46 = vpop.f32.mrb[26].mxu0  ;;  %8400 = vmatprep.mubr.bf16.mxu1 %v4511_v41 }
 0x87f   : > { %v4290_v47 = vadd.f32 %v8327_v46, %v10003_v16  ;;  %v4281_v48 = vpop.f32.mrb[27].mxu0  ;;  %8401 = vmatmul.mubr.bf16.gmra.mrb[20].mxu1 %v4512_v40  ;;  %v4463_v51 = vmax.f32 %v4287_v43, 0.0 }
 0x880   : > { %v4282_v49 = vadd.f32 %v10003_v16, %v4281_v48  ;;  %v4461_v53 = vmax.f32 %v4279_v45, 0.0 }
 0x881   : > { %v4464_v52 = vmax.f32 %v4290_v47, 0.0 }
 0x882   : > { %v4462_v55 = vmax.f32 %v4282_v49, 0.0 }
 0x883   : > { %v4514_v56 = vpack.c.bf16 %v4464_v52, %v4463_v51 }
 0x884   : > { %v4513_v57 = vpack.c.bf16 %v4462_v55, %v4461_v53  ;;  %v8330_v58 = vpop.f32.mrb[28].mxu0 }
 0x885   : > { %v4303_v59 = vadd.f32 %v8330_v58, %v10003_v16  ;;  %v4294_v60 = vpop.f32.mrb[29].mxu0 }
 0x886   : > { %v4295_v61 = vadd.f32 %v10003_v16, %v4294_v60  ;;  %v8331_v14 = vpop.f32.mrb[30].mxu0  ;;  %8404 = vmatprep.mubr.bf16.mxu1 %v4513_v57 }
 0x887   : > { %v4306_v62 = vadd.f32 %v8331_v14, %v10003_v16  ;;  %v4297_v63 = vpop.f32.mrb[31].mxu0  ;;  %8405 = vmatmul.mubr.bf16.gmra.mrb[24].mxu1 %v4514_v56  ;;  %v4467_v1 = vmax.f32 %v4303_v59, 0.0 }
 0x888   : > { %v4298_v0 = vadd.f32 %v10003_v16, %v4297_v63  ;;  %v4465_v3 = vmax.f32 %v4295_v61, 0.0 }
 0x889   : > { %v4468_v2 = vmax.f32 %v4306_v62, 0.0 }
 0x88a   : > { %v4466_v4 = vmax.f32 %v4298_v0, 0.0 }
 0x88b   : > { %v4516_v5 = vpack.c.bf16 %v4468_v2, %v4467_v1 }
 0x88c   : > { %v4515_v6 = vpack.c.bf16 %v4466_v4, %v4465_v3  ;;  %v8334_v7 = vpop.f32.mrb[32].mxu0 }
 0x88d   : > { %v4319_v8 = vadd.f32 %v8334_v7, %v10003_v16  ;;  %v4310_v9 = vpop.f32.mrb[33].mxu0 }
 0x88e   : > { %v4311_v11 = vadd.f32 %v10003_v16, %v4310_v9  ;;  %v8335_v12 = vpop.f32.mrb[34].mxu0  ;;  %8408 = vmatprep.mubr.bf16.mxu1 %v4515_v6 }
 0x88f   : > { %v4322_v30 = vadd.f32 %v8335_v12, %v10003_v16  ;;  %v4313_v13 = vpop.f32.mrb[35].mxu0  ;;  %8409 = vmatmul.mubr.bf16.gmra.mrb[28].mxu1 %v4516_v5  ;;  %v4471_v33 = vmax.f32 %v4319_v8, 0.0 }
 0x890   : > { %v4314_v15 = vadd.f32 %v10003_v16, %v4313_v13  ;;  %v4469_v54 = vmax.f32 %v4311_v11, 0.0 }
 0x891   : > { %v4472_v17 = vmax.f32 %v4322_v30, 0.0 }
 0x892   : > { %v4470_v18 = vmax.f32 %v4314_v15, 0.0 }
 0x893   : > { %v4518_v19 = vpack.c.bf16 %v4472_v17, %v4471_v33 }
 0x894   : > { %v4517_v20 = vpack.c.bf16 %v4470_v18, %v4469_v54  ;;  %v8338_v21 = vpop.f32.mrb[36].mxu0 }
 0x895   : > { %v4335_v22 = vadd.f32 %v8338_v21, %v10003_v16  ;;  %v4326_v23 = vpop.f32.mrb[37].mxu0 }
 0x896   : > { %v4327_v24 = vadd.f32 %v10003_v16, %v4326_v23  ;;  %v8339_v25 = vpop.f32.mrb[38].mxu0  ;;  %8412 = vmatprep.mubr.bf16.mxu1 %v4517_v20 }
 0x897   : > { %v4338_v26 = vadd.f32 %v8339_v25, %v10003_v16  ;;  %v4329_v27 = vpop.f32.mrb[39].mxu0  ;;  %8413 = vmatmul.mubr.bf16.gmra.mrb[32].mxu1 %v4518_v19  ;;  %v4475_v29 = vmax.f32 %v4335_v22, 0.0 }
 0x898   : > { %v4330_v28 = vadd.f32 %v10003_v16, %v4329_v27  ;;  %v4473_v32 = vmax.f32 %v4327_v24, 0.0 }
 0x899   : > { %v4476_v31 = vmax.f32 %v4338_v26, 0.0 }
 0x89a   : > { %v4474_v50 = vmax.f32 %v4330_v28, 0.0 }
 0x89b   : > { %v4520_v34 = vpack.c.bf16 %v4476_v31, %v4475_v29 }
 0x89c   : > { %v4519_v35 = vpack.c.bf16 %v4474_v50, %v4473_v32  ;;  %v8342_v36 = vpop.f32.mrb[40].mxu0 }
 0x89d   : > { %v4351_v37 = vadd.f32 %v8342_v36, %v10003_v16  ;;  %v4342_v10 = vpop.f32.mrb[41].mxu0 }
 0x89e   : > { %v4343_v38 = vadd.f32 %v10003_v16, %v4342_v10  ;;  %v8343_v39 = vpop.f32.mrb[42].mxu0  ;;  %8416 = vmatprep.mubr.bf16.mxu1 %v4519_v35 }
 0x89f   : > { %v4354_v40 = vadd.f32 %v8343_v39, %v10003_v16  ;;  %v4345_v41 = vpop.f32.mrb[43].mxu0  ;;  %8417 = vmatmul.mubr.bf16.gmra.mrb[36].mxu1 %v4520_v34  ;;  %v4479_v43 = vmax.f32 %v4351_v37, 0.0 }
 0x8a0   : > { %v4346_v42 = vadd.f32 %v10003_v16, %v4345_v41  ;;  %v4477_v45 = vmax.f32 %v4343_v38, 0.0 }
 0x8a1   : > { %v4480_v44 = vmax.f32 %v4354_v40, 0.0 }
 0x8a2   : > { %v4478_v46 = vmax.f32 %v4346_v42, 0.0 }
 0x8a3   : > { %v4522_v47 = vpack.c.bf16 %v4480_v44, %v4479_v43 }
 0x8a4   : > { %v4521_v48 = vpack.c.bf16 %v4478_v46, %v4477_v45  ;;  %v8346_v49 = vpop.f32.mrb[44].mxu0 }
 0x8a5   : > { %v4367_v51 = vadd.f32 %v8346_v49, %v10003_v16  ;;  %v4358_v52 = vpop.f32.mrb[45].mxu0 }
 0x8a6   : > { %v4359_v53 = vadd.f32 %v10003_v16, %v4358_v52  ;;  %v8347_v55 = vpop.f32.mrb[46].mxu0  ;;  %8420 = vmatprep.mubr.bf16.mxu1 %v4521_v48 }
 0x8a7   : > { %v4370_v56 = vadd.f32 %v8347_v55, %v10003_v16  ;;  %v4361_v57 = vpop.f32.mrb[47].mxu0  ;;  %8421 = vmatmul.mubr.bf16.gmra.mrb[40].mxu1 %v4522_v47  ;;  %v4483_v59 = vmax.f32 %v4367_v51, 0.0 }
 0x8a8   : > { %v4362_v58 = vadd.f32 %v10003_v16, %v4361_v57  ;;  %v4481_v61 = vmax.f32 %v4359_v53, 0.0 }
 0x8a9   : > { %v4484_v60 = vmax.f32 %v4370_v56, 0.0 }
 0x8aa   : > { %v4482_v14 = vmax.f32 %v4362_v58, 0.0  ;;  %v8797_v58 = vld [vmem:[#allocation5 + $0x2c0] sm:$0xff]  }
 0x8ab   : > { %v4524_v62 = vpack.c.bf16 %v4484_v60, %v4483_v59  ;;  %8524 = vmatprep.subr.bf16.mxu1 %v8797_v58  ;;  %v8798_v59 = vld [vmem:[#allocation5 + $0x2c8] sm:$0xff]  }
 0x8ac   : > { %v4523_v63 = vpack.c.bf16 %v4482_v14, %v4481_v61  ;;  %v8350_v0 = vpop.f32.mrb[48].mxu0  ;;  %8525 = vmatpush3.bf16.msra.mxu1 %v8797_v58  ;;  %v10069_v60 = vld [vmem:[#allocation7 + $0x9] ss:$0 sm:$0xff] }
 0x8ad   : > { %v4383_v1 = vadd.f32 %v8350_v0, %v10003_v16  ;;  %v4374_v2 = vpop.f32.mrb[49].mxu0  ;;  %8526 = vmatprep.subr.bf16.mxu1 %v8798_v59 }
 0x8ae   : > { %v4375_v3 = vadd.f32 %v10003_v16, %v4374_v2  ;;  %v8351_v4 = vpop.f32.mrb[50].mxu0  ;;  %8424 = vmatprep.mubr.bf16.mxu1 %v4523_v63  ;;  %v8799_v2 = vld [vmem:[#allocation5 + $0x2d0] sm:$0xff]  }
 0x8af   : > { %v4386_v5 = vadd.f32 %v8351_v4, %v10003_v16  ;;  %v4377_v6 = vpop.f32.mrb[51].mxu0  ;;  %8425 = vmatmul.mubr.bf16.gmra.mrb[44].mxu1 %v4524_v62  ;;  %v4487_v8 = vmax.f32 %v4383_v1, 0.0 }
 0x8b0   : > { %v4378_v7 = vadd.f32 %v10003_v16, %v4377_v6  ;;  %v4485_v11 = vmax.f32 %v4375_v3, 0.0  ;;  %8527 = vmatpush3.bf16.msra.mxu1 %v8798_v59  ;;  %v8800_v3 = vld [vmem:[#allocation5 + $0x2d8] sm:$0xff]  }
 0x8b1   : > { %v4488_v9 = vmax.f32 %v4386_v5, 0.0  ;;  %8528 = vmatprep.subr.bf16.mxu1 %v8799_v2 }
 0x8b2   : > { %v4486_v12 = vmax.f32 %v4378_v7, 0.0 }
 0x8b3   : > { %v4526_v30 = vpack.c.bf16 %v4488_v9, %v4487_v8 }
 0x8b4   : > { %v4525_v13 = vpack.c.bf16 %v4486_v12, %v4485_v11  ;;  %v8354_v15 = vpop.f32.mrb[52].mxu0  ;;  %8529 = vmatpush3.bf16.msra.mxu1 %v8799_v2  ;;  %v8801_v11 = vld [vmem:[#allocation5 + $0x2e0] sm:$0xff]  }
 0x8b5   : > { %v4399_v33 = vadd.f32 %v8354_v15, %v10003_v16  ;;  %v4390_v17 = vpop.f32.mrb[53].mxu0  ;;  %8530 = vmatprep.subr.bf16.mxu1 %v8800_v3 }
 0x8b6   : > { %v4391_v54 = vadd.f32 %v10003_v16, %v4390_v17  ;;  %v8355_v18 = vpop.f32.mrb[54].mxu0  ;;  %8428 = vmatprep.mubr.bf16.mxu1 %v4525_v13 }
 0x8b7   : > { %v4402_v19 = vadd.f32 %v8355_v18, %v10003_v16  ;;  %v4393_v20 = vpop.f32.mrb[55].mxu0  ;;  %8429 = vmatmul.mubr.bf16.gmra.mrb[48].mxu1 %v4526_v30  ;;  %v4491_v22 = vmax.f32 %v4399_v33, 0.0 }
 0x8b8   : > { %v4394_v21 = vadd.f32 %v10003_v16, %v4393_v20  ;;  %v4489_v24 = vmax.f32 %v4391_v54, 0.0  ;;  %8531 = vmatpush3.bf16.msra.mxu1 %v8800_v3 }
 0x8b9   : > { %v4492_v23 = vmax.f32 %v4402_v19, 0.0  ;;  %8532 = vmatprep.subr.bf16.mxu1 %v8801_v11  ;;  %v8802_v19 = vld [vmem:[#allocation5 + $0x2e8] sm:$0xff]  }
 0x8ba   : > { %v4490_v25 = vmax.f32 %v4394_v21, 0.0 }
 0x8bb   : > { %v4528_v26 = vpack.c.bf16 %v4492_v23, %v4491_v22 }
 0x8bc   : > { %v4527_v27 = vpack.c.bf16 %v4490_v25, %v4489_v24  ;;  %v8358_v28 = vpop.f32.mrb[56].mxu0  ;;  %8533 = vmatpush3.bf16.msra.mxu1 %v8801_v11 }
 0x8bd   : > { %v4415_v29 = vadd.f32 %v8358_v28, %v10003_v16  ;;  %v4406_v31 = vpop.f32.mrb[57].mxu0  ;;  %8534 = vmatprep.subr.bf16.mxu1 %v8802_v19 }
 0x8be   : > { %v4407_v32 = vadd.f32 %v10003_v16, %v4406_v31  ;;  %v8359_v50 = vpop.f32.mrb[58].mxu0  ;;  %8432 = vmatprep.mubr.bf16.mxu1 %v4527_v27 }
 0x8bf   : > { %v4418_v34 = vadd.f32 %v8359_v50, %v10003_v16  ;;  %v4409_v35 = vpop.f32.mrb[59].mxu0  ;;  %8433 = vmatmul.mubr.bf16.gmra.mrb[52].mxu1 %v4528_v26  ;;  %v4495_v37 = vmax.f32 %v4415_v29, 0.0  ;;  %v8803_v26 = vld [vmem:[#allocation5 + $0x2f0] sm:$0xff]  }
 0x8c0   : > { %v4410_v36 = vadd.f32 %v10003_v16, %v4409_v35  ;;  %v4493_v38 = vmax.f32 %v4407_v32, 0.0  ;;  %8535 = vmatpush3.bf16.msra.mxu1 %v8802_v19 }
 0x8c1   : > { %v4496_v10 = vmax.f32 %v4418_v34, 0.0  ;;  %8536 = vmatprep.subr.bf16.mxu1 %v8803_v26 }
 0x8c2   : > { %v4494_v39 = vmax.f32 %v4410_v36, 0.0  ;;  %v8804_v36 = vld [vmem:[#allocation5 + $0x2f8] sm:$0xff]  }
 0x8c3   : > { %v4530_v40 = vpack.c.bf16 %v4496_v10, %v4495_v37 }
 0x8c4   : > { %v4529_v41 = vpack.c.bf16 %v4494_v39, %v4493_v38  ;;  %v8362_v42 = vpop.f32.mrb[60].mxu0  ;;  %8537 = vmatpush3.bf16.msra.mxu1 %v8803_v26 }
 0x8c5   : > { %v4431_v43 = vadd.f32 %v8362_v42, %v10003_v16  ;;  %v4422_v44 = vpop.f32.mrb[61].mxu0  ;;  %8538 = vmatprep.subr.bf16.mxu1 %v8804_v36 }
 0x8c6   : > { %v4423_v45 = vadd.f32 %v10003_v16, %v4422_v44  ;;  %v8363_v46 = vpop.f32.mrb[62].mxu0  ;;  %8436 = vmatprep.mubr.bf16.mxu1 %v4529_v41 }
 0x8c7   : > { %v4434_v47 = vadd.f32 %v8363_v46, %v10003_v16  ;;  %v4425_v48 = vpop.f32.mrb[63].mxu0  ;;  %8437 = vmatmul.mubr.bf16.gmra.mrb[56].mxu1 %v4530_v40  ;;  %v4499_v51 = vmax.f32 %v4431_v43, 0.0 }
 0x8c8   : > { %v4426_v49 = vadd.f32 %v10003_v16, %v4425_v48  ;;  %v4497_v53 = vmax.f32 %v4423_v45, 0.0  ;;  %8539 = vmatpush3.bf16.msra.mxu1 %v8804_v36 }
 0x8c9   : > { %v4500_v52 = vmax.f32 %v4434_v47, 0.0 }
 0x8ca   : > { %v4498_v55 = vmax.f32 %v4426_v49, 0.0 }
 0x8cb   : > { %v4532_v56 = vpack.c.bf16 %v4500_v52, %v4499_v51 }
 0x8cc   : > { %v4531_v57 = vpack.c.bf16 %v4498_v55, %v4497_v53 }
 0x8ce   : > { %8440 = vmatprep.mubr.bf16.mxu1 %v4531_v57 }
 0x8cf   : > { %8441 = vmatmul.mubr.bf16.gmra.mrb[60].mxu1 %v4532_v56 }
 0x92a   : > { %v8382_v61 = vpop.f32.mrb[0].mxu1 }
 0x92b   : > { %v4649_v14 = vadd.f32 %v8382_v61, %v10069_v60  ;;  %v4640_v16 = vpop.f32.mrb[1].mxu1 }
 0x92c   : > { %v4641_v62 = vadd.f32 %v10069_v60, %v4640_v16  ;;  %v8383_v63 = vpop.f32.mrb[2].mxu1 }
 0x92d   : > { %v4652_v0 = vadd.f32 %v8383_v63, %v10069_v60  ;;  %v4643_v1 = vpop.f32.mrb[3].mxu1  ;;  %v4897_v5 = vmax.f32 %v4649_v14, 0.0 }
 0x92e   : > { %v4644_v4 = vadd.f32 %v10069_v60, %v4643_v1  ;;  %v4895_v7 = vmax.f32 %v4641_v62, 0.0 }
 0x92f   : > { %v4898_v6 = vmax.f32 %v4652_v0, 0.0 }
 0x930   : > { %v4896_v8 = vmax.f32 %v4644_v4, 0.0 }
 0x931   : > { %v4960_v9 = vpack.c.bf16 %v4898_v6, %v4897_v5 }
 0x932   : > { %v4959_v12 = vpack.c.bf16 %v4896_v8, %v4895_v7  ;;  %v8386_v30 = vpop.f32.mrb[4].mxu1 }
 0x933   : > { %v4665_v13 = vadd.f32 %v8386_v30, %v10069_v60  ;;  %v4656_v15 = vpop.f32.mrb[5].mxu1 }
 0x934   : > { %v4657_v33 = vadd.f32 %v10069_v60, %v4656_v15  ;;  %v8387_v17 = vpop.f32.mrb[6].mxu1  ;;  %8460 = vmatprep.mubr.bf16.mxu0 %v4959_v12 }
 0x935   : > { %v4668_v54 = vadd.f32 %v8387_v17, %v10069_v60  ;;  %v4659_v18 = vpop.f32.mrb[7].mxu1  ;;  %8461 = vmatmul.mubr.bf16.vlgmr.msra.gmra.mrb[64].mxu0 %v4960_v9  ;;  %v4901_v21 = vmax.f32 %v4665_v13, 0.0 }
 0x936   : > { %v4660_v20 = vadd.f32 %v10069_v60, %v4659_v18  ;;  %v4899_v23 = vmax.f32 %v4657_v33, 0.0 }
 0x937   : > { %v4902_v22 = vmax.f32 %v4668_v54, 0.0 }
 0x938   : > { %v4900_v24 = vmax.f32 %v4660_v20, 0.0 }
 0x939   : > { %v4962_v25 = vpack.c.bf16 %v4902_v22, %v4901_v21 }
 0x93a   : > { %v4961_v27 = vpack.c.bf16 %v4900_v24, %v4899_v23  ;;  %v8390_v28 = vpop.f32.mrb[8].mxu1 }
 0x93b   : > { %v4681_v29 = vadd.f32 %v8390_v28, %v10069_v60  ;;  %v4672_v31 = vpop.f32.mrb[9].mxu1 }
 0x93c   : > { %v4673_v32 = vadd.f32 %v10069_v60, %v4672_v31  ;;  %v8391_v50 = vpop.f32.mrb[10].mxu1  ;;  %8464 = vmatprep.mubr.bf16.mxu0 %v4961_v27 }
 0x93d   : > { %v4684_v34 = vadd.f32 %v8391_v50, %v10069_v60  ;;  %v4675_v35 = vpop.f32.mrb[11].mxu1  ;;  %8465 = vmatmul.mubr.bf16.gmra.mrb[68].mxu0 %v4962_v25  ;;  %v4905_v10 = vmax.f32 %v4681_v29, 0.0 }
 0x93e   : > { %v4676_v37 = vadd.f32 %v10069_v60, %v4675_v35  ;;  %v4903_v39 = vmax.f32 %v4673_v32, 0.0 }
 0x93f   : > { %v4906_v38 = vmax.f32 %v4684_v34, 0.0 }
 0x940   : > { %v4904_v40 = vmax.f32 %v4676_v37, 0.0 }
 0x941   : > { %v4964_v41 = vpack.c.bf16 %v4906_v38, %v4905_v10 }
 0x942   : > { %v4963_v42 = vpack.c.bf16 %v4904_v40, %v4903_v39  ;;  %v8394_v43 = vpop.f32.mrb[12].mxu1 }
 0x943   : > { %v4697_v44 = vadd.f32 %v8394_v43, %v10069_v60  ;;  %v4688_v45 = vpop.f32.mrb[13].mxu1 }
 0x944   : > { %v4689_v46 = vadd.f32 %v10069_v60, %v4688_v45  ;;  %v8395_v47 = vpop.f32.mrb[14].mxu1  ;;  %8468 = vmatprep.mubr.bf16.mxu0 %v4963_v42 }
 0x945   : > { %v4700_v48 = vadd.f32 %v8395_v47, %v10069_v60  ;;  %v4691_v49 = vpop.f32.mrb[15].mxu1  ;;  %8469 = vmatmul.mubr.bf16.gmra.mrb[72].mxu0 %v4964_v41  ;;  %v4909_v52 = vmax.f32 %v4697_v44, 0.0 }
 0x946   : > { %v4692_v51 = vadd.f32 %v10069_v60, %v4691_v49  ;;  %v4907_v55 = vmax.f32 %v4689_v46, 0.0 }
 0x947   : > { %v4910_v53 = vmax.f32 %v4700_v48, 0.0 }
 0x948   : > { %v4908_v56 = vmax.f32 %v4692_v51, 0.0 }
 0x949   : > { %v4966_v57 = vpack.c.bf16 %v4910_v53, %v4909_v52 }
 0x94a   : > { %v4965_v58 = vpack.c.bf16 %v4908_v56, %v4907_v55  ;;  %v8398_v59 = vpop.f32.mrb[16].mxu1 }
 0x94b   : > { %v4713_v61 = vadd.f32 %v8398_v59, %v10069_v60  ;;  %v4704_v14 = vpop.f32.mrb[17].mxu1 }
 0x94c   : > { %v4705_v16 = vadd.f32 %v10069_v60, %v4704_v14  ;;  %v8399_v62 = vpop.f32.mrb[18].mxu1  ;;  %8472 = vmatprep.mubr.bf16.mxu0 %v4965_v58 }
 0x94d   : > { %v4716_v63 = vadd.f32 %v8399_v62, %v10069_v60  ;;  %v4707_v0 = vpop.f32.mrb[19].mxu1  ;;  %8473 = vmatmul.mubr.bf16.gmra.mrb[76].mxu0 %v4966_v57  ;;  %v4913_v2 = vmax.f32 %v4713_v61, 0.0 }
 0x94e   : > { %v4708_v1 = vadd.f32 %v10069_v60, %v4707_v0  ;;  %v4911_v4 = vmax.f32 %v4705_v16, 0.0 }
 0x94f   : > { %v4914_v3 = vmax.f32 %v4716_v63, 0.0 }
 0x950   : > { %v4912_v5 = vmax.f32 %v4708_v1, 0.0 }
 0x951   : > { %v4968_v6 = vpack.c.bf16 %v4914_v3, %v4913_v2 }
 0x952   : > { %v4967_v7 = vpack.c.bf16 %v4912_v5, %v4911_v4  ;;  %v8402_v8 = vpop.f32.mrb[20].mxu1 }
 0x953   : > { %v4729_v9 = vadd.f32 %v8402_v8, %v10069_v60  ;;  %v4720_v11 = vpop.f32.mrb[21].mxu1 }
 0x954   : > { %v4721_v12 = vadd.f32 %v10069_v60, %v4720_v11  ;;  %v8403_v30 = vpop.f32.mrb[22].mxu1  ;;  %8476 = vmatprep.mubr.bf16.mxu0 %v4967_v7 }
 0x955   : > { %v4732_v13 = vadd.f32 %v8403_v30, %v10069_v60  ;;  %v4723_v15 = vpop.f32.mrb[23].mxu1  ;;  %8477 = vmatmul.mubr.bf16.gmra.mrb[80].mxu0 %v4968_v6  ;;  %v4917_v17 = vmax.f32 %v4729_v9, 0.0 }
 0x956   : > { %v4724_v33 = vadd.f32 %v10069_v60, %v4723_v15  ;;  %v4915_v18 = vmax.f32 %v4721_v12, 0.0 }
 0x957   : > { %v4918_v54 = vmax.f32 %v4732_v13, 0.0 }
 0x958   : > { %v4916_v19 = vmax.f32 %v4724_v33, 0.0 }
 0x959   : > { %v4970_v20 = vpack.c.bf16 %v4918_v54, %v4917_v17 }
 0x95a   : > { %v4969_v21 = vpack.c.bf16 %v4916_v19, %v4915_v18  ;;  %v8406_v22 = vpop.f32.mrb[24].mxu1 }
 0x95b   : > { %v4745_v23 = vadd.f32 %v8406_v22, %v10069_v60  ;;  %v4736_v24 = vpop.f32.mrb[25].mxu1 }
 0x95c   : > { %v4737_v25 = vadd.f32 %v10069_v60, %v4736_v24  ;;  %v8407_v26 = vpop.f32.mrb[26].mxu1  ;;  %8480 = vmatprep.mubr.bf16.mxu0 %v4969_v21 }
 0x95d   : > { %v4748_v27 = vadd.f32 %v8407_v26, %v10069_v60  ;;  %v4739_v28 = vpop.f32.mrb[27].mxu1  ;;  %8481 = vmatmul.mubr.bf16.gmra.mrb[84].mxu0 %v4970_v20  ;;  %v4921_v31 = vmax.f32 %v4745_v23, 0.0 }
 0x95e   : > { %v4740_v29 = vadd.f32 %v10069_v60, %v4739_v28  ;;  %v4919_v50 = vmax.f32 %v4737_v25, 0.0 }
 0x95f   : > { %v4922_v32 = vmax.f32 %v4748_v27, 0.0 }
 0x960   : > { %v4920_v34 = vmax.f32 %v4740_v29, 0.0 }
 0x961   : > { %v4972_v35 = vpack.c.bf16 %v4922_v32, %v4921_v31 }
 0x962   : > { %v4971_v36 = vpack.c.bf16 %v4920_v34, %v4919_v50  ;;  %v8410_v37 = vpop.f32.mrb[28].mxu1 }
 0x963   : > { %v4761_v10 = vadd.f32 %v8410_v37, %v10069_v60  ;;  %v4752_v38 = vpop.f32.mrb[29].mxu1 }
 0x964   : > { %v4753_v39 = vadd.f32 %v10069_v60, %v4752_v38  ;;  %v8411_v40 = vpop.f32.mrb[30].mxu1  ;;  %8484 = vmatprep.mubr.bf16.mxu0 %v4971_v36 }
 0x965   : > { %v4764_v41 = vadd.f32 %v8411_v40, %v10069_v60  ;;  %v4755_v42 = vpop.f32.mrb[31].mxu1  ;;  %8485 = vmatmul.mubr.bf16.gmra.mrb[88].mxu0 %v4972_v35  ;;  %v4925_v44 = vmax.f32 %v4761_v10, 0.0 }
 0x966   : > { %v4756_v43 = vadd.f32 %v10069_v60, %v4755_v42  ;;  %v4923_v46 = vmax.f32 %v4753_v39, 0.0 }
 0x967   : > { %v4926_v45 = vmax.f32 %v4764_v41, 0.0 }
 0x968   : > { %v4924_v47 = vmax.f32 %v4756_v43, 0.0 }
 0x969   : > { %v4974_v48 = vpack.c.bf16 %v4926_v45, %v4925_v44 }
 0x96a   : > { %v4973_v49 = vpack.c.bf16 %v4924_v47, %v4923_v46  ;;  %v8414_v51 = vpop.f32.mrb[32].mxu1 }
 0x96b   : > { %v4777_v52 = vadd.f32 %v8414_v51, %v10069_v60  ;;  %v4768_v53 = vpop.f32.mrb[33].mxu1 }
 0x96c   : > { %v4769_v55 = vadd.f32 %v10069_v60, %v4768_v53  ;;  %v8415_v56 = vpop.f32.mrb[34].mxu1  ;;  %8488 = vmatprep.mubr.bf16.mxu0 %v4973_v49 }
 0x96d   : > { %v4780_v57 = vadd.f32 %v8415_v56, %v10069_v60  ;;  %v4771_v58 = vpop.f32.mrb[35].mxu1  ;;  %8489 = vmatmul.mubr.bf16.gmra.mrb[92].mxu0 %v4974_v48  ;;  %v4929_v61 = vmax.f32 %v4777_v52, 0.0 }
 0x96e   : > { %v4772_v59 = vadd.f32 %v10069_v60, %v4771_v58  ;;  %v4927_v16 = vmax.f32 %v4769_v55, 0.0 }
 0x96f   : > { %v4930_v14 = vmax.f32 %v4780_v57, 0.0 }
 0x970   : > { %v4928_v62 = vmax.f32 %v4772_v59, 0.0 }
 0x971   : > { %v4976_v63 = vpack.c.bf16 %v4930_v14, %v4929_v61 }
 0x972   : > { %v4975_v0 = vpack.c.bf16 %v4928_v62, %v4927_v16  ;;  %v8418_v1 = vpop.f32.mrb[36].mxu1 }
 0x973   : > { %v4793_v2 = vadd.f32 %v8418_v1, %v10069_v60  ;;  %v4784_v3 = vpop.f32.mrb[37].mxu1 }
 0x974   : > { %v4785_v4 = vadd.f32 %v10069_v60, %v4784_v3  ;;  %v8419_v5 = vpop.f32.mrb[38].mxu1  ;;  %8492 = vmatprep.mubr.bf16.mxu0 %v4975_v0 }
 0x975   : > { %v4796_v6 = vadd.f32 %v8419_v5, %v10069_v60  ;;  %v4787_v7 = vpop.f32.mrb[39].mxu1  ;;  %8493 = vmatmul.mubr.bf16.gmra.mrb[96].mxu0 %v4976_v63  ;;  %v4933_v9 = vmax.f32 %v4793_v2, 0.0 }
 0x976   : > { %v4788_v8 = vadd.f32 %v10069_v60, %v4787_v7  ;;  %v4931_v12 = vmax.f32 %v4785_v4, 0.0 }
 0x977   : > { %v4934_v11 = vmax.f32 %v4796_v6, 0.0 }
 0x978   : > { %v4932_v30 = vmax.f32 %v4788_v8, 0.0 }
 0x979   : > { %v4978_v13 = vpack.c.bf16 %v4934_v11, %v4933_v9 }
 0x97a   : > { %v4977_v15 = vpack.c.bf16 %v4932_v30, %v4931_v12  ;;  %v8422_v33 = vpop.f32.mrb[40].mxu1 }
 0x97b   : > { %v4809_v17 = vadd.f32 %v8422_v33, %v10069_v60  ;;  %v4800_v54 = vpop.f32.mrb[41].mxu1 }
 0x97c   : > { %v4801_v18 = vadd.f32 %v10069_v60, %v4800_v54  ;;  %v8423_v19 = vpop.f32.mrb[42].mxu1  ;;  %8496 = vmatprep.mubr.bf16.mxu0 %v4977_v15 }
 0x97d   : > { %v4812_v20 = vadd.f32 %v8423_v19, %v10069_v60  ;;  %v4803_v21 = vpop.f32.mrb[43].mxu1  ;;  %8497 = vmatmul.mubr.bf16.gmra.mrb[100].mxu0 %v4978_v13  ;;  %v4937_v23 = vmax.f32 %v4809_v17, 0.0 }
 0x97e   : > { %v4804_v22 = vadd.f32 %v10069_v60, %v4803_v21  ;;  %v4935_v25 = vmax.f32 %v4801_v18, 0.0 }
 0x97f   : > { %v4938_v24 = vmax.f32 %v4812_v20, 0.0 }
 0x980   : > { %v4936_v26 = vmax.f32 %v4804_v22, 0.0 }
 0x981   : > { %v4980_v27 = vpack.c.bf16 %v4938_v24, %v4937_v23 }
 0x982   : > { %v4979_v28 = vpack.c.bf16 %v4936_v26, %v4935_v25  ;;  %v8426_v29 = vpop.f32.mrb[44].mxu1 }
 0x983   : > { %v4825_v31 = vadd.f32 %v8426_v29, %v10069_v60  ;;  %v4816_v32 = vpop.f32.mrb[45].mxu1 }
 0x984   : > { %v4817_v50 = vadd.f32 %v10069_v60, %v4816_v32  ;;  %v8427_v34 = vpop.f32.mrb[46].mxu1  ;;  %8500 = vmatprep.mubr.bf16.mxu0 %v4979_v28 }
 0x985   : > { %v4828_v35 = vadd.f32 %v8427_v34, %v10069_v60  ;;  %v4819_v36 = vpop.f32.mrb[47].mxu1  ;;  %8501 = vmatmul.mubr.bf16.gmra.mrb[104].mxu0 %v4980_v27  ;;  %v4941_v10 = vmax.f32 %v4825_v31, 0.0 }
 0x986   : > { %v4820_v37 = vadd.f32 %v10069_v60, %v4819_v36  ;;  %v4939_v39 = vmax.f32 %v4817_v50, 0.0 }
 0x987   : > { %v4942_v38 = vmax.f32 %v4828_v35, 0.0 }
 0x988   : > { %v4940_v40 = vmax.f32 %v4820_v37, 0.0  ;;  %v10135_v37 = vld [vmem:[#allocation7 + $0xa] ss:$0 sm:$0xff] }
 0x989   : > { %v4982_v41 = vpack.c.bf16 %v4942_v38, %v4941_v10 }
 0x98a   : > { %v4981_v42 = vpack.c.bf16 %v4940_v40, %v4939_v39  ;;  %v8430_v43 = vpop.f32.mrb[48].mxu1 }
 0x98b   : > { %v4841_v44 = vadd.f32 %v8430_v43, %v10069_v60  ;;  %v4832_v45 = vpop.f32.mrb[49].mxu1 }
 0x98c   : > { %v4833_v46 = vadd.f32 %v10069_v60, %v4832_v45  ;;  %v8431_v47 = vpop.f32.mrb[50].mxu1  ;;  %8504 = vmatprep.mubr.bf16.mxu0 %v4981_v42 }
 0x98d   : > { %v4844_v48 = vadd.f32 %v8431_v47, %v10069_v60  ;;  %v4835_v49 = vpop.f32.mrb[51].mxu1  ;;  %8505 = vmatmul.mubr.bf16.gmra.mrb[108].mxu0 %v4982_v41  ;;  %v4945_v52 = vmax.f32 %v4841_v44, 0.0 }
 0x98e   : > { %v4836_v51 = vadd.f32 %v10069_v60, %v4835_v49  ;;  %v4943_v55 = vmax.f32 %v4833_v46, 0.0 }
 0x98f   : > { %v4946_v53 = vmax.f32 %v4844_v48, 0.0 }
 0x990   : > { %v4944_v56 = vmax.f32 %v4836_v51, 0.0 }
 0x991   : > { %v4984_v57 = vpack.c.bf16 %v4946_v53, %v4945_v52 }
 0x992   : > { %v4983_v58 = vpack.c.bf16 %v4944_v56, %v4943_v55  ;;  %v8434_v59 = vpop.f32.mrb[52].mxu1 }
 0x993   : > { %v4857_v61 = vadd.f32 %v8434_v59, %v10069_v60  ;;  %v4848_v14 = vpop.f32.mrb[53].mxu1 }
 0x994   : > { %v4849_v16 = vadd.f32 %v10069_v60, %v4848_v14  ;;  %v8435_v62 = vpop.f32.mrb[54].mxu1  ;;  %8508 = vmatprep.mubr.bf16.mxu0 %v4983_v58 }
 0x995   : > { %v4860_v63 = vadd.f32 %v8435_v62, %v10069_v60  ;;  %v4851_v0 = vpop.f32.mrb[55].mxu1  ;;  %8509 = vmatmul.mubr.bf16.gmra.mrb[112].mxu0 %v4984_v57  ;;  %v4949_v2 = vmax.f32 %v4857_v61, 0.0 }
 0x996   : > { %v4852_v1 = vadd.f32 %v10069_v60, %v4851_v0  ;;  %v4947_v4 = vmax.f32 %v4849_v16, 0.0 }
 0x997   : > { %v4950_v3 = vmax.f32 %v4860_v63, 0.0 }
 0x998   : > { %v4948_v5 = vmax.f32 %v4852_v1, 0.0 }
 0x999   : > { %v4986_v6 = vpack.c.bf16 %v4950_v3, %v4949_v2 }
 0x99a   : > { %v4985_v7 = vpack.c.bf16 %v4948_v5, %v4947_v4  ;;  %v8438_v8 = vpop.f32.mrb[56].mxu1 }
 0x99b   : > { %v4873_v9 = vadd.f32 %v8438_v8, %v10069_v60  ;;  %v4864_v11 = vpop.f32.mrb[57].mxu1 }
 0x99c   : > { %v4865_v12 = vadd.f32 %v10069_v60, %v4864_v11  ;;  %v8439_v30 = vpop.f32.mrb[58].mxu1  ;;  %8512 = vmatprep.mubr.bf16.mxu0 %v4985_v7 }
 0x99d   : > { %v4876_v13 = vadd.f32 %v8439_v30, %v10069_v60  ;;  %v4867_v15 = vpop.f32.mrb[59].mxu1  ;;  %8513 = vmatmul.mubr.bf16.gmra.mrb[116].mxu0 %v4986_v6  ;;  %v4953_v17 = vmax.f32 %v4873_v9, 0.0 }
 0x99e   : > { %v4868_v33 = vadd.f32 %v10069_v60, %v4867_v15  ;;  %v4951_v18 = vmax.f32 %v4865_v12, 0.0 }
 0x99f   : > { %v4954_v54 = vmax.f32 %v4876_v13, 0.0 }
 0x9a0   : > { %v4952_v19 = vmax.f32 %v4868_v33, 0.0 }
 0x9a1   : > { %v4988_v20 = vpack.c.bf16 %v4954_v54, %v4953_v17 }
 0x9a2   : > { %v4987_v21 = vpack.c.bf16 %v4952_v19, %v4951_v18  ;;  %v8442_v22 = vpop.f32.mrb[60].mxu1 }
 0x9a3   : > { %v4889_v23 = vadd.f32 %v8442_v22, %v10069_v60  ;;  %v4880_v24 = vpop.f32.mrb[61].mxu1 }
 0x9a4   : > { %v4881_v25 = vadd.f32 %v10069_v60, %v4880_v24  ;;  %v8443_v26 = vpop.f32.mrb[62].mxu1  ;;  %8516 = vmatprep.mubr.bf16.mxu0 %v4987_v21 }
 0x9a5   : > { %v4892_v27 = vadd.f32 %v8443_v26, %v10069_v60  ;;  %v4883_v28 = vpop.f32.mrb[63].mxu1  ;;  %8517 = vmatmul.mubr.bf16.gmra.mrb[120].mxu0 %v4988_v20  ;;  %v4957_v31 = vmax.f32 %v4889_v23, 0.0 }
 0x9a6   : > { %v4884_v29 = vadd.f32 %v10069_v60, %v4883_v28  ;;  %v4955_v50 = vmax.f32 %v4881_v25, 0.0 }
 0x9a7   : > { %v4958_v32 = vmax.f32 %v4892_v27, 0.0 }
 0x9a8   : > { %v4956_v34 = vmax.f32 %v4884_v29, 0.0 }
 0x9a9   : > { %v4990_v35 = vpack.c.bf16 %v4958_v32, %v4957_v31 }
 0x9aa   : > { %v4989_v36 = vpack.c.bf16 %v4956_v34, %v4955_v50 }
 0x9ac   : > { %8520 = vmatprep.mubr.bf16.mxu0 %v4989_v36 }
 0x9ad   : > { %8521 = vmatmul.mubr.bf16.gmra.mrb[124].mxu0 %v4990_v35 }
 0xa08   : > { %v8462_v10 = vpop.f32.mrb[64].mxu0 }
 0xa09   : > { %v5107_v38 = vadd.f32 %v8462_v10, %v10135_v37  ;;  %v5098_v39 = vpop.f32.mrb[65].mxu0 }
 0xa0a   : > { %v5099_v40 = vadd.f32 %v10135_v37, %v5098_v39  ;;  %v8463_v41 = vpop.f32.mrb[66].mxu0 }
 0xa0b   : > { %v5110_v42 = vadd.f32 %v8463_v41, %v10135_v37  ;;  %v5101_v60 = vpop.f32.mrb[67].mxu0  ;;  %v5355_v44 = vmax.f32 %v5107_v38, 0.0 }
 0xa0c   : > { %v5102_v43 = vadd.f32 %v10135_v37, %v5101_v60  ;;  %v5353_v46 = vmax.f32 %v5099_v40, 0.0 }
 0xa0d   : > { %v5356_v45 = vmax.f32 %v5110_v42, 0.0 }
 0xa0e   : > { %v5354_v47 = vmax.f32 %v5102_v43, 0.0 }
 0xa0f   : > { %v5418_v48 = vpack.c.bf16 %v5356_v45, %v5355_v44 }
 0xa10   : > { %v5417_v49 = vpack.c.bf16 %v5354_v47, %v5353_v46  ;;  %v8466_v51 = vpop.f32.mrb[68].mxu0 }
 0xa11   : > { %v5123_v52 = vadd.f32 %v8466_v51, %v10135_v37  ;;  %v5114_v53 = vpop.f32.mrb[69].mxu0 }
 0xa12   : > { %v5115_v55 = vadd.f32 %v10135_v37, %v5114_v53  ;;  %v8467_v56 = vpop.f32.mrb[70].mxu0  ;;  %8540 = vmatprep.mubr.bf16.mxu1 %v5417_v49 }
 0xa13   : > { %v5126_v57 = vadd.f32 %v8467_v56, %v10135_v37  ;;  %v5117_v58 = vpop.f32.mrb[71].mxu0  ;;  %8541 = vmatmul.mubr.bf16.vlgmr.msra.gmra.mrb[64].mxu1 %v5418_v48  ;;  %v5359_v61 = vmax.f32 %v5123_v52, 0.0 }
 0xa14   : > { %v5118_v59 = vadd.f32 %v10135_v37, %v5117_v58  ;;  %v5357_v16 = vmax.f32 %v5115_v55, 0.0 }
 0xa15   : > { %v5360_v14 = vmax.f32 %v5126_v57, 0.0 }
 0xa16   : > { %v5358_v62 = vmax.f32 %v5118_v59, 0.0 }
 0xa17   : > { %v5420_v63 = vpack.c.bf16 %v5360_v14, %v5359_v61 }
 0xa18   : > { %v5419_v0 = vpack.c.bf16 %v5358_v62, %v5357_v16  ;;  %v8470_v1 = vpop.f32.mrb[72].mxu0 }
 0xa19   : > { %v5139_v2 = vadd.f32 %v8470_v1, %v10135_v37  ;;  %v5130_v3 = vpop.f32.mrb[73].mxu0 }
 0xa1a   : > { %v5131_v4 = vadd.f32 %v10135_v37, %v5130_v3  ;;  %v8471_v5 = vpop.f32.mrb[74].mxu0  ;;  %8544 = vmatprep.mubr.bf16.mxu1 %v5419_v0 }
 0xa1b   : > { %v5142_v6 = vadd.f32 %v8471_v5, %v10135_v37  ;;  %v5133_v7 = vpop.f32.mrb[75].mxu0  ;;  %8545 = vmatmul.mubr.bf16.gmra.mrb[68].mxu1 %v5420_v63  ;;  %v5363_v9 = vmax.f32 %v5139_v2, 0.0 }
 0xa1c   : > { %v5134_v8 = vadd.f32 %v10135_v37, %v5133_v7  ;;  %v5361_v12 = vmax.f32 %v5131_v4, 0.0 }
 0xa1d   : > { %v5364_v11 = vmax.f32 %v5142_v6, 0.0 }
 0xa1e   : > { %v5362_v30 = vmax.f32 %v5134_v8, 0.0 }
 0xa1f   : > { %v5422_v13 = vpack.c.bf16 %v5364_v11, %v5363_v9 }
 0xa20   : > { %v5421_v15 = vpack.c.bf16 %v5362_v30, %v5361_v12  ;;  %v8474_v33 = vpop.f32.mrb[76].mxu0 }
 0xa21   : > { %v5155_v17 = vadd.f32 %v8474_v33, %v10135_v37  ;;  %v5146_v54 = vpop.f32.mrb[77].mxu0 }
 0xa22   : > { %v5147_v18 = vadd.f32 %v10135_v37, %v5146_v54  ;;  %v8475_v19 = vpop.f32.mrb[78].mxu0  ;;  %8548 = vmatprep.mubr.bf16.mxu1 %v5421_v15 }
 0xa23   : > { %v5158_v20 = vadd.f32 %v8475_v19, %v10135_v37  ;;  %v5149_v21 = vpop.f32.mrb[79].mxu0  ;;  %8549 = vmatmul.mubr.bf16.gmra.mrb[72].mxu1 %v5422_v13  ;;  %v5367_v23 = vmax.f32 %v5155_v17, 0.0 }
 0xa24   : > { %v5150_v22 = vadd.f32 %v10135_v37, %v5149_v21  ;;  %v5365_v25 = vmax.f32 %v5147_v18, 0.0 }
 0xa25   : > { %v5368_v24 = vmax.f32 %v5158_v20, 0.0 }
 0xa26   : > { %v5366_v26 = vmax.f32 %v5150_v22, 0.0 }
 0xa27   : > { %v5424_v27 = vpack.c.bf16 %v5368_v24, %v5367_v23 }
 0xa28   : > { %v5423_v28 = vpack.c.bf16 %v5366_v26, %v5365_v25  ;;  %v8478_v29 = vpop.f32.mrb[80].mxu0 }
 0xa29   : > { %v5171_v31 = vadd.f32 %v8478_v29, %v10135_v37  ;;  %v5162_v32 = vpop.f32.mrb[81].mxu0 }
 0xa2a   : > { %v5163_v50 = vadd.f32 %v10135_v37, %v5162_v32  ;;  %v8479_v34 = vpop.f32.mrb[82].mxu0  ;;  %8552 = vmatprep.mubr.bf16.mxu1 %v5423_v28 }
 0xa2b   : > { %v5174_v35 = vadd.f32 %v8479_v34, %v10135_v37  ;;  %v5165_v36 = vpop.f32.mrb[83].mxu0  ;;  %8553 = vmatmul.mubr.bf16.gmra.mrb[76].mxu1 %v5424_v27  ;;  %v5371_v38 = vmax.f32 %v5171_v31, 0.0 }
 0xa2c   : > { %v5166_v10 = vadd.f32 %v10135_v37, %v5165_v36  ;;  %v5369_v40 = vmax.f32 %v5163_v50, 0.0 }
 0xa2d   : > { %v5372_v39 = vmax.f32 %v5174_v35, 0.0 }
 0xa2e   : > { %v5370_v41 = vmax.f32 %v5166_v10, 0.0 }
 0xa2f   : > { %v5426_v42 = vpack.c.bf16 %v5372_v39, %v5371_v38 }
 0xa30   : > { %v5425_v60 = vpack.c.bf16 %v5370_v41, %v5369_v40  ;;  %v8482_v43 = vpop.f32.mrb[84].mxu0 }
 0xa31   : > { %v5187_v44 = vadd.f32 %v8482_v43, %v10135_v37  ;;  %v5178_v45 = vpop.f32.mrb[85].mxu0 }
 0xa32   : > { %v5179_v46 = vadd.f32 %v10135_v37, %v5178_v45  ;;  %v8483_v47 = vpop.f32.mrb[86].mxu0  ;;  %8556 = vmatprep.mubr.bf16.mxu1 %v5425_v60 }
 0xa33   : > { %v5190_v48 = vadd.f32 %v8483_v47, %v10135_v37  ;;  %v5181_v49 = vpop.f32.mrb[87].mxu0  ;;  %8557 = vmatmul.mubr.bf16.gmra.mrb[80].mxu1 %v5426_v42  ;;  %v5375_v52 = vmax.f32 %v5187_v44, 0.0 }
 0xa34   : > { %v5182_v51 = vadd.f32 %v10135_v37, %v5181_v49  ;;  %v5373_v55 = vmax.f32 %v5179_v46, 0.0 }
 0xa35   : > { %v5376_v53 = vmax.f32 %v5190_v48, 0.0 }
 0xa36   : > { %v5374_v56 = vmax.f32 %v5182_v51, 0.0 }
 0xa37   : > { %v5428_v57 = vpack.c.bf16 %v5376_v53, %v5375_v52 }
 0xa38   : > { %v5427_v58 = vpack.c.bf16 %v5374_v56, %v5373_v55  ;;  %v8486_v59 = vpop.f32.mrb[88].mxu0 }
 0xa39   : > { %v5203_v61 = vadd.f32 %v8486_v59, %v10135_v37  ;;  %v5194_v14 = vpop.f32.mrb[89].mxu0 }
 0xa3a   : > { %v5195_v16 = vadd.f32 %v10135_v37, %v5194_v14  ;;  %v8487_v62 = vpop.f32.mrb[90].mxu0  ;;  %8560 = vmatprep.mubr.bf16.mxu1 %v5427_v58 }
 0xa3b   : > { %v5206_v63 = vadd.f32 %v8487_v62, %v10135_v37  ;;  %v5197_v0 = vpop.f32.mrb[91].mxu0  ;;  %8561 = vmatmul.mubr.bf16.gmra.mrb[84].mxu1 %v5428_v57  ;;  %v5379_v2 = vmax.f32 %v5203_v61, 0.0 }
 0xa3c   : > { %v5198_v1 = vadd.f32 %v10135_v37, %v5197_v0  ;;  %v5377_v4 = vmax.f32 %v5195_v16, 0.0 }
 0xa3d   : > { %v5380_v3 = vmax.f32 %v5206_v63, 0.0 }
 0xa3e   : > { %v5378_v5 = vmax.f32 %v5198_v1, 0.0 }
 0xa3f   : > { %v5430_v6 = vpack.c.bf16 %v5380_v3, %v5379_v2 }
 0xa40   : > { %v5429_v7 = vpack.c.bf16 %v5378_v5, %v5377_v4  ;;  %v8490_v8 = vpop.f32.mrb[92].mxu0 }
 0xa41   : > { %v5219_v9 = vadd.f32 %v8490_v8, %v10135_v37  ;;  %v5210_v11 = vpop.f32.mrb[93].mxu0 }
 0xa42   : > { %v5211_v12 = vadd.f32 %v10135_v37, %v5210_v11  ;;  %v8491_v30 = vpop.f32.mrb[94].mxu0  ;;  %8564 = vmatprep.mubr.bf16.mxu1 %v5429_v7 }
 0xa43   : > { %v5222_v13 = vadd.f32 %v8491_v30, %v10135_v37  ;;  %v5213_v15 = vpop.f32.mrb[95].mxu0  ;;  %8565 = vmatmul.mubr.bf16.gmra.mrb[88].mxu1 %v5430_v6  ;;  %v5383_v17 = vmax.f32 %v5219_v9, 0.0 }
 0xa44   : > { %v5214_v33 = vadd.f32 %v10135_v37, %v5213_v15  ;;  %v5381_v18 = vmax.f32 %v5211_v12, 0.0 }
 0xa45   : > { %v5384_v54 = vmax.f32 %v5222_v13, 0.0 }
 0xa46   : > { %v5382_v19 = vmax.f32 %v5214_v33, 0.0 }
 0xa47   : > { %v5432_v20 = vpack.c.bf16 %v5384_v54, %v5383_v17 }
 0xa48   : > { %v5431_v21 = vpack.c.bf16 %v5382_v19, %v5381_v18  ;;  %v8494_v22 = vpop.f32.mrb[96].mxu0 }
 0xa49   : > { %v5235_v23 = vadd.f32 %v8494_v22, %v10135_v37  ;;  %v5226_v24 = vpop.f32.mrb[97].mxu0 }
 0xa4a   : > { %v5227_v25 = vadd.f32 %v10135_v37, %v5226_v24  ;;  %v8495_v26 = vpop.f32.mrb[98].mxu0  ;;  %8568 = vmatprep.mubr.bf16.mxu1 %v5431_v21 }
 0xa4b   : > { %v5238_v27 = vadd.f32 %v8495_v26, %v10135_v37  ;;  %v5229_v28 = vpop.f32.mrb[99].mxu0  ;;  %8569 = vmatmul.mubr.bf16.gmra.mrb[92].mxu1 %v5432_v20  ;;  %v5387_v31 = vmax.f32 %v5235_v23, 0.0 }
 0xa4c   : > { %v5230_v29 = vadd.f32 %v10135_v37, %v5229_v28  ;;  %v5385_v50 = vmax.f32 %v5227_v25, 0.0 }
 0xa4d   : > { %v5388_v32 = vmax.f32 %v5238_v27, 0.0 }
 0xa4e   : > { %v5386_v34 = vmax.f32 %v5230_v29, 0.0 }
 0xa4f   : > { %v5434_v35 = vpack.c.bf16 %v5388_v32, %v5387_v31 }
 0xa50   : > { %v5433_v36 = vpack.c.bf16 %v5386_v34, %v5385_v50  ;;  %v8498_v10 = vpop.f32.mrb[100].mxu0 }
 0xa51   : > { %v5251_v38 = vadd.f32 %v8498_v10, %v10135_v37  ;;  %v5242_v39 = vpop.f32.mrb[101].mxu0 }
 0xa52   : > { %v5243_v40 = vadd.f32 %v10135_v37, %v5242_v39  ;;  %v8499_v41 = vpop.f32.mrb[102].mxu0  ;;  %8572 = vmatprep.mubr.bf16.mxu1 %v5433_v36 }
 0xa53   : > { %v5254_v42 = vadd.f32 %v8499_v41, %v10135_v37  ;;  %v5245_v60 = vpop.f32.mrb[103].mxu0  ;;  %8573 = vmatmul.mubr.bf16.gmra.mrb[96].mxu1 %v5434_v35  ;;  %v5391_v44 = vmax.f32 %v5251_v38, 0.0 }
 0xa54   : > { %v5246_v43 = vadd.f32 %v10135_v37, %v5245_v60  ;;  %v5389_v46 = vmax.f32 %v5243_v40, 0.0 }
 0xa55   : > { %v5392_v45 = vmax.f32 %v5254_v42, 0.0 }
 0xa56   : > { %v5390_v47 = vmax.f32 %v5246_v43, 0.0 }
 0xa57   : > { %v5436_v48 = vpack.c.bf16 %v5392_v45, %v5391_v44 }
 0xa58   : > { %v5435_v49 = vpack.c.bf16 %v5390_v47, %v5389_v46  ;;  %v8502_v51 = vpop.f32.mrb[104].mxu0 }
 0xa59   : > { %v5267_v52 = vadd.f32 %v8502_v51, %v10135_v37  ;;  %v5258_v53 = vpop.f32.mrb[105].mxu0 }
 0xa5a   : > { %v5259_v55 = vadd.f32 %v10135_v37, %v5258_v53  ;;  %v8503_v56 = vpop.f32.mrb[106].mxu0  ;;  %8576 = vmatprep.mubr.bf16.mxu1 %v5435_v49 }
 0xa5b   : > { %v5270_v57 = vadd.f32 %v8503_v56, %v10135_v37  ;;  %v5261_v58 = vpop.f32.mrb[107].mxu0  ;;  %8577 = vmatmul.mubr.bf16.gmra.mrb[100].mxu1 %v5436_v48  ;;  %v5395_v61 = vmax.f32 %v5267_v52, 0.0 }
 0xa5c   : > { %v5262_v59 = vadd.f32 %v10135_v37, %v5261_v58  ;;  %v5393_v16 = vmax.f32 %v5259_v55, 0.0 }
 0xa5d   : > { %v5396_v14 = vmax.f32 %v5270_v57, 0.0 }
 0xa5e   : > { %v5394_v62 = vmax.f32 %v5262_v59, 0.0 }
 0xa5f   : > { %v5438_v63 = vpack.c.bf16 %v5396_v14, %v5395_v61 }
 0xa60   : > { %v5437_v0 = vpack.c.bf16 %v5394_v62, %v5393_v16  ;;  %v8506_v1 = vpop.f32.mrb[108].mxu0 }
 0xa61   : > { %v5283_v2 = vadd.f32 %v8506_v1, %v10135_v37  ;;  %v5274_v3 = vpop.f32.mrb[109].mxu0 }
 0xa62   : > { %v5275_v4 = vadd.f32 %v10135_v37, %v5274_v3  ;;  %v8507_v5 = vpop.f32.mrb[110].mxu0  ;;  %8580 = vmatprep.mubr.bf16.mxu1 %v5437_v0 }
 0xa63   : > { %v5286_v6 = vadd.f32 %v8507_v5, %v10135_v37  ;;  %v5277_v7 = vpop.f32.mrb[111].mxu0  ;;  %8581 = vmatmul.mubr.bf16.gmra.mrb[104].mxu1 %v5438_v63  ;;  %v5399_v9 = vmax.f32 %v5283_v2, 0.0 }
 0xa64   : > { %v5278_v8 = vadd.f32 %v10135_v37, %v5277_v7  ;;  %v5397_v12 = vmax.f32 %v5275_v4, 0.0 }
 0xa65   : > { %v5400_v11 = vmax.f32 %v5286_v6, 0.0 }
 0xa66   : > { %v5398_v30 = vmax.f32 %v5278_v8, 0.0  ;;  %v10201_v8 = vld [vmem:[#allocation7 + $0xb] ss:$0 sm:$0xff] }
 0xa67   : > { %v5440_v13 = vpack.c.bf16 %v5400_v11, %v5399_v9 }
 0xa68   : > { %v5439_v15 = vpack.c.bf16 %v5398_v30, %v5397_v12  ;;  %v8510_v33 = vpop.f32.mrb[112].mxu0 }
 0xa69   : > { %v5299_v17 = vadd.f32 %v8510_v33, %v10135_v37  ;;  %v5290_v54 = vpop.f32.mrb[113].mxu0 }
 0xa6a   : > { %v5291_v18 = vadd.f32 %v10135_v37, %v5290_v54  ;;  %v8511_v19 = vpop.f32.mrb[114].mxu0  ;;  %8584 = vmatprep.mubr.bf16.mxu1 %v5439_v15 }
 0xa6b   : > { %v5302_v20 = vadd.f32 %v8511_v19, %v10135_v37  ;;  %v5293_v21 = vpop.f32.mrb[115].mxu0  ;;  %8585 = vmatmul.mubr.bf16.gmra.mrb[108].mxu1 %v5440_v13  ;;  %v5403_v23 = vmax.f32 %v5299_v17, 0.0 }
 0xa6c   : > { %v5294_v22 = vadd.f32 %v10135_v37, %v5293_v21  ;;  %v5401_v25 = vmax.f32 %v5291_v18, 0.0 }
 0xa6d   : > { %v5404_v24 = vmax.f32 %v5302_v20, 0.0 }
 0xa6e   : > { %v5402_v26 = vmax.f32 %v5294_v22, 0.0 }
 0xa6f   : > { %v5442_v27 = vpack.c.bf16 %v5404_v24, %v5403_v23 }
 0xa70   : > { %v5441_v28 = vpack.c.bf16 %v5402_v26, %v5401_v25  ;;  %v8514_v29 = vpop.f32.mrb[116].mxu0 }
 0xa71   : > { %v5315_v31 = vadd.f32 %v8514_v29, %v10135_v37  ;;  %v5306_v32 = vpop.f32.mrb[117].mxu0 }
 0xa72   : > { %v5307_v50 = vadd.f32 %v10135_v37, %v5306_v32  ;;  %v8515_v34 = vpop.f32.mrb[118].mxu0  ;;  %8588 = vmatprep.mubr.bf16.mxu1 %v5441_v28 }
 0xa73   : > { %v5318_v35 = vadd.f32 %v8515_v34, %v10135_v37  ;;  %v5309_v36 = vpop.f32.mrb[119].mxu0  ;;  %8589 = vmatmul.mubr.bf16.gmra.mrb[112].mxu1 %v5442_v27  ;;  %v5407_v38 = vmax.f32 %v5315_v31, 0.0 }
 0xa74   : > { %v5310_v10 = vadd.f32 %v10135_v37, %v5309_v36  ;;  %v5405_v40 = vmax.f32 %v5307_v50, 0.0 }
 0xa75   : > { %v5408_v39 = vmax.f32 %v5318_v35, 0.0 }
 0xa76   : > { %v5406_v41 = vmax.f32 %v5310_v10, 0.0 }
 0xa77   : > { %v5444_v42 = vpack.c.bf16 %v5408_v39, %v5407_v38 }
 0xa78   : > { %v5443_v60 = vpack.c.bf16 %v5406_v41, %v5405_v40  ;;  %v8518_v43 = vpop.f32.mrb[120].mxu0 }
 0xa79   : > { %v5331_v44 = vadd.f32 %v8518_v43, %v10135_v37  ;;  %v5322_v45 = vpop.f32.mrb[121].mxu0 }
 0xa7a   : > { %v5323_v46 = vadd.f32 %v10135_v37, %v5322_v45  ;;  %v8519_v47 = vpop.f32.mrb[122].mxu0  ;;  %8592 = vmatprep.mubr.bf16.mxu1 %v5443_v60 }
 0xa7b   : > { %v5334_v48 = vadd.f32 %v8519_v47, %v10135_v37  ;;  %v5325_v49 = vpop.f32.mrb[123].mxu0  ;;  %8593 = vmatmul.mubr.bf16.gmra.mrb[116].mxu1 %v5444_v42  ;;  %v5411_v52 = vmax.f32 %v5331_v44, 0.0 }
 0xa7c   : > { %v5326_v51 = vadd.f32 %v10135_v37, %v5325_v49  ;;  %v5409_v55 = vmax.f32 %v5323_v46, 0.0 }
 0xa7d   : > { %v5412_v53 = vmax.f32 %v5334_v48, 0.0 }
 0xa7e   : > { %v5410_v56 = vmax.f32 %v5326_v51, 0.0 }
 0xa7f   : > { %v5446_v57 = vpack.c.bf16 %v5412_v53, %v5411_v52 }
 0xa80   : > { %v5445_v58 = vpack.c.bf16 %v5410_v56, %v5409_v55  ;;  %v8522_v59 = vpop.f32.mrb[124].mxu0 }
 0xa81   : > { %v5347_v61 = vadd.f32 %v8522_v59, %v10135_v37  ;;  %v5338_v14 = vpop.f32.mrb[125].mxu0 }
 0xa82   : > { %v5339_v16 = vadd.f32 %v10135_v37, %v5338_v14  ;;  %v8523_v62 = vpop.f32.mrb[126].mxu0  ;;  %8596 = vmatprep.mubr.bf16.mxu1 %v5445_v58 }
 0xa83   : > { %v5350_v63 = vadd.f32 %v8523_v62, %v10135_v37  ;;  %v5341_v0 = vpop.f32.mrb[127].mxu0  ;;  %8597 = vmatmul.mubr.bf16.gmra.mrb[120].mxu1 %v5446_v57  ;;  %v5415_v2 = vmax.f32 %v5347_v61, 0.0 }
 0xa84   : > { %v5342_v1 = vadd.f32 %v10135_v37, %v5341_v0  ;;  %v5413_v4 = vmax.f32 %v5339_v16, 0.0 }
 0xa85   : > { %v5416_v3 = vmax.f32 %v5350_v63, 0.0 }
 0xa86   : > { %v5414_v5 = vmax.f32 %v5342_v1, 0.0 }
 0xa87   : > { %v5448_v6 = vpack.c.bf16 %v5416_v3, %v5415_v2 }
 0xa88   : > { %v5447_v7 = vpack.c.bf16 %v5414_v5, %v5413_v4 }
 0xa8a   : > { %8600 = vmatprep.mubr.bf16.mxu1 %v5447_v7 }
 0xa8b   : > { %8601 = vmatmul.mubr.bf16.gmra.mrb[124].mxu1 %v5448_v6 }
 0xae6   : > { %v8542_v9 = vpop.f32.mrb[64].mxu1 }
 0xae7   : > { %v5565_v11 = vadd.f32 %v8542_v9, %v10201_v8  ;;  %v5556_v12 = vpop.f32.mrb[65].mxu1 }
 0xae8   : > { %v5557_v30 = vadd.f32 %v10201_v8, %v5556_v12  ;;  %v8543_v13 = vpop.f32.mrb[66].mxu1 }
 0xae9   : > { %v6776_v15 = vmul.f32 -1.442695, %v5565_v11  ;;  %v5568_v37 = vadd.f32 %v8543_v13, %v10201_v8  ;;  %v5559_v33 = vpop.f32.mrb[67].mxu1 }
 0xaea   : > { %v6774_v17 = vmul.f32 -1.442695, %v5557_v30  ;;  %v5560_v54 = vadd.f32 %v10201_v8, %v5559_v33 }
 0xaeb   : > { %8805 = vpow2.f32 %v6776_v15  ;;  %v6777_v18 = vmul.f32 -1.442695, %v5568_v37 }
 0xaec   : > { %8807 = vpow2.f32 %v6774_v17  ;;  %v6775_v19 = vmul.f32 -1.442695, %v5560_v54 }
 0xaed   : > { %8809 = vpow2.f32 %v6777_v18 }
 0xaee   : > { %8811 = vpow2.f32 %v6775_v19  ;;  %v8546_v20 = vpop.f32.mrb[68].mxu1 }
 0xaef   : > { %v5581_v21 = vadd.f32 %v8546_v20, %v10201_v8  ;;  %v5572_v22 = vpop.f32.mrb[69].mxu1 }
 0xaf0   : > { %v5573_v23 = vadd.f32 %v10201_v8, %v5572_v22  ;;  %v8547_v24 = vpop.f32.mrb[70].mxu1 }
 0xaf1   : > { %v6780_v25 = vmul.f32 -1.442695, %v5581_v21  ;;  %v5584_v26 = vadd.f32 %v8547_v24, %v10201_v8  ;;  %v5575_v27 = vpop.f32.mrb[71].mxu1 }
 0xaf2   : > { %v6778_v28 = vmul.f32 -1.442695, %v5573_v23  ;;  %v5576_v29 = vadd.f32 %v10201_v8, %v5575_v27 }
 0xaf3   : > { %8813 = vpow2.f32 %v6780_v25  ;;  %v6781_v31 = vmul.f32 -1.442695, %v5584_v26 }
 0xaf4   : > { %8815 = vpow2.f32 %v6778_v28  ;;  %v6779_v32 = vmul.f32 -1.442695, %v5576_v29 }
 0xaf5   : > { %v8806_v50 = vpop.eup %8805  ;;  %8817 = vpow2.f32 %v6781_v31 }
 0xaf6   : > { %v8808_v34 = vpop.eup %8807  ;;  %v6005_v35 = vadd.f32 1.0, %v8806_v50  ;;  %8819 = vpow2.f32 %v6779_v32  ;;  %v8550_v36 = vpop.f32.mrb[72].mxu1 }
 0xaf7   : > { %v8810_v10 = vpop.eup %8809  ;;  %v6003_v38 = vadd.f32 1.0, %v8808_v34  ;;  %v5597_v39 = vadd.f32 %v8550_v36, %v10201_v8  ;;  %v5588_v40 = vpop.f32.mrb[73].mxu1 }
 0xaf8   : > { %v8812_v41 = vpop.eup %8811  ;;  %8821 = vrcp.f32 %v6005_v35  ;;  %v6006_v42 = vadd.f32 1.0, %v8810_v10  ;;  %v5589_v60 = vadd.f32 %v10201_v8, %v5588_v40  ;;  %v8551_v43 = vpop.f32.mrb[74].mxu1 }
 0xaf9   : > { %8823 = vrcp.f32 %v6003_v38  ;;  %v6004_v44 = vadd.f32 1.0, %v8812_v41  ;;  %v6784_v45 = vmul.f32 -1.442695, %v5597_v39  ;;  %v5600_v46 = vadd.f32 %v8551_v43, %v10201_v8  ;;  %v5591_v47 = vpop.f32.mrb[75].mxu1 }
 0xafa   : > { %8825 = vrcp.f32 %v6006_v42  ;;  %v6782_v48 = vmul.f32 -1.442695, %v5589_v60  ;;  %v5592_v49 = vadd.f32 %v10201_v8, %v5591_v47 }
 0xafb   : > { %8827 = vrcp.f32 %v6004_v44  ;;  %v6785_v51 = vmul.f32 -1.442695, %v5600_v46 }
 0xafc   : > { %8829 = vpow2.f32 %v6784_v45  ;;  %v6783_v52 = vmul.f32 -1.442695, %v5592_v49 }
 0xafd   : > { %v8814_v53 = vpop.eup %8813  ;;  %8831 = vpow2.f32 %v6782_v48 }
 0xafe   : > { %v8816_v55 = vpop.eup %8815  ;;  %v6009_v56 = vadd.f32 1.0, %v8814_v53  ;;  %8833 = vpow2.f32 %v6785_v51  ;;  %v8554_v57 = vpop.f32.mrb[76].mxu1 }
 0xaff   : > { %v8818_v58 = vpop.eup %8817  ;;  %v6007_v59 = vadd.f32 1.0, %v8816_v55  ;;  %8835 = vpow2.f32 %v6783_v52  ;;  %v5613_v61 = vadd.f32 %v8554_v57, %v10201_v8  ;;  %v5604_v14 = vpop.f32.mrb[77].mxu1 }
 0xb00   : > { %v8820_v16 = vpop.eup %8819  ;;  %8837 = vrcp.f32 %v6009_v56  ;;  %v6010_v62 = vadd.f32 1.0, %v8818_v58  ;;  %v5605_v63 = vadd.f32 %v10201_v8, %v5604_v14  ;;  %v8555_v0 = vpop.f32.mrb[78].mxu1 }
 0xb01   : > { %8839 = vrcp.f32 %v6007_v59  ;;  %v6008_v1 = vadd.f32 1.0, %v8820_v16  ;;  %v6788_v2 = vmul.f32 -1.442695, %v5613_v61  ;;  %v5616_v3 = vadd.f32 %v8555_v0, %v10201_v8  ;;  %v5607_v4 = vpop.f32.mrb[79].mxu1 }
 0xb02   : > { %v8822_v5 = vpop.eup %8821  ;;  %8841 = vrcp.f32 %v6010_v62  ;;  %v6786_v6 = vmul.f32 -1.442695, %v5605_v63  ;;  %v5608_v7 = vadd.f32 %v10201_v8, %v5607_v4 }
 0xb03   : > { %v8824_v9 = vpop.eup %8823  ;;  %8843 = vrcp.f32 %v6008_v1  ;;  %v6789_v11 = vmul.f32 -1.442695, %v5616_v3 }
 0xb04   : > { %v8826_v12 = vpop.eup %8825  ;;  %8845 = vpow2.f32 %v6788_v2  ;;  %v6787_v30 = vmul.f32 -1.442695, %v5608_v7 }
 0xb05   : > { %v8828_v13 = vpop.eup %8827  ;;  %v6981_v15 = vpack.c.bf16 %v8826_v12, %v8822_v5  ;;  %8847 = vpow2.f32 %v6786_v6 }
 0xb06   : > { %v8830_v37 = vpop.eup %8829  ;;  %v6976_v33 = vpack.c.bf16 %v8828_v13, %v8824_v9  ;;  %8849 = vpow2.f32 %v6789_v11  ;;  %v8558_v17 = vpop.f32.mrb[80].mxu1 }
 0xb07   : > { %v8832_v54 = vpop.eup %8831  ;;  %7133 = vst [vmem:[%s10221_s18 + $0x8] sm:$0xff] %v6981_v15   ;;  %v6013_v18 = vadd.f32 1.0, %v8830_v37  ;;  %8851 = vpow2.f32 %v6787_v30  ;;  %v5629_v19 = vadd.f32 %v8558_v17, %v10201_v8  ;;  %v5620_v20 = vpop.f32.mrb[81].mxu1 }
 0xb08   : > { %v8834_v21 = vpop.eup %8833  ;;  %6977 = vst [vmem:[%s10221_s18] sm:$0xff] %v6976_v33   ;;  %v6011_v22 = vadd.f32 1.0, %v8832_v54  ;;  %v5621_v23 = vadd.f32 %v10201_v8, %v5620_v20  ;;  %v8559_v24 = vpop.f32.mrb[82].mxu1 }
 0xb09   : > { %v8836_v25 = vpop.eup %8835  ;;  %8853 = vrcp.f32 %v6013_v18  ;;  %v6014_v26 = vadd.f32 1.0, %v8834_v21  ;;  %v6792_v27 = vmul.f32 -1.442695, %v5629_v19  ;;  %v5632_v28 = vadd.f32 %v8559_v24, %v10201_v8  ;;  %v5623_v29 = vpop.f32.mrb[83].mxu1 }
 0xb0a   : > { %v8838_v31 = vpop.eup %8837  ;;  %8855 = vrcp.f32 %v6011_v22  ;;  %v6012_v32 = vadd.f32 1.0, %v8836_v25  ;;  %v6790_v50 = vmul.f32 -1.442695, %v5621_v23  ;;  %v5624_v34 = vadd.f32 %v10201_v8, %v5623_v29 }
 0xb0b   : > { %v8840_v35 = vpop.eup %8839  ;;  %8857 = vrcp.f32 %v6014_v26  ;;  %v6793_v36 = vmul.f32 -1.442695, %v5632_v28 }
 0xb0c   : > { %v8842_v10 = vpop.eup %8841  ;;  %8859 = vrcp.f32 %v6012_v32  ;;  %v6791_v38 = vmul.f32 -1.442695, %v5624_v34 }
 0xb0d   : > { %v8844_v39 = vpop.eup %8843  ;;  %v6991_v40 = vpack.c.bf16 %v8842_v10, %v8838_v31  ;;  %8861 = vpow2.f32 %v6792_v27 }
 0xb0e   : > { %v8846_v41 = vpop.eup %8845  ;;  %v6986_v42 = vpack.c.bf16 %v8844_v39, %v8840_v35  ;;  %8863 = vpow2.f32 %v6790_v50  ;;  %v8562_v60 = vpop.f32.mrb[84].mxu1 }
 0xb0f   : > { %v8848_v43 = vpop.eup %8847  ;;  %7135 = vst [vmem:[%s10221_s18 + $0x18] sm:$0xff] %v6991_v40   ;;  %v6017_v44 = vadd.f32 1.0, %v8846_v41  ;;  %8865 = vpow2.f32 %v6793_v36  ;;  %v5645_v45 = vadd.f32 %v8562_v60, %v10201_v8  ;;  %v5636_v46 = vpop.f32.mrb[85].mxu1 }
 0xb10   : > { %v8850_v47 = vpop.eup %8849  ;;  %7134 = vst [vmem:[%s10221_s18 + $0x10] sm:$0xff] %v6986_v42   ;;  %v6015_v48 = vadd.f32 1.0, %v8848_v43  ;;  %8867 = vpow2.f32 %v6791_v38  ;;  %v5637_v49 = vadd.f32 %v10201_v8, %v5636_v46  ;;  %v8563_v51 = vpop.f32.mrb[86].mxu1 }
 0xb11   : > { %v8852_v52 = vpop.eup %8851  ;;  %8869 = vrcp.f32 %v6017_v44  ;;  %v6018_v53 = vadd.f32 1.0, %v8850_v47  ;;  %v6796_v55 = vmul.f32 -1.442695, %v5645_v45  ;;  %v5648_v56 = vadd.f32 %v8563_v51, %v10201_v8  ;;  %v5639_v57 = vpop.f32.mrb[87].mxu1 }
 0xb12   : > { %8871 = vrcp.f32 %v6015_v48  ;;  %v6016_v58 = vadd.f32 1.0, %v8852_v52  ;;  %v6794_v59 = vmul.f32 -1.442695, %v5637_v49  ;;  %v5640_v61 = vadd.f32 %v10201_v8, %v5639_v57 }
 0xb13   : > { %v8854_v14 = vpop.eup %8853  ;;  %8873 = vrcp.f32 %v6018_v53  ;;  %v6797_v16 = vmul.f32 -1.442695, %v5648_v56 }
 0xb14   : > { %v8856_v62 = vpop.eup %8855  ;;  %8875 = vrcp.f32 %v6016_v58  ;;  %v6795_v63 = vmul.f32 -1.442695, %v5640_v61 }
 0xb15   : > { %v8858_v0 = vpop.eup %8857  ;;  %8877 = vpow2.f32 %v6796_v55 }
 0xb16   : > { %v8860_v1 = vpop.eup %8859  ;;  %v7001_v2 = vpack.c.bf16 %v8858_v0, %v8854_v14  ;;  %8879 = vpow2.f32 %v6794_v59  ;;  %v8566_v3 = vpop.f32.mrb[88].mxu1 }
 0xb17   : > { %v8862_v4 = vpop.eup %8861  ;;  %v6996_v5 = vpack.c.bf16 %v8860_v1, %v8856_v62  ;;  %8881 = vpow2.f32 %v6797_v16  ;;  %v5661_v6 = vadd.f32 %v8566_v3, %v10201_v8  ;;  %v5652_v7 = vpop.f32.mrb[89].mxu1 }
 0xb18   : > { %v8864_v9 = vpop.eup %8863  ;;  %7137 = vst [vmem:[%s10221_s18 + $0x28] sm:$0xff] %v7001_v2   ;;  %v6021_v11 = vadd.f32 1.0, %v8862_v4  ;;  %8883 = vpow2.f32 %v6795_v63  ;;  %v5653_v12 = vadd.f32 %v10201_v8, %v5652_v7  ;;  %v8567_v30 = vpop.f32.mrb[90].mxu1 }
 0xb19   : > { %v8866_v13 = vpop.eup %8865  ;;  %7136 = vst [vmem:[%s10221_s18 + $0x20] sm:$0xff] %v6996_v5   ;;  %v6019_v15 = vadd.f32 1.0, %v8864_v9  ;;  %v5664_v37 = vadd.f32 %v8567_v30, %v10201_v8  ;;  %v5655_v33 = vpop.f32.mrb[91].mxu1  ;;  %v6800_v18 = vmul.f32 -1.442695, %v5661_v6 }
 0xb1a   : > { %v8868_v17 = vpop.eup %8867  ;;  %8885 = vrcp.f32 %v6021_v11  ;;  %v6022_v54 = vadd.f32 1.0, %v8866_v13  ;;  %v5656_v19 = vadd.f32 %v10201_v8, %v5655_v33  ;;  %v6798_v22 = vmul.f32 -1.442695, %v5653_v12 }
 0xb1b   : > { %v8870_v20 = vpop.eup %8869  ;;  %8887 = vrcp.f32 %v6019_v15  ;;  %v6020_v21 = vadd.f32 1.0, %v8868_v17  ;;  %v6801_v24 = vmul.f32 -1.442695, %v5664_v37 }
 0xb1c   : > { %v8872_v23 = vpop.eup %8871  ;;  %8889 = vrcp.f32 %v6022_v54  ;;  %v6799_v26 = vmul.f32 -1.442695, %v5656_v19 }
 0xb1d   : > { %v8874_v25 = vpop.eup %8873  ;;  %8891 = vrcp.f32 %v6020_v21 }
 0xb1e   : > { %v8876_v27 = vpop.eup %8875  ;;  %v7011_v28 = vpack.c.bf16 %v8874_v25, %v8870_v20  ;;  %8893 = vpow2.f32 %v6800_v18  ;;  %v8570_v29 = vpop.f32.mrb[92].mxu1 }
 0xb1f   : > { %v8878_v31 = vpop.eup %8877  ;;  %v7006_v32 = vpack.c.bf16 %v8876_v27, %v8872_v23  ;;  %8895 = vpow2.f32 %v6798_v22  ;;  %v5677_v50 = vadd.f32 %v8570_v29, %v10201_v8  ;;  %v5668_v34 = vpop.f32.mrb[93].mxu1 }
 0xb20   : > { %v8880_v35 = vpop.eup %8879  ;;  %7139 = vst [vmem:[%s10221_s18 + $0x38] sm:$0xff] %v7011_v28   ;;  %v6025_v36 = vadd.f32 1.0, %v8878_v31  ;;  %8897 = vpow2.f32 %v6801_v24  ;;  %v5669_v10 = vadd.f32 %v10201_v8, %v5668_v34  ;;  %v8571_v38 = vpop.f32.mrb[94].mxu1 }
 0xb21   : > { %v8882_v39 = vpop.eup %8881  ;;  %7138 = vst [vmem:[%s10221_s18 + $0x30] sm:$0xff] %v7006_v32   ;;  %v6023_v40 = vadd.f32 1.0, %v8880_v35  ;;  %8899 = vpow2.f32 %v6799_v26  ;;  %v5680_v41 = vadd.f32 %v8571_v38, %v10201_v8  ;;  %v5671_v42 = vpop.f32.mrb[95].mxu1  ;;  %v6804_v44 = vmul.f32 -1.442695, %v5677_v50 }
 0xb22   : > { %v8884_v60 = vpop.eup %8883  ;;  %8901 = vrcp.f32 %v6025_v36  ;;  %v6026_v43 = vadd.f32 1.0, %v8882_v39  ;;  %v5672_v45 = vadd.f32 %v10201_v8, %v5671_v42  ;;  %v6802_v47 = vmul.f32 -1.442695, %v5669_v10 }
 0xb23   : > { %8903 = vrcp.f32 %v6023_v40  ;;  %v6024_v46 = vadd.f32 1.0, %v8884_v60  ;;  %v6805_v49 = vmul.f32 -1.442695, %v5680_v41 }
 0xb24   : > { %v8886_v48 = vpop.eup %8885  ;;  %8905 = vrcp.f32 %v6026_v43  ;;  %v6803_v52 = vmul.f32 -1.442695, %v5672_v45 }
 0xb25   : > { %v8888_v51 = vpop.eup %8887  ;;  %8907 = vrcp.f32 %v6024_v46 }
 0xb26   : > { %v8890_v53 = vpop.eup %8889  ;;  %8909 = vpow2.f32 %v6804_v44  ;;  %v8574_v55 = vpop.f32.mrb[96].mxu1 }
 0xb27   : > { %v8892_v56 = vpop.eup %8891  ;;  %v7021_v57 = vpack.c.bf16 %v8890_v53, %v8886_v48  ;;  %8911 = vpow2.f32 %v6802_v47  ;;  %v5693_v58 = vadd.f32 %v8574_v55, %v10201_v8  ;;  %v5684_v59 = vpop.f32.mrb[97].mxu1 }
 0xb28   : > { %v8894_v61 = vpop.eup %8893  ;;  %v7016_v14 = vpack.c.bf16 %v8892_v56, %v8888_v51  ;;  %8913 = vpow2.f32 %v6805_v49  ;;  %v5685_v16 = vadd.f32 %v10201_v8, %v5684_v59  ;;  %v8575_v62 = vpop.f32.mrb[98].mxu1 }
 0xb29   : > { %v8896_v63 = vpop.eup %8895  ;;  %7141 = vst [vmem:[%s10221_s18 + $0x48] sm:$0xff] %v7021_v57   ;;  %v6029_v0 = vadd.f32 1.0, %v8894_v61  ;;  %8915 = vpow2.f32 %v6803_v52  ;;  %v5696_v1 = vadd.f32 %v8575_v62, %v10201_v8  ;;  %v5687_v2 = vpop.f32.mrb[99].mxu1  ;;  %v6808_v9 = vmul.f32 -1.442695, %v5693_v58 }
 0xb2a   : > { %v8898_v3 = vpop.eup %8897  ;;  %7140 = vst [vmem:[%s10221_s18 + $0x40] sm:$0xff] %v7016_v14   ;;  %v6027_v4 = vadd.f32 1.0, %v8896_v63  ;;  %v5688_v5 = vadd.f32 %v10201_v8, %v5687_v2  ;;  %v6806_v30 = vmul.f32 -1.442695, %v5685_v16 }
 0xb2b   : > { %v8900_v6 = vpop.eup %8899  ;;  %8917 = vrcp.f32 %v6029_v0  ;;  %v6030_v7 = vadd.f32 1.0, %v8898_v3  ;;  %v6809_v15 = vmul.f32 -1.442695, %v5696_v1 }
 0xb2c   : > { %v8902_v11 = vpop.eup %8901  ;;  %8919 = vrcp.f32 %v6027_v4  ;;  %v6028_v12 = vadd.f32 1.0, %v8900_v6  ;;  %v6807_v33 = vmul.f32 -1.442695, %v5688_v5 }
 0xb2d   : > { %v8904_v13 = vpop.eup %8903  ;;  %8921 = vrcp.f32 %v6030_v7 }
 0xb2e   : > { %v8906_v37 = vpop.eup %8905  ;;  %8923 = vrcp.f32 %v6028_v12  ;;  %v8578_v17 = vpop.f32.mrb[100].mxu1 }
 0xb2f   : > { %v8908_v54 = vpop.eup %8907  ;;  %v7031_v18 = vpack.c.bf16 %v8906_v37, %v8902_v11  ;;  %8925 = vpow2.f32 %v6808_v9  ;;  %v5709_v19 = vadd.f32 %v8578_v17, %v10201_v8  ;;  %v5700_v20 = vpop.f32.mrb[101].mxu1 }
 0xb30   : > { %v8910_v21 = vpop.eup %8909  ;;  %v7026_v22 = vpack.c.bf16 %v8908_v54, %v8904_v13  ;;  %8927 = vpow2.f32 %v6806_v30  ;;  %v5701_v23 = vadd.f32 %v10201_v8, %v5700_v20  ;;  %v8579_v24 = vpop.f32.mrb[102].mxu1 }
 0xb31   : > { %v8912_v25 = vpop.eup %8911  ;;  %7143 = vst [vmem:[%s10221_s18 + $0x58] sm:$0xff] %v7031_v18   ;;  %v6033_v26 = vadd.f32 1.0, %v8910_v21  ;;  %8929 = vpow2.f32 %v6809_v15  ;;  %v5712_v27 = vadd.f32 %v8579_v24, %v10201_v8  ;;  %v5703_v28 = vpop.f32.mrb[103].mxu1  ;;  %v6812_v35 = vmul.f32 -1.442695, %v5709_v19 }
 0xb32   : > { %v8914_v29 = vpop.eup %8913  ;;  %7142 = vst [vmem:[%s10221_s18 + $0x50] sm:$0xff] %v7026_v22   ;;  %v6031_v31 = vadd.f32 1.0, %v8912_v25  ;;  %8931 = vpow2.f32 %v6807_v33  ;;  %v5704_v32 = vadd.f32 %v10201_v8, %v5703_v28  ;;  %v6810_v10 = vmul.f32 -1.442695, %v5701_v23 }
 0xb33   : > { %v8916_v50 = vpop.eup %8915  ;;  %8933 = vrcp.f32 %v6033_v26  ;;  %v6034_v34 = vadd.f32 1.0, %v8914_v29  ;;  %v6813_v39 = vmul.f32 -1.442695, %v5712_v27 }
 0xb34   : > { %8935 = vrcp.f32 %v6031_v31  ;;  %v6032_v36 = vadd.f32 1.0, %v8916_v50  ;;  %v6811_v41 = vmul.f32 -1.442695, %v5704_v32 }
 0xb35   : > { %v8918_v38 = vpop.eup %8917  ;;  %8937 = vrcp.f32 %v6034_v34 }
 0xb36   : > { %v8920_v40 = vpop.eup %8919  ;;  %8939 = vrcp.f32 %v6032_v36  ;;  %v8582_v42 = vpop.f32.mrb[104].mxu1 }
 0xb37   : > { %v8922_v60 = vpop.eup %8921  ;;  %8941 = vpow2.f32 %v6812_v35  ;;  %v5725_v43 = vadd.f32 %v8582_v42, %v10201_v8  ;;  %v5716_v44 = vpop.f32.mrb[105].mxu1 }
 0xb38   : > { %v8924_v45 = vpop.eup %8923  ;;  %v7041_v46 = vpack.c.bf16 %v8922_v60, %v8918_v38  ;;  %8943 = vpow2.f32 %v6810_v10  ;;  %v5717_v47 = vadd.f32 %v10201_v8, %v5716_v44  ;;  %v8583_v48 = vpop.f32.mrb[106].mxu1 }
 0xb39   : > { %v8926_v49 = vpop.eup %8925  ;;  %v7036_v51 = vpack.c.bf16 %v8924_v45, %v8920_v40  ;;  %8945 = vpow2.f32 %v6813_v39  ;;  %v6816_v52 = vmul.f32 -1.442695, %v5725_v43  ;;  %v5728_v53 = vadd.f32 %v8583_v48, %v10201_v8  ;;  %v5719_v55 = vpop.f32.mrb[107].mxu1 }
 0xb3a   : > { %v8928_v56 = vpop.eup %8927  ;;  %7145 = vst [vmem:[%s10221_s18 + $0x68] sm:$0xff] %v7041_v46   ;;  %v6037_v57 = vadd.f32 1.0, %v8926_v49  ;;  %8947 = vpow2.f32 %v6811_v41  ;;  %v5720_v58 = vadd.f32 %v10201_v8, %v5719_v55  ;;  %v6814_v62 = vmul.f32 -1.442695, %v5717_v47 }
 0xb3b   : > { %v8930_v59 = vpop.eup %8929  ;;  %7144 = vst [vmem:[%s10221_s18 + $0x60] sm:$0xff] %v7036_v51   ;;  %v6035_v61 = vadd.f32 1.0, %v8928_v56  ;;  %8949 = vpow2.f32 %v6816_v52  ;;  %v6817_v1 = vmul.f32 -1.442695, %v5728_v53 }
 0xb3c   : > { %v8932_v14 = vpop.eup %8931  ;;  %8951 = vrcp.f32 %v6037_v57  ;;  %v6038_v16 = vadd.f32 1.0, %v8930_v59  ;;  %v6815_v3 = vmul.f32 -1.442695, %v5720_v58 }
 0xb3d   : > { %v8934_v63 = vpop.eup %8933  ;;  %8953 = vrcp.f32 %v6035_v61  ;;  %v6036_v0 = vadd.f32 1.0, %v8932_v14 }
 0xb3e   : > { %v8936_v2 = vpop.eup %8935  ;;  %8955 = vrcp.f32 %v6038_v16  ;;  %v8586_v4 = vpop.f32.mrb[108].mxu1 }
 0xb3f   : > { %v8938_v5 = vpop.eup %8937  ;;  %8957 = vrcp.f32 %v6036_v0  ;;  %v5741_v6 = vadd.f32 %v8586_v4, %v10201_v8  ;;  %v5732_v7 = vpop.f32.mrb[109].mxu1 }
 0xb40   : > { %v8940_v9 = vpop.eup %8939  ;;  %v7051_v11 = vpack.c.bf16 %v8938_v5, %v8934_v63  ;;  %8959 = vpow2.f32 %v6814_v62  ;;  %v8587_v12 = vpop.f32.mrb[110].mxu1  ;;  %v5733_v37 = vadd.f32 %v10201_v8, %v5732_v7 }
 0xb41   : > { %v8942_v30 = vpop.eup %8941  ;;  %v7046_v13 = vpack.c.bf16 %v8940_v9, %v8936_v2  ;;  %8961 = vpow2.f32 %v6817_v1  ;;  %v6820_v15 = vmul.f32 -1.442695, %v5741_v6  ;;  %v5735_v33 = vpop.f32.mrb[111].mxu1  ;;  %v5744_v18 = vadd.f32 %v8587_v12, %v10201_v8 }
 0xb42   : > { %v8944_v17 = vpop.eup %8943  ;;  %7147 = vst [vmem:[%s10221_s18 + $0x78] sm:$0xff] %v7051_v11   ;;  %v6041_v54 = vadd.f32 1.0, %v8942_v30  ;;  %8963 = vpow2.f32 %v6815_v3  ;;  %v5736_v21 = vadd.f32 %v10201_v8, %v5735_v33  ;;  %v6818_v26 = vmul.f32 -1.442695, %v5733_v37 }
 0xb43   : > { %v8946_v19 = vpop.eup %8945  ;;  %7146 = vst [vmem:[%s10221_s18 + $0x70] sm:$0xff] %v7046_v13   ;;  %v6039_v20 = vadd.f32 1.0, %v8944_v17  ;;  %8965 = vpow2.f32 %v6820_v15  ;;  %v6821_v29 = vmul.f32 -1.442695, %v5744_v18 }
 0xb44   : > { %v8948_v22 = vpop.eup %8947  ;;  %8967 = vrcp.f32 %v6041_v54  ;;  %v6042_v23 = vadd.f32 1.0, %v8946_v19  ;;  %v6819_v50 = vmul.f32 -1.442695, %v5736_v21 }
 0xb45   : > { %v8950_v24 = vpop.eup %8949  ;;  %8969 = vrcp.f32 %v6039_v20  ;;  %v6040_v25 = vadd.f32 1.0, %v8948_v22 }
 0xb46   : > { %v8952_v27 = vpop.eup %8951  ;;  %8971 = vrcp.f32 %v6042_v23  ;;  %v6045_v28 = vadd.f32 1.0, %v8950_v24  ;;  %v8590_v31 = vpop.f32.mrb[112].mxu1 }
 0xb47   : > { %v8954_v32 = vpop.eup %8953  ;;  %8973 = vrcp.f32 %v6040_v25  ;;  %v5757_v34 = vadd.f32 %v8590_v31, %v10201_v8  ;;  %v5748_v35 = vpop.f32.mrb[113].mxu1 }
 0xb48   : > { %v8956_v36 = vpop.eup %8955  ;;  %8975 = vrcp.f32 %v6045_v28  ;;  %v8591_v10 = vpop.f32.mrb[114].mxu1  ;;  %v5749_v41 = vadd.f32 %v10201_v8, %v5748_v35 }
 0xb49   : > { %v8958_v38 = vpop.eup %8957  ;;  %v7061_v39 = vpack.c.bf16 %v8956_v36, %v8952_v27  ;;  %8977 = vpow2.f32 %v6818_v26  ;;  %v6824_v40 = vmul.f32 -1.442695, %v5757_v34  ;;  %v5751_v42 = vpop.f32.mrb[115].mxu1  ;;  %v5760_v44 = vadd.f32 %v8591_v10, %v10201_v8 }
 0xb4a   : > { %v8960_v60 = vpop.eup %8959  ;;  %v7056_v43 = vpack.c.bf16 %v8958_v38, %v8954_v32  ;;  %8979 = vpow2.f32 %v6821_v29  ;;  %v5752_v47 = vadd.f32 %v10201_v8, %v5751_v42  ;;  %v6822_v53 = vmul.f32 -1.442695, %v5749_v41 }
 0xb4b   : > { %v8962_v45 = vpop.eup %8961  ;;  %7149 = vst [vmem:[%s10221_s18 + $0x88] sm:$0xff] %v7061_v39   ;;  %v6043_v46 = vadd.f32 1.0, %v8960_v60  ;;  %8981 = vpow2.f32 %v6819_v50  ;;  %v6825_v57 = vmul.f32 -1.442695, %v5760_v44 }
 0xb4c   : > { %v8964_v48 = vpop.eup %8963  ;;  %7148 = vst [vmem:[%s10221_s18 + $0x80] sm:$0xff] %v7056_v43   ;;  %v6046_v49 = vadd.f32 1.0, %v8962_v45  ;;  %8983 = vpow2.f32 %v6824_v40  ;;  %v6823_v61 = vmul.f32 -1.442695, %v5752_v47 }
 0xb4d   : > { %v8966_v51 = vpop.eup %8965  ;;  %8985 = vrcp.f32 %v6043_v46  ;;  %v6044_v52 = vadd.f32 1.0, %v8964_v48 }
 0xb4e   : > { %v8968_v55 = vpop.eup %8967  ;;  %8987 = vrcp.f32 %v6046_v49  ;;  %v6049_v56 = vadd.f32 1.0, %v8966_v51  ;;  %v8594_v58 = vpop.f32.mrb[116].mxu1 }
 0xb4f   : > { %v8970_v59 = vpop.eup %8969  ;;  %8989 = vrcp.f32 %v6044_v52  ;;  %v5773_v14 = vadd.f32 %v8594_v58, %v10201_v8  ;;  %v5764_v16 = vpop.f32.mrb[117].mxu1 }
 0xb50   : > { %v8972_v62 = vpop.eup %8971  ;;  %8991 = vrcp.f32 %v6049_v56  ;;  %v5765_v63 = vadd.f32 %v10201_v8, %v5764_v16  ;;  %v8595_v0 = vpop.f32.mrb[118].mxu1 }
 0xb51   : > { %v8974_v1 = vpop.eup %8973  ;;  %v7071_v2 = vpack.c.bf16 %v8972_v62, %v8968_v55  ;;  %8993 = vpow2.f32 %v6822_v53  ;;  %v6828_v3 = vmul.f32 -1.442695, %v5773_v14  ;;  %v5767_v4 = vpop.f32.mrb[119].mxu1  ;;  %v5776_v9 = vadd.f32 %v8595_v0, %v10201_v8 }
 0xb52   : > { %v8976_v5 = vpop.eup %8975  ;;  %v7066_v6 = vpack.c.bf16 %v8974_v1, %v8970_v59  ;;  %8995 = vpow2.f32 %v6825_v57  ;;  %v6826_v7 = vmul.f32 -1.442695, %v5765_v63  ;;  %v5768_v12 = vadd.f32 %v10201_v8, %v5767_v4 }
 0xb53   : > { %v8978_v11 = vpop.eup %8977  ;;  %7151 = vst [vmem:[%s10221_s18 + $0x98] sm:$0xff] %v7071_v2   ;;  %8997 = vpow2.f32 %v6823_v61  ;;  %v6829_v54 = vmul.f32 -1.442695, %v5776_v9 }
 0xb54   : > { %v8980_v30 = vpop.eup %8979  ;;  %7150 = vst [vmem:[%s10221_s18 + $0x90] sm:$0xff] %v7066_v6   ;;  %v6047_v13 = vadd.f32 1.0, %v8978_v11  ;;  %8999 = vpow2.f32 %v6828_v3  ;;  %v6827_v21 = vmul.f32 -1.442695, %v5768_v12 }
 0xb55   : > { %v8982_v15 = vpop.eup %8981  ;;  %v6050_v37 = vadd.f32 1.0, %v8980_v30  ;;  %9001 = vpow2.f32 %v6826_v7 }
 0xb56   : > { %v8984_v33 = vpop.eup %8983  ;;  %9003 = vrcp.f32 %v6047_v13  ;;  %v6048_v17 = vadd.f32 1.0, %v8982_v15  ;;  %v8598_v18 = vpop.f32.mrb[120].mxu1 }
 0xb57   : > { %v8986_v19 = vpop.eup %8985  ;;  %9005 = vrcp.f32 %v6050_v37  ;;  %v6053_v20 = vadd.f32 1.0, %v8984_v33  ;;  %v5789_v22 = vadd.f32 %v8598_v18, %v10201_v8  ;;  %v5780_v23 = vpop.f32.mrb[121].mxu1 }
 0xb58   : > { %v8988_v24 = vpop.eup %8987  ;;  %9007 = vrcp.f32 %v6048_v17  ;;  %v5781_v25 = vadd.f32 %v10201_v8, %v5780_v23  ;;  %v8599_v26 = vpop.f32.mrb[122].mxu1 }
 0xb59   : > { %v8990_v27 = vpop.eup %8989  ;;  %v7081_v28 = vpack.c.bf16 %v8988_v24, %v8976_v5  ;;  %9009 = vrcp.f32 %v6053_v20  ;;  %v6832_v29 = vmul.f32 -1.442695, %v5789_v22  ;;  %v5783_v31 = vpop.f32.mrb[123].mxu1  ;;  %v5792_v36 = vadd.f32 %v8599_v26, %v10201_v8 }
 0xb5a   : > { %v8992_v32 = vpop.eup %8991  ;;  %v7076_v50 = vpack.c.bf16 %v8990_v27, %v8986_v19  ;;  %9011 = vpow2.f32 %v6829_v54  ;;  %v6830_v34 = vmul.f32 -1.442695, %v5781_v25  ;;  %v5784_v39 = vadd.f32 %v10201_v8, %v5783_v31 }
 0xb5b   : > { %v8994_v35 = vpop.eup %8993  ;;  %7153 = vst [vmem:[%s10221_s18 + $0xa8] sm:$0xff] %v7081_v28   ;;  %9013 = vpow2.f32 %v6827_v21  ;;  %v6833_v46 = vmul.f32 -1.442695, %v5792_v36 }
 0xb5c   : > { %v8996_v10 = vpop.eup %8995  ;;  %7152 = vst [vmem:[%s10221_s18 + $0xa0] sm:$0xff] %v7076_v50   ;;  %v6051_v38 = vadd.f32 1.0, %v8994_v35  ;;  %9015 = vpow2.f32 %v6832_v29  ;;  %v6831_v52 = vmul.f32 -1.442695, %v5784_v39 }
 0xb5d   : > { %v8998_v40 = vpop.eup %8997  ;;  %v6054_v41 = vadd.f32 1.0, %v8996_v10  ;;  %9017 = vpow2.f32 %v6830_v34 }
 0xb5e   : > { %v9000_v42 = vpop.eup %8999  ;;  %9019 = vrcp.f32 %v6051_v38  ;;  %v6052_v60 = vadd.f32 1.0, %v8998_v40  ;;  %v8602_v43 = vpop.f32.mrb[124].mxu1 }
 0xb5f   : > { %v9002_v44 = vpop.eup %9001  ;;  %9021 = vrcp.f32 %v6054_v41  ;;  %v6057_v45 = vadd.f32 1.0, %v9000_v42  ;;  %v5805_v47 = vadd.f32 %v8602_v43, %v10201_v8  ;;  %v5796_v48 = vpop.f32.mrb[125].mxu1 }
 0xb60   : > { %v9004_v49 = vpop.eup %9003  ;;  %9023 = vrcp.f32 %v6052_v60  ;;  %v6055_v51 = vadd.f32 1.0, %v9002_v44  ;;  %v5797_v53 = vadd.f32 %v10201_v8, %v5796_v48  ;;  %v8603_v55 = vpop.f32.mrb[126].mxu1 }
 0xb61   : > { %v9006_v56 = vpop.eup %9005  ;;  %9025 = vrcp.f32 %v6057_v45  ;;  %v6836_v57 = vmul.f32 -1.442695, %v5805_v47  ;;  %v5799_v58 = vpop.f32.mrb[127].mxu1  ;;  %v5808_v63 = vadd.f32 %v8603_v55, %v10201_v8 }
 0xb62   : > { %v9008_v59 = vpop.eup %9007  ;;  %v7091_v61 = vpack.c.bf16 %v9006_v56, %v8992_v32  ;;  %9027 = vrcp.f32 %v6055_v51  ;;  %v6834_v14 = vmul.f32 -1.442695, %v5797_v53  ;;  %v5800_v1 = vadd.f32 %v10201_v8, %v5799_v58 }
 0xb63   : > { %v9010_v16 = vpop.eup %9009  ;;  %v7086_v62 = vpack.c.bf16 %v9008_v59, %v9004_v49  ;;  %9029 = vpow2.f32 %v6833_v46  ;;  %v6837_v7 = vmul.f32 -1.442695, %v5808_v63 }
 0xb64   : > { %v9012_v0 = vpop.eup %9011  ;;  %7155 = vst [vmem:[%s10221_s18 + $0xb8] sm:$0xff] %v7091_v61   ;;  %9031 = vpow2.f32 %v6831_v52  ;;  %v6835_v11 = vmul.f32 -1.442695, %v5800_v1 }
 0xb65   : > { %v9014_v2 = vpop.eup %9013  ;;  %7154 = vst [vmem:[%s10221_s18 + $0xb0] sm:$0xff] %v7086_v62   ;;  %v6058_v3 = vadd.f32 1.0, %v9012_v0  ;;  %9033 = vpow2.f32 %v6836_v57 }
 0xb66   : > { %v9016_v4 = vpop.eup %9015  ;;  %v6056_v5 = vadd.f32 1.0, %v9014_v2  ;;  %9035 = vpow2.f32 %v6834_v14 }
 0xb67   : > { %v9018_v6 = vpop.eup %9017  ;;  %9037 = vrcp.f32 %v6058_v3  ;;  %v6061_v15 = vadd.f32 1.0, %v9016_v4 }
 0xb68   : > { %v9020_v9 = vpop.eup %9019  ;;  %9039 = vrcp.f32 %v6056_v5  ;;  %v6059_v33 = vadd.f32 1.0, %v9018_v6 }
 0xb69   : > { %v9022_v12 = vpop.eup %9021  ;;  %9041 = vpow2.f32 %v6837_v7 }
 0xb6a   : > { %v9024_v30 = vpop.eup %9023  ;;  %v7101_v13 = vpack.c.bf16 %v9022_v12, %v9010_v16  ;;  %9043 = vpow2.f32 %v6835_v11 }
 0xb6b   : > { %v9026_v8 = vpop.eup %9025  ;;  %v7096_v37 = vpack.c.bf16 %v9024_v30, %v9020_v9  ;;  %9045 = vrcp.f32 %v6061_v15 }
 0xb6c   : > { %v9028_v17 = vpop.eup %9027  ;;  %7157 = vst [vmem:[%s10221_s18 + $0xc8] sm:$0xff] %v7101_v13   ;;  %9047 = vrcp.f32 %v6059_v33 }
 0xb6d   : > { %v9030_v54 = vpop.eup %9029  ;;  %7156 = vst [vmem:[%s10221_s18 + $0xc0] sm:$0xff] %v7096_v37  }
 0xb6e   : > { %v9032_v18 = vpop.eup %9031  ;;  %v6062_v19 = vadd.f32 1.0, %v9030_v54 }
 0xb6f   : > { %v9034_v20 = vpop.eup %9033  ;;  %v6060_v21 = vadd.f32 1.0, %v9032_v18 }
 0xb70   : > { %v9036_v22 = vpop.eup %9035  ;;  %9049 = vrcp.f32 %v6062_v19  ;;  %v6065_v26 = vadd.f32 1.0, %v9034_v20 }
 0xb71   : > { %v9038_v23 = vpop.eup %9037  ;;  %9051 = vrcp.f32 %v6060_v21  ;;  %v6063_v28 = vadd.f32 1.0, %v9036_v22 }
 0xb72   : > { %v9040_v24 = vpop.eup %9039  ;;  %v7111_v25 = vpack.c.bf16 %v9038_v23, %v9026_v8  ;;  %9053 = vrcp.f32 %v6065_v26 }
 0xb73   : > { %v7106_v27 = vpack.c.bf16 %v9040_v24, %v9028_v17  ;;  %v9042_v29 = vpop.eup %9041  ;;  %9055 = vrcp.f32 %v6063_v28 }
 0xb74   : > { %7159 = vst [vmem:[%s10221_s18 + $0xd8] sm:$0xff] %v7111_v25   ;;  %v9044_v31 = vpop.eup %9043  ;;  %v6066_v32 = vadd.f32 1.0, %v9042_v29 }
 0xb75   : > { %7158 = vst [vmem:[%s10221_s18 + $0xd0] sm:$0xff] %v7106_v27   ;;  %v6064_v50 = vadd.f32 1.0, %v9044_v31  ;;  %v9046_v34 = vpop.eup %9045 }
 0xb76   : > { %9057 = vrcp.f32 %v6066_v32  ;;  %v9048_v35 = vpop.eup %9047 }
 0xb77   : > { %9059 = vrcp.f32 %v6064_v50 }
 0xb7a   : > { %v9050_v36 = vpop.eup %9049 }
 0xb7b   : > { %v9052_v10 = vpop.eup %9051  ;;  %v7121_v38 = vpack.c.bf16 %v9050_v36, %v9046_v34 }
 0xb7c   : > { %v7116_v39 = vpack.c.bf16 %v9052_v10, %v9048_v35  ;;  %v9054_v40 = vpop.eup %9053 }
 0xb7d   : > { %7161 = vst [vmem:[%s10221_s18 + $0xe8] sm:$0xff] %v7121_v38   ;;  %v9056_v41 = vpop.eup %9055 }
 0xb7e   : > { %7160 = vst [vmem:[%s10221_s18 + $0xe0] sm:$0xff] %v7116_v39  }
 0xb80   : > { %v9058_v42 = vpop.eup %9057 }
 0xb81   : > { %v9060_v60 = vpop.eup %9059  ;;  %v7131_v43 = vpack.c.bf16 %v9058_v42, %v9054_v40 }
 0xb82   : > { %v7126_v44 = vpack.c.bf16 %v9060_v60, %v9056_v41 }
 0xb83   : > { %7163 = vst [vmem:[%s10221_s18 + $0xf8] sm:$0xff] %v7131_v43  }
 0xb84   : > { %7162 = vst [vmem:[%s10221_s18 + $0xf0] sm:$0xff] %v7126_v44  }
 0xb85   : > { %9160 = shalt.err (!%p9157_p1)
}
 0xb86   : > { %s9161_s23 = scalar_lea.hbm %s10306_s22, 4096  ;;  %s9165_s28 = scalar_lea.hbm %s10357_s3, 8192 }
 0xb87   : > { %p9162_p13 = scmp.ne.s32.totalorder %s10306_s22, %s9161_s23  ;;  %p9166_p4 = scmp.lt.u32.totalorder %s10306_s22, %s10357_s3 }
 0xb88   : > { %p9167_p7 = scmp.lt.u32.totalorder %s9165_s28, %s9161_s23  ;;  %p9169_p11 = scmp.lt.u32.totalorder %s9161_s23, %s10306_s22 }
 0xb89   : > { %p9163_p6 = pnand %p9162_p13, %p10371_p0 }
 0xb8a   : > { %p9168_p8 = por %p9167_p7, %p9166_p4 }
 0xb8b   : > { %p9164_p10 = pneg %p9163_p6 }
 0xb8c   : > { %p9170_p2 = por %p9169_p11, %p9168_p8 }
 0xb8e   : > { %p9171_p3 = pnand %p9170_p2, %p9164_p10 }
 0xb90   : > { %9174 = shalt.err (!%p9171_p3)
}
 0xb91   : > { %s9227_s29 = smov 64   ;;  %s9228_s18 = smov 4  }
 0xb92   : > { %8614 = dma.vmem_to_hbm [thread:$0]  (%p10371_p0), %s10308_s7, 4096, %s10306_s22, %s6516_s30, %s9227_s29, %s9227_s29, %s9228_s18  }
 0xb93 PF: > { %s6544_s20 = sand.u32 1, %s9205_s12   ;;  %p10372_p5 = scmp.ne.s32.totalorder %s10362_s19, 0 }
 0xb94   : > { %p10373_p9 = scmp.ge.s32.totalorder %s9217_s15, 2  ;;  %s6545_s8 = scalar_lea.sflag [#allocation4], %s6544_s20 }
 0xb96   : > { %p8628_p12 = pnand %p10373_p9, %p10372_p5 }
 0xb98   : > { %9200 = dma.done.wait (!%p8628_p12), %s6545_s8, 4096  }
 0xb99   : > { %9202 = vsyncadd (!%p8628_p12), %s6545_s8, 4294963200  ;;  %p17_p1 = scmp.ge.s32.totalorder %s9362_s6, 4   ;;  %s10374_s12 = smov %s9209_s13 }
 0xb9a   : > { %s10375_s13 = smov %s9213_s14  ;;  %s10376_s14 = smov %s9371_s11 }
 0xb9b   : > { %s10377_s15 = smov %s9362_s6  ;;  %19 = sbr.rel (!%p17_p1) target bundleno = 6 (0x6), region = 107 }
 0xba2   :  { %6550 = vsyncpa [#allocation3], 1 }
 0xba3   :  { %6552 = vsyncpa [#allocation3 + $0x1], 1 }
 0xba4   :  { %6553 = vsyncpa [#allocation6], 1 }
 0xba5   :  { %6554 = vsyncpa [#allocation4], 1 }
 0xba6   :  { %6556 = vsyncpa [#allocation4 + $0x1], 1 }

</bundles_post_ra>
